<compile_context>
chip_gen: v7x
topology: tpu7x:2x2x1
jax: 0.10.0
libtpu: 0.0.40
codegen_flags: <defaults>
</compile_context>

<pallas_src>
import math

import jax
import jax.numpy as jnp
from jax.experimental import pallas as pl
from jax.experimental.pallas import tpu as pltpu


_INV_SQRT2 = 0.7071067811865476
_LANE = 128
_MIN_BM = 8      # sublane multiple
_MAX_BM = 512    # keeps double-buffered tiles + weights well inside v5e scoped VMEM


def _gelu(v):
    # exact GELU (matches torch.nn.GELU() default): 0.5*x*(1+erf(x/sqrt(2)))
    return 0.5 * v * (1.0 + jax.lax.erf(v * _INV_SQRT2))


def _round_up(n, m):
    return ((n + m - 1) // m) * m


# ----------------------------- fused Pallas kernel ---------------------------

def _fused_forward_kernel(x_ref,
                          m1_ref, b1_ref,
                          m2_ref, b2_ref,
                          m3_ref, b3_ref,
                          m4_ref, b4_ref,
                          wf_ref, bf_ref,
                          o_ref):
    """x: (bm, 896) f32 -> o: (bm, 128) f32.  Five chained lane-dense matmuls.

    Weights live in VMEM as bf16; activations are cast to bf16 right before each
    MXU matmul and accumulated in f32; bias-add and GELU stay f32 on the VPU."""

    def stage(y, m_ref, b_ref, act):
        z = jnp.dot(y.astype(jnp.bfloat16), m_ref[...],
                    preferred_element_type=jnp.float32) + b_ref[...]
        return _gelu(z) if act else z

    y = x_ref[...]
    y = stage(y, m1_ref, b1_ref, True)
    y = stage(y, m2_ref, b2_ref, True)
    y = stage(y, m3_ref, b3_ref, True)
    y = stage(y, m4_ref, b4_ref, True)
    o_ref[...] = stage(y, wf_ref, bf_ref, False)


# -------------------- weight preprocessing (once per params) -----------------

def _im2col(x, k=3, stride=2, pad=1):
    """x: (B, C, H, W) -> patches (B*Ho*Wo, C*k*k), Ho, Wo.  (c, kh, kw) order."""
    B, C, H, W = x.shape
    Ho = (H + 2 * pad - k) // stride + 1
    Wo = (W + 2 * pad - k) // stride + 1
    xp = jnp.pad(x, ((0, 0), (0, 0), (pad, pad), (pad, pad)))
    cols = []
    for kh in range(k):
        for kw in range(k):
            cols.append(
                xp[:, :, kh:kh + stride * Ho:stride, kw:kw + stride * Wo:stride]
            )
    patches = jnp.stack(cols, axis=2)                   # (B, C, k*k, Ho, Wo)
    patches = patches.reshape(B, C * k * k, Ho, Wo)
    patches = patches.transpose(0, 2, 3, 1).reshape(B * Ho * Wo, C * k * k)
    return patches, Ho, Wo


def _conv_to_matrix(w, H, W):
    """Fold Conv2d(k=3,s=2,p=1) with weight w (Cout,Cin,3,3) acting on (Cin,H,W)
    into a dense matrix M of shape (Cin*H*W, Cout*Ho*Wo) in NCHW flat order, so
    conv(x).flatten() == x.flatten() @ M (bias excluded).  Numerically exact."""
    Cout, Cin = w.shape[0], w.shape[1]
    eye = jnp.eye(Cin * H * W, dtype=jnp.float32).reshape(Cin * H * W, Cin, H, W)
    patches, Ho, Wo = _im2col(eye)                      # (Cin*H*W*Ho*Wo, Cin*9)
    y = patches @ w.reshape(Cout, -1).T.astype(jnp.float32)
    y = y.reshape(Cin * H * W, Ho, Wo, Cout).transpose(0, 3, 1, 2)
    return y.reshape(Cin * H * W, Cout * Ho * Wo), Ho, Wo


def _pad2d(a, rows, cols):
    return jnp.pad(a, ((0, rows - a.shape[0]), (0, cols - a.shape[1])))


def prepare_fused_params(params):
    """Fold convs + fc into dense (K_pad, N_pad) bf16 matrices and f32 bias rows.

    Every K / N is zero-padded to a multiple of 128 so all in-kernel matmuls and
    stores are lane-dense.  Done once per set of weights, never per input."""
    ops = []
    H = W = 28
    k_pad = _round_up(28 * 28, _LANE)                   # 784 -> 896
    for (w, b) in params["convs"]:
        M, Ho, Wo = _conv_to_matrix(w, H, W)            # (Cin*H*W, Cout*Ho*Wo)
        n_pad = _round_up(M.shape[1], _LANE)            # 588->640,147->256,48->128,12->128
        Mp = _pad2d(M, k_pad, n_pad).astype(jnp.bfloat16)
        bias = jnp.repeat(b.astype(jnp.float32), Ho * Wo)
        bias = jnp.pad(bias, (0, n_pad - bias.shape[0])).reshape(1, n_pad)
        ops.append((Mp, bias))
        H, W = Ho, Wo
        k_pad = n_pad
    w_fc, b_fc = params["fc"]                           # (10, 12), (10,)
    n_pad = _round_up(10, _LANE)                        # 128
    Wf = _pad2d(w_fc.T.astype(jnp.float32), k_pad, n_pad).astype(jnp.bfloat16)
    bf = jnp.pad(b_fc.astype(jnp.float32), (0, n_pad - 10)).reshape(1, n_pad)
    ops.append((Wf, bf))
    return ops


# --------------------------------- forward -----------------------------------

def _batch_tiling(B):
    """(bm, Bp): batch-tile rows and zero-padded batch size.

    Always >= 2 grid steps so the "parallel" batch axis can shard across v7x's
    two TensorCores; bm capped at 512 so double-buffered x/out tiles + weights
    stay inside v5e's scoped-VMEM budget."""
    bm = min(_MAX_BM, max(_MIN_BM, _round_up(pl.cdiv(B, 2), _MIN_BM)))
    Bp = _round_up(B, bm)
    if Bp // bm < 2:
        Bp = 2 * bm
    return bm, Bp


def mnist_classifier_cnn_forward(x, fused_ops):
    assert x.ndim == 4 and x.shape[1:] == (1, 28, 28)
    B = x.shape[0]
    (m1, b1), (m2, b2), (m3, b3), (m4, b4), (wf, bf) = fused_ops
    f_in, f_out = m1.shape[0], wf.shape[1]              # 896, 128

    bm, Bp = _batch_tiling(B)
    grid = (Bp // bm,)

    # Flatten NCHW and zero-pad batch rows + feature columns (exact: the extra
    # weight rows are zero).
    x_flat = x.reshape(B, 28 * 28).astype(jnp.float32)
    x_pad = jnp.zeros((Bp, f_in), jnp.float32).at[:B, :28 * 28].set(x_flat)

    mats = (m1, m2, m3, m4, wf)
    biases = (b1, b2, b3, b4, bf)
    weights = (m1, b1, m2, b2, m3, b3, m4, b4, wf, bf)

    # VMEM budget: double-buffered x/out tiles, weights (x2 in case the
    # single-buffer request is unsupported), f32 intermediates; 2x headroom,
    # clamped to [16, 32] MiB so it is valid on v5e/v6e/v7x alike.
    weight_bytes = sum(int(a.size) * a.dtype.itemsize for a in weights)
    tile_bytes = 2 * bm * (f_in + f_out) * 4
    interm_bytes = bm * sum(int(m.shape[1]) for m in mats) * 4
    vmem_limit = int(min(32 << 20,
                         max(16 << 20,
                             2 * (2 * weight_bytes + tile_bytes + interm_bytes))))

    flops = 2 * Bp * sum(int(m.shape[0] * m.shape[1]) for m in mats)
    transcendentals = Bp * sum(int(b.shape[1]) for b in biases[:4])
    bytes_accessed = int(x_pad.size) * 4 + Bp * f_out * 4 + weight_bytes

    def _resident(arr, single_buffer):
        # Whole-array block, same block every grid step (weights / bias rows).
        nd = arr.ndim

        def imap(i):
            return (0,) * nd

        if single_buffer:
            return pl.BlockSpec(arr.shape, imap, pipeline_mode=pl.Buffered(1))
        return pl.BlockSpec(arr.shape, imap)

    def _run(single_buffer_weights):
        in_specs = [pl.BlockSpec((bm, f_in), lambda i: (i, 0))]
        in_specs += [_resident(a, single_buffer_weights) for a in weights]
        call = pl.pallas_call(
            _fused_forward_kernel,
            out_shape=jax.ShapeDtypeStruct((Bp, f_out), jnp.float32),
            grid=grid,
            in_specs=in_specs,
            out_specs=pl.BlockSpec((bm, f_out), lambda i: (i, 0)),
            compiler_params=pltpu.CompilerParams(
                dimension_semantics=("parallel",),
                vmem_limit_bytes=vmem_limit),
            cost_estimate=pl.CostEstimate(flops=flops,
                                          transcendentals=transcendentals,
                                          bytes_accessed=bytes_accessed),
        )
        return jax.block_until_ready(call(x_pad, *weights))

    try:
        out = _run(single_buffer_weights=True)
    except Exception:
        # pipeline_mode=pl.Buffered(1) unsupported on this jax version/backend;
        # default double-buffered constant blocks only cost ~1.6 MiB extra VMEM.
        out = _run(single_buffer_weights=False)

    return out[:B, :10]


# --------------------------- deterministic params ----------------------------

def init_params(key):
    nc = 3
    keys = jax.random.split(key, 10)
    convs = []
    in_ch = 1
    ki = 0
    for _ in range(4):
        fan_in = in_ch * 3 * 3
        bound = 1.0 / math.sqrt(fan_in)
        w = jax.random.uniform(keys[ki], (nc, in_ch, 3, 3), jnp.float32, -bound, bound)
        b = jax.random.uniform(keys[ki + 1], (nc,), jnp.float32, -bound, bound)
        convs.append((w, b))
        in_ch = nc
        ki += 2
    fan_in = 4 * nc
    bound = 1.0 / math.sqrt(fan_in)
    w_fc = jax.random.uniform(keys[8], (10, 4 * nc), jnp.float32, -bound, bound)
    b_fc = jax.random.uniform(keys[9], (10,), jnp.float32, -bound, bound)
    return {"convs": convs, "fc": (w_fc, b_fc)}


# ------------------------------ reference (jnp) -------------------------------

def _reference_forward(x, params):
    B = x.shape[0]
    y = x
    for (w, b) in params["convs"]:
        patches, Ho, Wo = _im2col(y)
        z = patches @ w.reshape(w.shape[0], -1).T + b
        z = _gelu(z)
        y = z.reshape(B, Ho, Wo, w.shape[0]).transpose(0, 3, 1, 2)
    y = y.reshape(B, -1)
    w_fc, b_fc = params["fc"]
    return y @ w_fc.T + b_fc


# ----------------------------------- main -------------------------------------

if __name__ == "__main__":
    key = jax.random.PRNGKey(0)
    k_x, k_p = jax.random.split(key)
    x = jax.random.normal(k_x, (2, 1, 28, 28), dtype=jnp.float32)
    params = init_params(k_p)
    fused_ops = prepare_fused_params(params)   # one-time weight preprocessing

    out = jax.block_until_ready(mnist_classifier_cnn_forward(x, fused_ops))
    assert out.shape == (2, 10), out.shape

    ref = jax.block_until_ready(_reference_forward(x, params))
    # bf16 weight storage (f32 accumulate) => ~1e-3-level deviation vs f32 ref.
    assert jnp.allclose(out, ref, atol=3e-2, rtol=3e-2), (out, ref)

    print("KERNEL_OK")
</pallas_src>

<mosaic_0001>
module attributes {stable_mosaic.version = 11 : i64} {
  func.func @_fused_forward_kernel(%arg0: i32, %arg1: memref<8x896xf32, #tpu.memory_space<vmem>>, %arg2: memref<896x640xbf16, #tpu.memory_space<vmem>>, %arg3: memref<1x640xf32, #tpu.memory_space<vmem>>, %arg4: memref<640x256xbf16, #tpu.memory_space<vmem>>, %arg5: memref<1x256xf32, #tpu.memory_space<vmem>>, %arg6: memref<256x128xbf16, #tpu.memory_space<vmem>>, %arg7: memref<1x128xf32, #tpu.memory_space<vmem>>, %arg8: memref<128x128xbf16, #tpu.memory_space<vmem>>, %arg9: memref<1x128xf32, #tpu.memory_space<vmem>>, %arg10: memref<128x128xbf16, #tpu.memory_space<vmem>>, %arg11: memref<1x128xf32, #tpu.memory_space<vmem>>, %arg12: memref<8x128xf32, #tpu.memory_space<vmem>>) attributes {dimension_semantics = [#tpu.dimension_semantics<parallel>], iteration_bounds = array<i64: 2>, scalar_prefetch = 0 : i64, scratch_operands = 0 : i64, tpu.core_type = #tpu.core_type<tc>, window_params = [{transform_indices = @transform_0, window_bounds = array<i64: 8, 896>}, {pipeline_mode = #tpu.pipeline_mode<synchronous>, transform_indices = @transform_1, window_bounds = array<i64: 896, 640>}, {pipeline_mode = #tpu.pipeline_mode<synchronous>, transform_indices = @transform_2, window_bounds = array<i64: 1, 640>}, {pipeline_mode = #tpu.pipeline_mode<synchronous>, transform_indices = @transform_3, window_bounds = array<i64: 640, 256>}, {pipeline_mode = #tpu.pipeline_mode<synchronous>, transform_indices = @transform_4, window_bounds = array<i64: 1, 256>}, {pipeline_mode = #tpu.pipeline_mode<synchronous>, transform_indices = @transform_5, window_bounds = array<i64: 256, 128>}, {pipeline_mode = #tpu.pipeline_mode<synchronous>, transform_indices = @transform_6, window_bounds = array<i64: 1, 128>}, {pipeline_mode = #tpu.pipeline_mode<synchronous>, transform_indices = @transform_7, window_bounds = array<i64: 128, 128>}, {pipeline_mode = #tpu.pipeline_mode<synchronous>, transform_indices = @transform_8, window_bounds = array<i64: 1, 128>}, {pipeline_mode = #tpu.pipeline_mode<synchronous>, transform_indices = @transform_9, window_bounds = array<i64: 128, 128>}, {pipeline_mode = #tpu.pipeline_mode<synchronous>, transform_indices = @transform_10, window_bounds = array<i64: 1, 128>}, {transform_indices = @transform_11, window_bounds = array<i64: 8, 128>}]} {
    %c0 = arith.constant 0 : index
    %c0_0 = arith.constant 0 : index
    %0 = vector.load %arg1[%c0, %c0_0] : memref<8x896xf32, #tpu.memory_space<vmem>>, vector<8x896xf32>
    %1 = arith.truncf %0 : vector<8x896xf32> to vector<8x896xbf16>
    %c0_1 = arith.constant 0 : index
    %c0_2 = arith.constant 0 : index
    %2 = vector.load %arg2[%c0_1, %c0_2] : memref<896x640xbf16, #tpu.memory_space<vmem>>, vector<896x640xbf16>
    %cst = arith.constant dense<0.000000e+00> : vector<8x640xf32>
    %3 = tpu.matmul %1, %2, %cst {dimension_numbers = #tpu.dot_dimension_numbers<[1], [0], [0], [1], [0, 0, 1, 1], [], []>} : vector<8x896xbf16>, vector<896x640xbf16>, vector<8x640xf32> -> vector<8x640xf32>
    %c0_3 = arith.constant 0 : index
    %c0_4 = arith.constant 0 : index
    %4 = vector.load %arg3[%c0_3, %c0_4] : memref<1x640xf32, #tpu.memory_space<vmem>>, vector<1x640xf32>
    %5 = vector.broadcast %4 : vector<1x640xf32> to vector<8x640xf32>
    %6 = arith.addf %3, %5 : vector<8x640xf32>
    %cst_5 = arith.constant 5.000000e-01 : f32
    %7 = vector.broadcast %cst_5 : f32 to vector<8x640xf32>
    %8 = arith.mulf %7, %6 : vector<8x640xf32>
    %cst_6 = arith.constant 0.707106769 : f32
    %9 = vector.broadcast %cst_6 : f32 to vector<8x640xf32>
    %10 = arith.mulf %6, %9 : vector<8x640xf32>
    %11 = math.erf %10 : vector<8x640xf32>
    %cst_7 = arith.constant 1.000000e+00 : f32
    %12 = vector.broadcast %cst_7 : f32 to vector<8x640xf32>
    %13 = arith.addf %12, %11 : vector<8x640xf32>
    %14 = arith.mulf %8, %13 : vector<8x640xf32>
    %15 = arith.truncf %14 : vector<8x640xf32> to vector<8x640xbf16>
    %c0_8 = arith.constant 0 : index
    %c0_9 = arith.constant 0 : index
    %16 = vector.load %arg4[%c0_8, %c0_9] : memref<640x256xbf16, #tpu.memory_space<vmem>>, vector<640x256xbf16>
    %cst_10 = arith.constant dense<0.000000e+00> : vector<8x256xf32>
    %17 = tpu.matmul %15, %16, %cst_10 {dimension_numbers = #tpu.dot_dimension_numbers<[1], [0], [0], [1], [0, 0, 1, 1], [], []>} : vector<8x640xbf16>, vector<640x256xbf16>, vector<8x256xf32> -> vector<8x256xf32>
    %c0_11 = arith.constant 0 : index
    %c0_12 = arith.constant 0 : index
    %18 = vector.load %arg5[%c0_11, %c0_12] : memref<1x256xf32, #tpu.memory_space<vmem>>, vector<1x256xf32>
    %19 = vector.broadcast %18 : vector<1x256xf32> to vector<8x256xf32>
    %20 = arith.addf %17, %19 : vector<8x256xf32>
    %cst_13 = arith.constant 5.000000e-01 : f32
    %21 = vector.broadcast %cst_13 : f32 to vector<8x256xf32>
    %22 = arith.mulf %21, %20 : vector<8x256xf32>
    %cst_14 = arith.constant 0.707106769 : f32
    %23 = vector.broadcast %cst_14 : f32 to vector<8x256xf32>
    %24 = arith.mulf %20, %23 : vector<8x256xf32>
    %25 = math.erf %24 : vector<8x256xf32>
    %cst_15 = arith.constant 1.000000e+00 : f32
    %26 = vector.broadcast %cst_15 : f32 to vector<8x256xf32>
    %27 = arith.addf %26, %25 : vector<8x256xf32>
    %28 = arith.mulf %22, %27 : vector<8x256xf32>
    %29 = arith.truncf %28 : vector<8x256xf32> to vector<8x256xbf16>
    %c0_16 = arith.constant 0 : index
    %c0_17 = arith.constant 0 : index
    %30 = vector.load %arg6[%c0_16, %c0_17] : memref<256x128xbf16, #tpu.memory_space<vmem>>, vector<256x128xbf16>
    %cst_18 = arith.constant dense<0.000000e+00> : vector<8x128xf32>
    %31 = tpu.matmul %29, %30, %cst_18 {dimension_numbers = #tpu.dot_dimension_numbers<[1], [0], [0], [1], [0, 0, 1, 1], [], []>} : vector<8x256xbf16>, vector<256x128xbf16>, vector<8x128xf32> -> vector<8x128xf32>
    %c0_19 = arith.constant 0 : index
    %c0_20 = arith.constant 0 : index
    %32 = vector.load %arg7[%c0_19, %c0_20] : memref<1x128xf32, #tpu.memory_space<vmem>>, vector<1x128xf32>
    %33 = vector.broadcast %32 : vector<1x128xf32> to vector<8x128xf32>
    %34 = arith.addf %31, %33 : vector<8x128xf32>
    %cst_21 = arith.constant 5.000000e-01 : f32
    %35 = vector.broadcast %cst_21 : f32 to vector<8x128xf32>
    %36 = arith.mulf %35, %34 : vector<8x128xf32>
    %cst_22 = arith.constant 0.707106769 : f32
    %37 = vector.broadcast %cst_22 : f32 to vector<8x128xf32>
    %38 = arith.mulf %34, %37 : vector<8x128xf32>
    %39 = math.erf %38 : vector<8x128xf32>
    %cst_23 = arith.constant 1.000000e+00 : f32
    %40 = vector.broadcast %cst_23 : f32 to vector<8x128xf32>
    %41 = arith.addf %40, %39 : vector<8x128xf32>
    %42 = arith.mulf %36, %41 : vector<8x128xf32>
    %43 = arith.truncf %42 : vector<8x128xf32> to vector<8x128xbf16>
    %c0_24 = arith.constant 0 : index
    %c0_25 = arith.constant 0 : index
    %44 = vector.load %arg8[%c0_24, %c0_25] : memref<128x128xbf16, #tpu.memory_space<vmem>>, vector<128x128xbf16>
    %cst_26 = arith.constant dense<0.000000e+00> : vector<8x128xf32>
    %45 = tpu.matmul %43, %44, %cst_26 {dimension_numbers = #tpu.dot_dimension_numbers<[1], [0], [0], [1], [0, 0, 1, 1], [], []>} : vector<8x128xbf16>, vector<128x128xbf16>, vector<8x128xf32> -> vector<8x128xf32>
    %c0_27 = arith.constant 0 : index
    %c0_28 = arith.constant 0 : index
    %46 = vector.load %arg9[%c0_27, %c0_28] : memref<1x128xf32, #tpu.memory_space<vmem>>, vector<1x128xf32>
    %47 = vector.broadcast %46 : vector<1x128xf32> to vector<8x128xf32>
    %48 = arith.addf %45, %47 : vector<8x128xf32>
    %cst_29 = arith.constant 5.000000e-01 : f32
    %49 = vector.broadcast %cst_29 : f32 to vector<8x128xf32>
    %50 = arith.mulf %49, %48 : vector<8x128xf32>
    %cst_30 = arith.constant 0.707106769 : f32
    %51 = vector.broadcast %cst_30 : f32 to vector<8x128xf32>
    %52 = arith.mulf %48, %51 : vector<8x128xf32>
    %53 = math.erf %52 : vector<8x128xf32>
    %cst_31 = arith.constant 1.000000e+00 : f32
    %54 = vector.broadcast %cst_31 : f32 to vector<8x128xf32>
    %55 = arith.addf %54, %53 : vector<8x128xf32>
    %56 = arith.mulf %50, %55 : vector<8x128xf32>
    %57 = arith.truncf %56 : vector<8x128xf32> to vector<8x128xbf16>
    %c0_32 = arith.constant 0 : index
    %c0_33 = arith.constant 0 : index
    %58 = vector.load %arg10[%c0_32, %c0_33] : memref<128x128xbf16, #tpu.memory_space<vmem>>, vector<128x128xbf16>
    %cst_34 = arith.constant dense<0.000000e+00> : vector<8x128xf32>
    %59 = tpu.matmul %57, %58, %cst_34 {dimension_numbers = #tpu.dot_dimension_numbers<[1], [0], [0], [1], [0, 0, 1, 1], [], []>} : vector<8x128xbf16>, vector<128x128xbf16>, vector<8x128xf32> -> vector<8x128xf32>
    %c0_35 = arith.constant 0 : index
    %c0_36 = arith.constant 0 : index
    %60 = vector.load %arg11[%c0_35, %c0_36] : memref<1x128xf32, #tpu.memory_space<vmem>>, vector<1x128xf32>
    %61 = vector.broadcast %60 : vector<1x128xf32> to vector<8x128xf32>
    %62 = arith.addf %59, %61 : vector<8x128xf32>
    %c0_37 = arith.constant 0 : index
    %c0_38 = arith.constant 0 : index
    %63 = vector.load %arg12[%c0_37, %c0_38] : memref<8x128xf32, #tpu.memory_space<vmem>>, vector<8x128xf32>
    tpu.vector_store %arg12[%c0_37, %c0_38], %62 {strides = array<i32>} : memref<8x128xf32, #tpu.memory_space<vmem>>, vector<8x128xf32>,
    return
  }
  func.func @transform_0(%arg0: i32) -> (i32, i32) {
    %c0_i32 = arith.constant 0 : i32
    %c0_i32_0 = arith.constant 0 : i32
    return %arg0, %c0_i32 : i32, i32
  }
  func.func @transform_1(%arg0: i32) -> (i32, i32) {
    %c0_i32 = arith.constant 0 : i32
    %c0_i32_0 = arith.constant 0 : i32
    %c0_i32_1 = arith.constant 0 : i32
    return %c0_i32, %c0_i32_0 : i32, i32
  }
  func.func @transform_2(%arg0: i32) -> (i32, i32) {
    %c0_i32 = arith.constant 0 : i32
    %c0_i32_0 = arith.constant 0 : i32
    %c0_i32_1 = arith.constant 0 : i32
    return %c0_i32, %c0_i32_0 : i32, i32
  }
  func.func @transform_3(%arg0: i32) -> (i32, i32) {
    %c0_i32 = arith.constant 0 : i32
    %c0_i32_0 = arith.constant 0 : i32
    %c0_i32_1 = arith.constant 0 : i32
    return %c0_i32, %c0_i32_0 : i32, i32
  }
  func.func @transform_4(%arg0: i32) -> (i32, i32) {
    %c0_i32 = arith.constant 0 : i32
    %c0_i32_0 = arith.constant 0 : i32
    %c0_i32_1 = arith.constant 0 : i32
    return %c0_i32, %c0_i32_0 : i32, i32
  }
  func.func @transform_5(%arg0: i32) -> (i32, i32) {
    %c0_i32 = arith.constant 0 : i32
    %c0_i32_0 = arith.constant 0 : i32
    %c0_i32_1 = arith.constant 0 : i32
    return %c0_i32, %c0_i32_0 : i32, i32
  }
  func.func @transform_6(%arg0: i32) -> (i32, i32) {
    %c0_i32 = arith.constant 0 : i32
    %c0_i32_0 = arith.constant 0 : i32
    %c0_i32_1 = arith.constant 0 : i32
    return %c0_i32, %c0_i32_0 : i32, i32
  }
  func.func @transform_7(%arg0: i32) -> (i32, i32) {
    %c0_i32 = arith.constant 0 : i32
    %c0_i32_0 = arith.constant 0 : i32
    %c0_i32_1 = arith.constant 0 : i32
    return %c0_i32, %c0_i32_0 : i32, i32
  }
  func.func @transform_8(%arg0: i32) -> (i32, i32) {
    %c0_i32 = arith.constant 0 : i32
    %c0_i32_0 = arith.constant 0 : i32
    %c0_i32_1 = arith.constant 0 : i32
    return %c0_i32, %c0_i32_0 : i32, i32
  }
  func.func @transform_9(%arg0: i32) -> (i32, i32) {
    %c0_i32 = arith.constant 0 : i32
    %c0_i32_0 = arith.constant 0 : i32
    %c0_i32_1 = arith.constant 0 : i32
    return %c0_i32, %c0_i32_0 : i32, i32
  }
  func.func @transform_10(%arg0: i32) -> (i32, i32) {
    %c0_i32 = arith.constant 0 : i32
    %c0_i32_0 = arith.constant 0 : i32
    %c0_i32_1 = arith.constant 0 : i32
    return %c0_i32, %c0_i32_0 : i32, i32
  }
  func.func @transform_11(%arg0: i32) -> (i32, i32) {
    %c0_i32 = arith.constant 0 : i32
    %c0_i32_0 = arith.constant 0 : i32
    return %arg0, %c0_i32 : i32, i32
  }
}

module attributes {stable_mosaic.version = 11 : i64} {
  func.func @_fused_forward_kernel(%arg0: i32, %arg1: memref<8x896xf32, #tpu.memory_space<vmem>>, %arg2: memref<896x640xbf16, #tpu.memory_space<vmem>>, %arg3: memref<1x640xf32, #tpu.memory_space<vmem>>, %arg4: memref<640x256xbf16, #tpu.memory_space<vmem>>, %arg5: memref<1x256xf32, #tpu.memory_space<vmem>>, %arg6: memref<256x128xbf16, #tpu.memory_space<vmem>>, %arg7: memref<1x128xf32, #tpu.memory_space<vmem>>, %arg8: memref<128x128xbf16, #tpu.memory_space<vmem>>, %arg9: memref<1x128xf32, #tpu.memory_space<vmem>>, %arg10: memref<128x128xbf16, #tpu.memory_space<vmem>>, %arg11: memref<1x128xf32, #tpu.memory_space<vmem>>, %arg12: memref<8x128xf32, #tpu.memory_space<vmem>>) attributes {dimension_semantics = [#tpu.dimension_semantics<parallel>], iteration_bounds = array<i64: 2>, scalar_prefetch = 0 : i64, scratch_operands = 0 : i64, tpu.core_type = #tpu.core_type<tc>, window_params = [{transform_indices = @transform_0, window_bounds = array<i64: 8, 896>}, {pipeline_mode = #tpu.pipeline_mode<synchronous>, transform_indices = @transform_1, window_bounds = array<i64: 896, 640>}, {pipeline_mode = #tpu.pipeline_mode<synchronous>, transform_indices = @transform_2, window_bounds = array<i64: 1, 640>}, {pipeline_mode = #tpu.pipeline_mode<synchronous>, transform_indices = @transform_3, window_bounds = array<i64: 640, 256>}, {pipeline_mode = #tpu.pipeline_mode<synchronous>, transform_indices = @transform_4, window_bounds = array<i64: 1, 256>}, {pipeline_mode = #tpu.pipeline_mode<synchronous>, transform_indices = @transform_5, window_bounds = array<i64: 256, 128>}, {pipeline_mode = #tpu.pipeline_mode<synchronous>, transform_indices = @transform_6, window_bounds = array<i64: 1, 128>}, {pipeline_mode = #tpu.pipeline_mode<synchronous>, transform_indices = @transform_7, window_bounds = array<i64: 128, 128>}, {pipeline_mode = #tpu.pipeline_mode<synchronous>, transform_indices = @transform_8, window_bounds = array<i64: 1, 128>}, {pipeline_mode = #tpu.pipeline_mode<synchronous>, transform_indices = @transform_9, window_bounds = array<i64: 128, 128>}, {pipeline_mode = #tpu.pipeline_mode<synchronous>, transform_indices = @transform_10, window_bounds = array<i64: 1, 128>}, {transform_indices = @transform_11, window_bounds = array<i64: 8, 128>}]} {
    %c0 = arith.constant 0 : index
    %c0_0 = arith.constant 0 : index
    %0 = vector.load %arg1[%c0, %c0_0] : memref<8x896xf32, #tpu.memory_space<vmem>>, vector<8x896xf32>
    %1 = arith.truncf %0 : vector<8x896xf32> to vector<8x896xbf16>
    %c0_1 = arith.constant 0 : index
    %c0_2 = arith.constant 0 : index
    %2 = vector.load %arg2[%c0_1, %c0_2] : memref<896x640xbf16, #tpu.memory_space<vmem>>, vector<896x640xbf16>
    %cst = arith.constant dense<0.000000e+00> : vector<8x640xf32>
    %3 = tpu.matmul %1, %2, %cst {dimension_numbers = #tpu.dot_dimension_numbers<[1], [0], [0], [1], [0, 0, 1, 1], [], []>} : vector<8x896xbf16>, vector<896x640xbf16>, vector<8x640xf32> -> vector<8x640xf32>
    %c0_3 = arith.constant 0 : index
    %c0_4 = arith.constant 0 : index
    %4 = vector.load %arg3[%c0_3, %c0_4] : memref<1x640xf32, #tpu.memory_space<vmem>>, vector<1x640xf32>
    %5 = vector.broadcast %4 : vector<1x640xf32> to vector<8x640xf32>
    %6 = arith.addf %3, %5 : vector<8x640xf32>
    %cst_5 = arith.constant 5.000000e-01 : f32
    %7 = vector.broadcast %cst_5 : f32 to vector<8x640xf32>
    %8 = arith.mulf %7, %6 : vector<8x640xf32>
    %cst_6 = arith.constant 0.707106769 : f32
    %9 = vector.broadcast %cst_6 : f32 to vector<8x640xf32>
    %10 = arith.mulf %6, %9 : vector<8x640xf32>
    %11 = math.erf %10 : vector<8x640xf32>
    %cst_7 = arith.constant 1.000000e+00 : f32
    %12 = vector.broadcast %cst_7 : f32 to vector<8x640xf32>
    %13 = arith.addf %12, %11 : vector<8x640xf32>
    %14 = arith.mulf %8, %13 : vector<8x640xf32>
    %15 = arith.truncf %14 : vector<8x640xf32> to vector<8x640xbf16>
    %c0_8 = arith.constant 0 : index
    %c0_9 = arith.constant 0 : index
    %16 = vector.load %arg4[%c0_8, %c0_9] : memref<640x256xbf16, #tpu.memory_space<vmem>>, vector<640x256xbf16>
    %cst_10 = arith.constant dense<0.000000e+00> : vector<8x256xf32>
    %17 = tpu.matmul %15, %16, %cst_10 {dimension_numbers = #tpu.dot_dimension_numbers<[1], [0], [0], [1], [0, 0, 1, 1], [], []>} : vector<8x640xbf16>, vector<640x256xbf16>, vector<8x256xf32> -> vector<8x256xf32>
    %c0_11 = arith.constant 0 : index
    %c0_12 = arith.constant 0 : index
    %18 = vector.load %arg5[%c0_11, %c0_12] : memref<1x256xf32, #tpu.memory_space<vmem>>, vector<1x256xf32>
    %19 = vector.broadcast %18 : vector<1x256xf32> to vector<8x256xf32>
    %20 = arith.addf %17, %19 : vector<8x256xf32>
    %cst_13 = arith.constant 5.000000e-01 : f32
    %21 = vector.broadcast %cst_13 : f32 to vector<8x256xf32>
    %22 = arith.mulf %21, %20 : vector<8x256xf32>
    %cst_14 = arith.constant 0.707106769 : f32
    %23 = vector.broadcast %cst_14 : f32 to vector<8x256xf32>
    %24 = arith.mulf %20, %23 : vector<8x256xf32>
    %25 = math.erf %24 : vector<8x256xf32>
    %cst_15 = arith.constant 1.000000e+00 : f32
    %26 = vector.broadcast %cst_15 : f32 to vector<8x256xf32>
    %27 = arith.addf %26, %25 : vector<8x256xf32>
    %28 = arith.mulf %22, %27 : vector<8x256xf32>
    %29 = arith.truncf %28 : vector<8x256xf32> to vector<8x256xbf16>
    %c0_16 = arith.constant 0 : index
    %c0_17 = arith.constant 0 : index
    %30 = vector.load %arg6[%c0_16, %c0_17] : memref<256x128xbf16, #tpu.memory_space<vmem>>, vector<256x128xbf16>
    %cst_18 = arith.constant dense<0.000000e+00> : vector<8x128xf32>
    %31 = tpu.matmul %29, %30, %cst_18 {dimension_numbers = #tpu.dot_dimension_numbers<[1], [0], [0], [1], [0, 0, 1, 1], [], []>} : vector<8x256xbf16>, vector<256x128xbf16>, vector<8x128xf32> -> vector<8x128xf32>
    %c0_19 = arith.constant 0 : index
    %c0_20 = arith.constant 0 : index
    %32 = vector.load %arg7[%c0_19, %c0_20] : memref<1x128xf32, #tpu.memory_space<vmem>>, vector<1x128xf32>
    %33 = vector.broadcast %32 : vector<1x128xf32> to vector<8x128xf32>
    %34 = arith.addf %31, %33 : vector<8x128xf32>
    %cst_21 = arith.constant 5.000000e-01 : f32
    %35 = vector.broadcast %cst_21 : f32 to vector<8x128xf32>
    %36 = arith.mulf %35, %34 : vector<8x128xf32>
    %cst_22 = arith.constant 0.707106769 : f32
    %37 = vector.broadcast %cst_22 : f32 to vector<8x128xf32>
    %38 = arith.mulf %34, %37 : vector<8x128xf32>
    %39 = math.erf %38 : vector<8x128xf32>
    %cst_23 = arith.constant 1.000000e+00 : f32
    %40 = vector.broadcast %cst_23 : f32 to vector<8x128xf32>
    %41 = arith.addf %40, %39 : vector<8x128xf32>
    %42 = arith.mulf %36, %41 : vector<8x128xf32>
    %43 = arith.truncf %42 : vector<8x128xf32> to vector<8x128xbf16>
    %c0_24 = arith.constant 0 : index
    %c0_25 = arith.constant 0 : index
    %44 = vector.load %arg8[%c0_24, %c0_25] : memref<128x128xbf16, #tpu.memory_space<vmem>>, vector<128x128xbf16>
    %cst_26 = arith.constant dense<0.000000e+00> : vector<8x128xf32>
    %45 = tpu.matmul %43, %44, %cst_26 {dimension_numbers = #tpu.dot_dimension_numbers<[1], [0], [0], [1], [0, 0, 1, 1], [], []>} : vector<8x128xbf16>, vector<128x128xbf16>, vector<8x128xf32> -> vector<8x128xf32>
    %c0_27 = arith.constant 0 : index
    %c0_28 = arith.constant 0 : index
    %46 = vector.load %arg9[%c0_27, %c0_28] : memref<1x128xf32, #tpu.memory_space<vmem>>, vector<1x128xf32>
    %47 = vector.broadcast %46 : vector<1x128xf32> to vector<8x128xf32>
    %48 = arith.addf %45, %47 : vector<8x128xf32>
    %cst_29 = arith.constant 5.000000e-01 : f32
    %49 = vector.broadcast %cst_29 : f32 to vector<8x128xf32>
    %50 = arith.mulf %49, %48 : vector<8x128xf32>
    %cst_30 = arith.constant 0.707106769 : f32
    %51 = vector.broadcast %cst_30 : f32 to vector<8x128xf32>
    %52 = arith.mulf %48, %51 : vector<8x128xf32>
    %53 = math.erf %52 : vector<8x128xf32>
    %cst_31 = arith.constant 1.000000e+00 : f32
    %54 = vector.broadcast %cst_31 : f32 to vector<8x128xf32>
    %55 = arith.addf %54, %53 : vector<8x128xf32>
    %56 = arith.mulf %50, %55 : vector<8x128xf32>
    %57 = arith.truncf %56 : vector<8x128xf32> to vector<8x128xbf16>
    %c0_32 = arith.constant 0 : index
    %c0_33 = arith.constant 0 : index
    %58 = vector.load %arg10[%c0_32, %c0_33] : memref<128x128xbf16, #tpu.memory_space<vmem>>, vector<128x128xbf16>
    %cst_34 = arith.constant dense<0.000000e+00> : vector<8x128xf32>
    %59 = tpu.matmul %57, %58, %cst_34 {dimension_numbers = #tpu.dot_dimension_numbers<[1], [0], [0], [1], [0, 0, 1, 1], [], []>} : vector<8x128xbf16>, vector<128x128xbf16>, vector<8x128xf32> -> vector<8x128xf32>
    %c0_35 = arith.constant 0 : index
    %c0_36 = arith.constant 0 : index
    %60 = vector.load %arg11[%c0_35, %c0_36] : memref<1x128xf32, #tpu.memory_space<vmem>>, vector<1x128xf32>
    %61 = vector.broadcast %60 : vector<1x128xf32> to vector<8x128xf32>
    %62 = arith.addf %59, %61 : vector<8x128xf32>
    %c0_37 = arith.constant 0 : index
    %c0_38 = arith.constant 0 : index
    %63 = vector.load %arg12[%c0_37, %c0_38] : memref<8x128xf32, #tpu.memory_space<vmem>>, vector<8x128xf32>
    tpu.vector_store %arg12[%c0_37, %c0_38], %62 {strides = array<i32>} : memref<8x128xf32, #tpu.memory_space<vmem>>, vector<8x128xf32>,
    return
  }
  func.func @transform_0(%arg0: i32) -> (i32, i32) {
    %c0_i32 = arith.constant 0 : i32
    %c0_i32_0 = arith.constant 0 : i32
    return %arg0, %c0_i32 : i32, i32
  }
  func.func @transform_1(%arg0: i32) -> (i32, i32) {
    %c0_i32 = arith.constant 0 : i32
    %c0_i32_0 = arith.constant 0 : i32
    %c0_i32_1 = arith.constant 0 : i32
    return %c0_i32, %c0_i32_0 : i32, i32
  }
  func.func @transform_2(%arg0: i32) -> (i32, i32) {
    %c0_i32 = arith.constant 0 : i32
    %c0_i32_0 = arith.constant 0 : i32
    %c0_i32_1 = arith.constant 0 : i32
    return %c0_i32, %c0_i32_0 : i32, i32
  }
  func.func @transform_3(%arg0: i32) -> (i32, i32) {
    %c0_i32 = arith.constant 0 : i32
    %c0_i32_0 = arith.constant 0 : i32
    %c0_i32_1 = arith.constant 0 : i32
    return %c0_i32, %c0_i32_0 : i32, i32
  }
  func.func @transform_4(%arg0: i32) -> (i32, i32) {
    %c0_i32 = arith.constant 0 : i32
    %c0_i32_0 = arith.constant 0 : i32
    %c0_i32_1 = arith.constant 0 : i32
    return %c0_i32, %c0_i32_0 : i32, i32
  }
  func.func @transform_5(%arg0: i32) -> (i32, i32) {
    %c0_i32 = arith.constant 0 : i32
    %c0_i32_0 = arith.constant 0 : i32
    %c0_i32_1 = arith.constant 0 : i32
    return %c0_i32, %c0_i32_0 : i32, i32
  }
  func.func @transform_6(%arg0: i32) -> (i32, i32) {
    %c0_i32 = arith.constant 0 : i32
    %c0_i32_0 = arith.constant 0 : i32
    %c0_i32_1 = arith.constant 0 : i32
    return %c0_i32, %c0_i32_0 : i32, i32
  }
  func.func @transform_7(%arg0: i32) -> (i32, i32) {
    %c0_i32 = arith.constant 0 : i32
    %c0_i32_0 = arith.constant 0 : i32
    %c0_i32_1 = arith.constant 0 : i32
    return %c0_i32, %c0_i32_0 : i32, i32
  }
  func.func @transform_8(%arg0: i32) -> (i32, i32) {
    %c0_i32 = arith.constant 0 : i32
    %c0_i32_0 = arith.constant 0 : i32
    %c0_i32_1 = arith.constant 0 : i32
    return %c0_i32, %c0_i32_0 : i32, i32
  }
  func.func @transform_9(%arg0: i32) -> (i32, i32) {
    %c0_i32 = arith.constant 0 : i32
    %c0_i32_0 = arith.constant 0 : i32
    %c0_i32_1 = arith.constant 0 : i32
    return %c0_i32, %c0_i32_0 : i32, i32
  }
  func.func @transform_10(%arg0: i32) -> (i32, i32) {
    %c0_i32 = arith.constant 0 : i32
    %c0_i32_0 = arith.constant 0 : i32
    %c0_i32_1 = arith.constant 0 : i32
    return %c0_i32, %c0_i32_0 : i32, i32
  }
  func.func @transform_11(%arg0: i32) -> (i32, i32) {
    %c0_i32 = arith.constant 0 : i32
    %c0_i32_0 = arith.constant 0 : i32
    return %arg0, %c0_i32 : i32, i32
  }
}

</mosaic_0001>

<bundles_post_ra>
// kernel: tpu_custom_call.1
= control target key start
LH: loop header
LB: loop body
LE: loop exit
PB: predicated region body
PF: predicated region fallthrough
CT: control target
= control target key end

     0   :  { %s6450_s0 = inlined_call_operand.hbm [shape: f32[16,896], index: 0, kind: input, shape index: {}]   ;;  %s6451_s1 = inlined_call_operand.hbm [shape: bf16[896,640], index: 1, kind: input, shape index: {}]   ;;  %s6452_s2 = inlined_call_operand.hbm [shape: f32[1,640], index: 2, kind: input, shape index: {}]   ;;  %s6453_s3 = inlined_call_operand.hbm [shape: bf16[640,256], index: 3, kind: input, shape index: {}]   ;;  %s6454_s4 = inlined_call_operand.hbm [shape: f32[1,256], index: 4, kind: input, shape index: {}]   ;;  %s6455_s5 = inlined_call_operand.hbm [shape: bf16[256,128], index: 5, kind: input, shape index: {}]   ;;  %s6456_s6 = inlined_call_operand.hbm [shape: f32[1,128], index: 6, kind: input, shape index: {}]   ;;  %s6457_s7 = inlined_call_operand.hbm [shape: bf16[128,128], index: 7, kind: input, shape index: {}]   ;;  %s6458_s8 = inlined_call_operand.hbm [shape: f32[1,128], index: 8, kind: input, shape index: {}]   ;;  %s6459_s9 = inlined_call_operand.hbm [shape: bf16[128,128], index: 9, kind: input, shape index: {}]   ;;  %s6460_s10 = inlined_call_operand.hbm [shape: f32[1,128], index: 10, kind: input, shape index: {}]   ;;  %s6461_s11 = inlined_call_operand.hbm [shape: f32[16,128], index: 11, kind: output, shape index: {}]  }
   0x1   :  { %6468 = sst [smem:[#allocation29_spill]] %s6450_s0 }
   0x2   :  { %6469 = sst [smem:[#allocation30_spill]] %s6451_s1 }
   0x3   :  { %6470 = sst [smem:[#allocation31_spill]] %s6452_s2 }
   0x4   :  { %6471 = sst [smem:[#allocation32_spill]] %s6453_s3 }
   0x5   :  { %6472 = sst [smem:[#allocation33_spill]] %s6461_s11 }
   0x6   :  { %16 = vsyncpa [#allocation3], 0 }
   0x7   :  { %18 = vsyncpa [#allocation3 + $0x1], 0 }
   0x8   :  { %19 = vsyncpa [#allocation6], 0 }
   0x9   :  { %20 = vsyncpa [#allocation9], 0 }
   0xa   :  { %21 = vsyncpa [#allocation12], 0 }
   0xb   :  { %22 = vsyncpa [#allocation15], 0 }
   0xc   :  { %23 = vsyncpa [#allocation18], 0 }
   0xd   :  { %24 = vsyncpa [#allocation4], 0 }
   0xe   :  { %26 = vsyncpa [#allocation4 + $0x1], 0  ;;  %s5942_s17 = smov 0   ;;  %s5944_s18 = smov 0  }
   0xf   :  { %s5946_s19 = smov 0   ;;  %s5948_s20 = smov 0  }
  0x10 LB: > { %s5861_s21 = smov [#allocation5]   ;;  %s5963_s23 = sadd.s32 4294967295, %s5859_s20   ;;  %s5859_s20 = sphi %s5948_s20, %s6505_s20   ;;  %s5855_s19 = sphi %s5946_s19, %s6504_s19   ;;  %s5851_s18 = sphi %s5944_s18, %s6503_s18   ;;  %s5847_s17 = sphi %s5942_s17, %s6502_s17  }
  0x11   : > { %s311_s22 = sshll.u32 %s5861_s21, 4  ;;  %p4107_p0 = scmp.ge.s32.totalorder %s5859_s20, 1  ;;  %s5968_s22 = int_to_ptr.vmem [resolvable:$true] %s311_s22 }
  0x12   : > { %p6465_p1 = scmp.eq.s32.totalorder %s5963_s23, 0  ;;  %p299_p2 = scmp.lt.s32.totalorder %s5859_s20, 3 }
  0x13   : > { %s5862_s25 = smov [#allocation8]   ;;  %s5863_s28 = smov [#allocation11]  }
  0x14   : > { %p5970_p3 = pnand %p4107_p0, %p299_p2  ;;  %s335_s26 = sshll.u32 %s5862_s25, 4  ;;  %s5983_s26 = int_to_ptr.vmem [resolvable:$true] %s335_s26 }
  0x15   : > { %s5985_s29 = sshll.u32 %s5863_s28, 4  ;;  %s6476_s1 = sld [smem:[#allocation30_spill]]  ;;  %s360_s29 = int_to_ptr.vmem [resolvable:$true] %s5985_s29 }
  0x16   : > { %s6473_s24 = scalar_select %p5970_p3, 1, 0 }
  0x17   : > { %p4789_p5 = pneg %p5970_p3 }
  0x18   : > { %6474 = sst [smem:[#allocation28_spill]] %s6473_s24 }
  0x19   : > { %p5979_p6 = pnand %p4789_p5, %p6465_p1 }
  0x1b   : > { %s5463_s13 = scalar_lea.hbm %s6476_s1, 35840  ;;  %p5995_p8 = pneg %p5979_p6 }
  0x1c   : > { %p5464_p7 = scmp.ne.s32.totalorder %s6476_s1, %s5463_s13  ;;  %p5470_p11 = scmp.lt.u32.totalorder %s5463_s13, %s6476_s1 }
  0x1e   : > { %p5466_p9 = pnand %p5995_p8, %p5464_p7 }
  0x20   : > { %p5467_p10 = pneg %p5466_p9 }
  0x22   : > { %p5472_p12 = pnand %p5470_p11, %p5467_p10 }
  0x24   : > { %5475 = shalt.err (!%p5472_p12)
}
  0x25   : > { %s5476_s28 = scalar_lea.vmem %s5968_s22, 35840  ;;  %p5484_p5 = scmp.lt.s32.totalorder %s5968_s22, %s5968_s22 }
  0x26   : > { %p5477_p13 = scmp.ne.s32.totalorder %s5968_s22, %s5476_s28  ;;  %p5485_p4 = scmp.lt.s32.totalorder %s5476_s28, %s5476_s28 }
  0x28   : > { %p5479_p0 = pnand %p5477_p13, %p5995_p8  ;;  %p5486_p7 = por %p5485_p4, %p5484_p5 }
  0x2a   : > { %p5480_p2 = pneg %p5479_p0 }
  0x2c   : > { %p5487_p9 = pnand %p5486_p7, %p5480_p2 }
  0x2e   : > { %5490 = shalt.err (!%p5487_p9)
}
  0x2f   : > { %s5864_s30 = smov 320   ;;  %s5865_s12 = smov 20  }
  0x30   : > { %4792 = dma.hbm_to_vmem [thread:$0]  (!%p5979_p6), %s6476_s1, 35840, %s5968_s22, [#allocation6], %s5864_s30, %s5864_s30, %s5865_s12  }
  0x31   : > { %s6478_s3 = sld [smem:[#allocation32_spill]] }
  0x37   : > { %s5491_s25 = scalar_lea.hbm %s6478_s3, 10240 }
  0x38   : > { %p5492_p4 = scmp.ne.s32.totalorder %s6478_s3, %s5491_s25  ;;  %p5498_p12 = scmp.lt.u32.totalorder %s5491_s25, %s6478_s3 }
  0x3a   : > { %p5494_p10 = pnand %p5492_p4, %p5995_p8 }
  0x3c   : > { %p5495_p11 = pneg %p5494_p10 }
  0x3e   : > { %p5500_p13 = pnand %p5498_p12, %p5495_p11 }
  0x40   : > { %5503 = shalt.err (!%p5500_p13)
}
  0x41   : > { %s5504_s22 = scalar_lea.vmem %s5983_s26, 10240  ;;  %p5512_p7 = scmp.lt.s32.totalorder %s5983_s26, %s5983_s26 }
  0x42   : > { %p5505_p0 = scmp.ne.s32.totalorder %s5983_s26, %s5504_s22  ;;  %p5513_p9 = scmp.lt.s32.totalorder %s5504_s22, %s5504_s22 }
  0x44   : > { %p5507_p2 = pnand %p5505_p0, %p5995_p8  ;;  %p5514_p4 = por %p5513_p9, %p5512_p7 }
  0x46   : > { %p5508_p5 = pneg %p5507_p2 }
  0x48   : > { %p5515_p10 = pnand %p5514_p4, %p5508_p5 }
  0x4a   : > { %5518 = shalt.err (!%p5515_p10)
}
  0x4b   : > { %s5866_s11 = smov 128   ;;  %s5867_s0 = smov 8  }
  0x4c   : > { %4798 = dma.hbm_to_vmem [thread:$0]  (!%p5979_p6), %s6478_s3, 10240, %s5983_s26, [#allocation9], %s5866_s11, %s5866_s11, %s5867_s0  }
  0x4d   : > { %s5519_s14 = scalar_lea.hbm %s6455_s5, 2048 }
  0x4e   : > { %p5520_p11 = scmp.ne.s32.totalorder %s6455_s5, %s5519_s14  ;;  %p5526_p0 = scmp.lt.u32.totalorder %s5519_s14, %s6455_s5 }
  0x50   : > { %p5522_p12 = pnand %p5520_p11, %p5995_p8 }
  0x52   : > { %p5523_p13 = pneg %p5522_p12 }
  0x54   : > { %p5528_p2 = pnand %p5526_p0, %p5523_p13 }
  0x56   : > { %5531 = shalt.err (!%p5528_p2)
}
  0x57   : > { %s5532_s22 = scalar_lea.vmem %s360_s29, 2048  ;;  %p5540_p4 = scmp.lt.s32.totalorder %s360_s29, %s360_s29 }
  0x58   : > { %p5533_p5 = scmp.ne.s32.totalorder %s360_s29, %s5532_s22  ;;  %p5541_p10 = scmp.lt.s32.totalorder %s5532_s22, %s5532_s22 }
  0x5a   : > { %p5535_p7 = pnand %p5533_p5, %p5995_p8  ;;  %p5542_p1 = por %p5541_p10, %p5540_p4 }
  0x5c   : > { %p5536_p9 = pneg %p5535_p7 }
  0x5e   : > { %p5543_p3 = pnand %p5542_p1, %p5536_p9 }
  0x60   : > { %5546 = shalt.err (!%p5543_p3)
}
  0x61   : > { %s5868_s26 = smov 64   ;;  %s5869_s11 = smov 4  }
  0x62   : > { %4804 = dma.hbm_to_vmem [thread:$0]  (!%p5979_p6), %s6455_s5, 2048, %s360_s29, [#allocation12], %s5868_s26, %s5868_s26, %s5869_s11  }
  0x63   : > { %s5870_s30 = smov [#allocation14]   ;;  %s5871_s13 = smov [#allocation17]  }
  0x64   : > { %s383_s12 = sshll.u32 %s5870_s30, 4  ;;  %s407_s14 = sshll.u32 %s5871_s13, 4  ;;  %s384_s12 = int_to_ptr.vmem [resolvable:$true] %s383_s12  ;;  %s408_s14 = int_to_ptr.vmem [resolvable:$true] %s407_s14 }
  0x65   : > { %s5547_s25 = scalar_lea.hbm %s6457_s7, 1024 }
  0x66   : > { %p5548_p1 = scmp.ne.s32.totalorder %s6457_s7, %s5547_s25  ;;  %p5554_p12 = scmp.lt.u32.totalorder %s5547_s25, %s6457_s7 }
  0x68   : > { %p5550_p3 = pnand %p5548_p1, %p5995_p8 }
  0x6a   : > { %p5551_p11 = pneg %p5550_p3 }
  0x6c   : > { %p5556_p13 = pnand %p5554_p12, %p5551_p11 }
  0x6e   : > { %5559 = shalt.err (!%p5556_p13)
}
  0x6f   : > { %s5560_s29 = scalar_lea.vmem %s384_s12, 1024  ;;  %p5568_p7 = scmp.lt.s32.totalorder %s384_s12, %s384_s12 }
  0x70   : > { %p5561_p0 = scmp.ne.s32.totalorder %s384_s12, %s5560_s29  ;;  %p5569_p9 = scmp.lt.s32.totalorder %s5560_s29, %s5560_s29 }
  0x72   : > { %p5563_p2 = pnand %p5561_p0, %p5995_p8  ;;  %p5570_p4 = por %p5569_p9, %p5568_p7 }
  0x74   : > { %p5564_p5 = pneg %p5563_p2 }
  0x76   : > { %p5571_p10 = pnand %p5570_p4, %p5564_p5 }
  0x78   : > { %5574 = shalt.err (!%p5571_p10)
}
  0x79   : > { %4810 = dma.hbm_to_vmem [thread:$0]  (!%p5979_p6), %s6457_s7, 1024, %s384_s12, [#allocation15], %s5868_s26, %s5868_s26, %s5869_s11  }
  0x7a   : > { %s5575_s30 = scalar_lea.hbm %s6459_s9, 1024 }
  0x7b   : > { %p5576_p1 = scmp.ne.s32.totalorder %s6459_s9, %s5575_s30  ;;  %p5582_p12 = scmp.lt.u32.totalorder %s5575_s30, %s6459_s9 }
  0x7d   : > { %p5578_p3 = pnand %p5576_p1, %p5995_p8 }
  0x7f   : > { %p5579_p11 = pneg %p5578_p3 }
  0x81   : > { %p5584_p13 = pnand %p5582_p12, %p5579_p11 }
  0x83   : > { %5587 = shalt.err (!%p5584_p13)
}
  0x84   : > { %s5588_s28 = scalar_lea.vmem %s408_s14, 1024  ;;  %p5596_p7 = scmp.lt.s32.totalorder %s408_s14, %s408_s14 }
  0x85   : > { %p5589_p0 = scmp.ne.s32.totalorder %s408_s14, %s5588_s28  ;;  %p5597_p9 = scmp.lt.s32.totalorder %s5588_s28, %s5588_s28 }
  0x87   : > { %p5591_p2 = pnand %p5589_p0, %p5995_p8  ;;  %p5598_p4 = por %p5597_p9, %p5596_p7 }
  0x89   : > { %p5592_p5 = pneg %p5591_p2 }
  0x8b   : > { %p5599_p10 = pnand %p5598_p4, %p5592_p5 }
  0x8d   : > { %5602 = shalt.err (!%p5599_p10)
}
  0x8e   : > { %4816 = dma.hbm_to_vmem [thread:$0]  (!%p5979_p6), %s6459_s9, 1024, %s408_s14, [#allocation18], %s5868_s26, %s5868_s26, %s5869_s11  }
  0x8f   : > { %s5872_s29 = smov [#allocation7]   ;;  %s5873_s3 = smov [#allocation10]  }
  0x90   : > { %s325_s1 = sshll.u32 %s5872_s29, 4  ;;  %s349_s0 = sshll.u32 %s5873_s3, 4  ;;  %s326_s1 = int_to_ptr.vmem [resolvable:$true] %s325_s1  ;;  %s350_s0 = int_to_ptr.vmem [resolvable:$true] %s349_s0 }
  0x91   : > { %s6479_s2 = sld [smem:[#allocation31_spill]] }
  0x97   : > { %s5603_s13 = scalar_lea.hbm %s6479_s2, 80 }
  0x98   : > { %p5604_p1 = scmp.ne.s32.totalorder %s6479_s2, %s5603_s13  ;;  %p5610_p12 = scmp.lt.u32.totalorder %s5603_s13, %s6479_s2 }
  0x9a   : > { %p5606_p3 = pnand %p5604_p1, %p5995_p8 }
  0x9c   : > { %p5607_p11 = pneg %p5606_p3 }
  0x9e   : > { %p5612_p13 = pnand %p5610_p12, %p5607_p11 }
  0xa0   : > { %5615 = shalt.err (!%p5612_p13)
}
  0xa1   : > { %s5616_s26 = scalar_lea.vmem %s326_s1, 80  ;;  %s5623_s11 = scalar_lea.vmem %s326_s1, 96 }
  0xa2   : > { %p5617_p0 = scmp.ne.s32.totalorder %s326_s1, %s5616_s26  ;;  %p5624_p7 = scmp.lt.s32.totalorder %s326_s1, %s326_s1 }
  0xa3   : > { %p5625_p9 = scmp.lt.s32.totalorder %s5623_s11, %s5616_s26 }
  0xa4   : > { %p5619_p2 = pnand %p5617_p0, %p5995_p8 }
  0xa5   : > { %p5626_p4 = por %p5625_p9, %p5624_p7 }
  0xa6   : > { %p5620_p5 = pneg %p5619_p2 }
  0xa8   : > { %p5627_p10 = pnand %p5626_p4, %p5620_p5 }
  0xaa   : > { %5630 = shalt.err (!%p5627_p10)
}
  0xab   : > { %4795 = dma.hbm_to_vmem [thread:$0]  (!%p5979_p6), %s6479_s2, 80, %s326_s1, [#allocation6]  }
  0xac   : > { %s5631_s3 = scalar_lea.hbm %s6454_s4, 32 }
  0xad   : > { %p5632_p1 = scmp.ne.s32.totalorder %s6454_s4, %s5631_s3  ;;  %p5638_p12 = scmp.lt.u32.totalorder %s5631_s3, %s6454_s4 }
  0xaf   : > { %p5634_p3 = pnand %p5632_p1, %p5995_p8 }
  0xb1   : > { %p5635_p11 = pneg %p5634_p3 }
  0xb3   : > { %p5640_p13 = pnand %p5638_p12, %p5635_p11 }
  0xb5   : > { %5643 = shalt.err (!%p5640_p13)
}
  0xb6   : > { %s5644_s21 = scalar_lea.vmem %s350_s0, 32  ;;  %p5652_p7 = scmp.lt.s32.totalorder %s350_s0, %s350_s0 }
  0xb7   : > { %p5645_p0 = scmp.ne.s32.totalorder %s350_s0, %s5644_s21  ;;  %p5653_p9 = scmp.lt.s32.totalorder %s5644_s21, %s5644_s21 }
  0xb9   : > { %p5647_p2 = pnand %p5645_p0, %p5995_p8  ;;  %p5654_p4 = por %p5653_p9, %p5652_p7 }
  0xbb   : > { %p5648_p5 = pneg %p5647_p2 }
  0xbd   : > { %p5655_p10 = pnand %p5654_p4, %p5648_p5 }
  0xbf   : > { %5658 = shalt.err (!%p5655_p10)
}
  0xc0   : > { %4801 = dma.hbm_to_vmem [thread:$0]  (!%p5979_p6), %s6454_s4, 32, %s350_s0, [#allocation9]  }
  0xc1   : > { %s5874_s28 = smov [#allocation13]   ;;  %s5875_s11 = smov [#allocation16]  }
  0xc2   : > { %s373_s26 = sshll.u32 %s5874_s28, 4  ;;  %s397_s14 = sshll.u32 %s5875_s11, 4  ;;  %s374_s26 = int_to_ptr.vmem [resolvable:$true] %s373_s26  ;;  %s398_s14 = int_to_ptr.vmem [resolvable:$true] %s397_s14 }
  0xc3   : > { %s5659_s29 = scalar_lea.hbm %s6456_s6, 16 }
  0xc4   : > { %p5660_p1 = scmp.ne.s32.totalorder %s6456_s6, %s5659_s29  ;;  %p5666_p12 = scmp.lt.u32.totalorder %s5659_s29, %s6456_s6 }
  0xc6   : > { %p5662_p3 = pnand %p5660_p1, %p5995_p8 }
  0xc8   : > { %p5663_p11 = pneg %p5662_p3 }
  0xca   : > { %p5668_p13 = pnand %p5666_p12, %p5663_p11 }
  0xcc   : > { %5671 = shalt.err (!%p5668_p13)
}
  0xcd   : > { %s5672_s0 = scalar_lea.vmem %s374_s26, 16  ;;  %s5679_s15 = scalar_lea.vmem %s374_s26, 32 }
  0xce   : > { %p5673_p0 = scmp.ne.s32.totalorder %s374_s26, %s5672_s0  ;;  %p5680_p7 = scmp.lt.s32.totalorder %s374_s26, %s374_s26 }
  0xcf   : > { %p5681_p9 = scmp.lt.s32.totalorder %s5679_s15, %s5672_s0 }
  0xd0   : > { %p5675_p2 = pnand %p5673_p0, %p5995_p8 }
  0xd1   : > { %p5682_p4 = por %p5681_p9, %p5680_p7 }
  0xd2   : > { %p5676_p5 = pneg %p5675_p2 }
  0xd4   : > { %p5683_p10 = pnand %p5682_p4, %p5676_p5 }
  0xd6   : > { %5686 = shalt.err (!%p5683_p10)
}
  0xd7   : > { %4807 = dma.hbm_to_vmem [thread:$0]  (!%p5979_p6), %s6456_s6, 16, %s374_s26, [#allocation12]  }
  0xd8   : > { %s5687_s11 = scalar_lea.hbm %s6458_s8, 16 }
  0xd9   : > { %p5688_p1 = scmp.ne.s32.totalorder %s6458_s8, %s5687_s11  ;;  %p5694_p12 = scmp.lt.u32.totalorder %s5687_s11, %s6458_s8 }
  0xdb   : > { %p5690_p3 = pnand %p5688_p1, %p5995_p8 }
  0xdd   : > { %p5691_p11 = pneg %p5690_p3 }
  0xdf   : > { %p5696_p13 = pnand %p5694_p12, %p5691_p11 }
  0xe1   : > { %5699 = shalt.err (!%p5696_p13)
}
  0xe2   : > { %s5700_s24 = scalar_lea.vmem %s398_s14, 16  ;;  %s5707_s26 = scalar_lea.vmem %s398_s14, 32 }
  0xe3   : > { %p5701_p0 = scmp.ne.s32.totalorder %s398_s14, %s5700_s24  ;;  %p5708_p7 = scmp.lt.s32.totalorder %s398_s14, %s398_s14 }
  0xe4   : > { %p5709_p9 = scmp.lt.s32.totalorder %s5707_s26, %s5700_s24 }
  0xe5   : > { %p5703_p2 = pnand %p5701_p0, %p5995_p8 }
  0xe6   : > { %p5710_p4 = por %p5709_p9, %p5708_p7 }
  0xe7   : > { %p5704_p5 = pneg %p5703_p2 }
  0xe9   : > { %p5711_p10 = pnand %p5710_p4, %p5704_p5 }
  0xeb   : > { %5714 = shalt.err (!%p5711_p10)
}
  0xec   : > { %4813 = dma.hbm_to_vmem [thread:$0]  (!%p5979_p6), %s6458_s8, 16, %s398_s14, [#allocation15]  }
  0xed   : > { %s5876_s0 = smov [#allocation19]   ;;  %s5715_s25 = scalar_lea.hbm %s6460_s10, 16 }
  0xee   : > { %s421_s15 = sshll.u32 %s5876_s0, 4  ;;  %p5716_p1 = scmp.ne.s32.totalorder %s6460_s10, %s5715_s25  ;;  %s422_s15 = int_to_ptr.vmem [resolvable:$true] %s421_s15 }
  0xef   : > { %p5722_p12 = scmp.lt.u32.totalorder %s5715_s25, %s6460_s10 }
  0xf0   : > { %p5718_p3 = pnand %p5716_p1, %p5995_p8 }
  0xf2   : > { %p5719_p11 = pneg %p5718_p3 }
  0xf4   : > { %p5724_p13 = pnand %p5722_p12, %p5719_p11 }
  0xf6   : > { %5727 = shalt.err (!%p5724_p13)
}
  0xf7   : > { %s5728_s14 = scalar_lea.vmem %s422_s15, 16  ;;  %s5735_s29 = scalar_lea.vmem %s422_s15, 32 }
  0xf8   : > { %p5729_p0 = scmp.ne.s32.totalorder %s422_s15, %s5728_s14  ;;  %p5736_p7 = scmp.lt.s32.totalorder %s422_s15, %s422_s15 }
  0xf9   : > { %p5737_p9 = scmp.lt.s32.totalorder %s5735_s29, %s5728_s14 }
  0xfa   : > { %p5731_p2 = pnand %p5729_p0, %p5995_p8 }
  0xfb   : > { %p5738_p4 = por %p5737_p9, %p5736_p7 }
  0xfc   : > { %p5732_p5 = pneg %p5731_p2 }
  0xfe   : > { %p5739_p10 = pnand %p5738_p4, %p5732_p5 }
 0x100   : > { %5742 = shalt.err (!%p5739_p10)
}
 0x101   : > { %4819 = dma.hbm_to_vmem [thread:$0]  (!%p5979_p6), %s6460_s10, 16, %s422_s15, [#allocation18]  }
 0x102   : > { %s4106_s16 = sadd.s32 4294967294, %s5859_s20   ;;  %s6195_s27 = sadd.s32 1, %s5859_s20  }
 0x103   : > { %s36_s26 = ssub.s32 %s5859_s20, %s6195_s27  ;;  %s39_s30 = sadd.s32 1, %s5855_s19 }
 0x104   : > { %p37_p8 = scmp.eq.s32.totalorder %s36_s26, 0  ;;  %p46_p1 = scmp.ne.s32.totalorder %s5855_s19, %s5851_s18 }
 0x105   : > { %p47_p3 = scmp.eq.s32.totalorder %s5859_s20, 0  ;;  %p52_p11 = scmp.ne.s32.totalorder %s5851_s18, %s5847_s17 }
 0x106   : > { %s6206_s13 = scalar_select %p37_p8, %s5855_s19, %s39_s30  }
 0x107   : > { %p48_p12 = por %p47_p3, %p46_p1  ;;  %p6480_p13 = scmp.eq.s32.totalorder %s5963_s23, 0 }
 0x108   : > { %p286_p6 = scmp.eq.s32.totalorder %s5963_s23, 1  ;;  %p292_p2 = scmp.eq.s32.totalorder %s4106_s16, 1 }
 0x109   : > { %p6210_p0 = por %p6480_p13, %p52_p11  ;;  %p4838_p5 = scmp.lt.s32.totalorder %s5859_s20, 2 }
 0x10a   : > { %s432_s15 = sand.u32 1, %s5855_s19   ;;  %p6217_p7 = por %p286_p6, %p46_p1 }
 0x10b   : > { %p6221_p9 = por %p292_p2, %p52_p11  ;;  %s4742_s25 = smul.u32 56, %s432_s15 }
 0x10c   : > { %s6482_s21 = scalar_select %p6217_p7, 1, 0 }
 0x10d   : > { %s6483_s1 = scalar_select %p6221_p9, 1, 0 }
 0x10e   : > { %s4743_s28 = smul.u32 896, %s5859_s20  ;;  %p6226_p4 = pnand %p4838_p5, %p48_p12 }
 0x10f   : > { %s6485_s14 = sld [smem:[#allocation29_spill]]  ;;  %s436_s3 = scalar_lea.vmem [#allocation2], %s4742_s25 }
 0x110   : > { %s444_s24 = sshll.u32 %s436_s3, 4  ;;  %s433_s16 = scalar_lea.sflag [#allocation3], %s432_s15  ;;  %s6235_s24 = int_to_ptr.vmem [resolvable:$true] %s444_s24 }
 0x111   : > { %p5745_p8 = pneg %p6226_p4 }
 0x115   : > { %s6233_s29 = scalar_lea.hbm %s6485_s14, %s4743_s28  ;;  %s5748_s12 = scalar_lea.hbm %s6485_s14, 1792 }
 0x116   : > { %s5743_s26 = scalar_lea.hbm %s6233_s29, 896  ;;  %p5749_p11 = scmp.lt.u32.totalorder %s6233_s29, %s6485_s14 }
 0x117   : > { %p5744_p10 = scmp.ne.s32.totalorder %s6233_s29, %s5743_s26  ;;  %p5750_p12 = scmp.lt.u32.totalorder %s5748_s12, %s5743_s26 }
 0x118   : > { %p5752_p6 = scmp.lt.u32.totalorder %s5743_s26, %s6233_s29 }
 0x119   : > { %p5746_p1 = pnand %p5745_p8, %p5744_p10  ;;  %p5751_p13 = por %p5750_p12, %p5749_p11 }
 0x11b   : > { %p5747_p3 = pneg %p5746_p1  ;;  %p5753_p2 = por %p5752_p6, %p5751_p13 }
 0x11d   : > { %p5754_p5 = pnand %p5753_p2, %p5747_p3 }
 0x11f   : > { %5757 = shalt.err (!%p5754_p5)
}
 0x120   : > { %s5758_s15 = scalar_lea.vmem %s6235_s24, 896  ;;  %s5877_s25 = smov [#allocation2]  }
 0x121   : > { %p5759_p10 = scmp.ne.s32.totalorder %s6235_s24, %s5758_s15  ;;  %s5763_s3 = sshll.u32 %s5877_s25, 4  ;;  %s5764_s3 = int_to_ptr.vmem [resolvable:$false] %s5763_s3 }
 0x122   : > { %s5765_s2 = scalar_lea.vmem %s5764_s3, 1792  ;;  %p5766_p7 = scmp.lt.s32.totalorder %s6235_s24, %s5764_s3 }
 0x123   : > { %p5761_p1 = pnand %p5759_p10, %p5745_p8  ;;  %p5767_p11 = scmp.lt.s32.totalorder %s5765_s2, %s5758_s15 }
 0x125   : > { %p5762_p9 = pneg %p5761_p1  ;;  %p5768_p12 = por %p5767_p11, %p5766_p7 }
 0x127   : > { %p5769_p13 = pnand %p5768_p12, %p5762_p9 }
 0x129   : > { %5772 = shalt.err (!%p5769_p13)
}
 0x12a   : > { %4823 = dma.hbm_to_vmem [thread:$0]  (!%p6226_p4), %s6233_s29, 896, %s6235_s24, %s433_s16  }
 0x12b   : > { %s6486_s26 = sld [smem:[#allocation28_spill]] }
 0x131   : > { %p6487_p3 = scmp.ne.s32.totalorder %s6486_s26, 0 }
 0x132   : > { %s6265_s30 = sand.u32 (!%p6487_p3), 1, %s5851_s18  }
 0x133   : > { %453 = sbr.rel (%p6487_p3) target bundleno = 1818 (0x71a), region = 64  ;;  %s456_s12 = scalar_lea.sflag (!%p6487_p3), [#allocation3], %s6265_s30 }
 0x134   : > { %s4744_s28 = smul.u32 (!%p6487_p3), 56, %s6265_s30 }
 0x136   : > { %s6269_s22 = scalar_lea.vmem (!%p6487_p3), [#allocation2], %s4744_s28 }
 0x13a   : > { %5818 = dma.done.wait (%p6210_p0), %s456_s12, 896  }
 0x13b   : > { %5820 = vsyncadd (%p6210_p0), %s456_s12, 4294966400  ;;  %p6488_p7 = scmp.eq.s32.totalorder %s5963_s23, 0 }
 0x13d   : > { %5822 = dma.done.wait (%p6488_p7), [#allocation6], 35920   ;;  %p6489_p9 = pmov %p6488_p7 }
 0x13e   : > { %p6490_p4 = pmov %p6488_p7 }
 0x13f   : > { %5824 = vsyncadd (%p6489_p9), [#allocation6], 4294931376 }
 0x140   : > { %5826 = dma.done.wait (%p6490_p4), [#allocation9], 10272   ;;  %p6491_p8 = pmov %p6490_p4 }
 0x141   : > { %p6492_p6 = pmov %p6490_p4 }
 0x142   : > { %5828 = vsyncadd (%p6491_p8), [#allocation9], 4294957024 }
 0x143   : > { %5830 = dma.done.wait (%p6492_p6), [#allocation12], 2064   ;;  %p6493_p2 = pmov %p6490_p4 }
 0x145   : > { %5832 = vsyncadd (%p6493_p2), [#allocation12], 4294965232  ;;  %p6494_p0 = pmov %p6493_p2 }
 0x147   : > { %5834 = dma.done.wait (%p6494_p0), [#allocation15], 1040   ;;  %p6495_p5 = pmov %p6494_p0 }
 0x148   : > { %p6496_p10 = pmov %p6494_p0 }
 0x149   : > { %5836 = vsyncadd (%p6495_p5), [#allocation15], 4294966256 }
 0x14a   : > { %5838 = dma.done.wait (%p6496_p10), [#allocation18], 1040   ;;  %p6497_p1 = pmov %p6494_p0 }
 0x14b   : > { %v5878_v0 = vmov 0   ;;  %v4901_v1 = vld [vmem:[#allocation5 + $0x4] ss:$20 sps:$4 sm:$0xff]   ;;  %v4905_v3 = vld [vmem:[#allocation5] ss:$20 sps:$4 sm:$0xff]   ;;  %vm5880_vm0 = vmmov 0  }
 0x14c   : > { %5840 = vsyncadd (%p6497_p1), [#allocation18], 4294966256  ;;  %2527 = vmatprep.mubr.bf16.mxu1 %v5878_v0  ;;  %v4903_v2 = vld [vmem:[#allocation5 + $0x784] ss:$20 sps:$4 sm:$0xff]   ;;  %2372 = vmatprep.subr.bf16.mxu0 %v4901_v1  ;;  %v4906_v4 = vld [vmem:[#allocation5 + $0x780] ss:$20 sps:$4 sm:$0xff]  }
 0x14d   : > { %2495 = vmatprep.subr.bf16.mxu1 %v4903_v2  ;;  %v4907_v5 = vld [vmem:[#allocation5 + $0x2c] ss:$20 sps:$4 sm:$0xff]   ;;  %2373 = vmatpush1.bf16.msra.mxu0 %v4905_v3  ;;  %v4911_v7 = vld [vmem:[#allocation5 + $0x28] ss:$20 sps:$4 sm:$0xff]   ;;  %v4917_v11 = vld [vmem:[#allocation5 + $0x50] ss:$20 sps:$4 sm:$0xff]  }
 0x14e   : > { %2496 = vmatpush1.bf16.msra.mxu1 %v4906_v4  ;;  %v4909_v6 = vld [vmem:[#allocation5 + $0x7ac] ss:$20 sps:$4 sm:$0xff]   ;;  %2374 = vmatprep.subr.bf16.mxu0 %v4907_v5  ;;  %v4912_v8 = vld [vmem:[#allocation5 + $0x7a8] ss:$20 sps:$4 sm:$0xff]   ;;  %v4918_v12 = vld [vmem:[#allocation5 + $0x7d0] ss:$20 sps:$4 sm:$0xff]  }
 0x14f   : > { %2497 = vmatprep.subr.bf16.mxu1 %v4909_v6  ;;  %v4913_v9 = vld [vmem:[#allocation5 + $0x54] ss:$20 sps:$4 sm:$0xff]   ;;  %v4919_v13 = vld [vmem:[#allocation5 + $0x7c] ss:$20 sps:$4 sm:$0xff]   ;;  %v4923_v15 = vld [vmem:[#allocation5 + $0x78] ss:$20 sps:$4 sm:$0xff]  }
 0x150   : > { %v4915_v10 = vld [vmem:[#allocation5 + $0x7d4] ss:$20 sps:$4 sm:$0xff]   ;;  %v4921_v14 = vld [vmem:[#allocation5 + $0x7fc] ss:$20 sps:$4 sm:$0xff]   ;;  %v4924_v16 = vld [vmem:[#allocation5 + $0x7f8] ss:$20 sps:$4 sm:$0xff]  }
 0x151   : > { %2375 = vmatpush1.bf16.msra.mxu0 %v4911_v7  ;;  %v4925_v17 = vld [vmem:[#allocation5 + $0xa4] ss:$20 sps:$4 sm:$0xff]   ;;  %v4929_v19 = vld [vmem:[#allocation5 + $0xa0] ss:$20 sps:$4 sm:$0xff]   ;;  %v4935_v23 = vld [vmem:[#allocation5 + $0xc8] ss:$20 sps:$4 sm:$0xff]  }
 0x152   : > { %2498 = vmatpush1.bf16.msra.mxu1 %v4912_v8  ;;  %2376 = vmatprep.subr.bf16.mxu0 %v4913_v9  ;;  %v4927_v18 = vld [vmem:[#allocation5 + $0x824] ss:$20 sps:$4 sm:$0xff]   ;;  %v4930_v20 = vld [vmem:[#allocation5 + $0x820] ss:$20 sps:$4 sm:$0xff]   ;;  %v4936_v24 = vld [vmem:[#allocation5 + $0x848] ss:$20 sps:$4 sm:$0xff]  }
 0x153   : > { %2499 = vmatprep.subr.bf16.mxu1 %v4915_v10  ;;  %v4931_v21 = vld [vmem:[#allocation5 + $0xcc] ss:$20 sps:$4 sm:$0xff]   ;;  %v4937_v25 = vld [vmem:[#allocation5 + $0xf4] ss:$20 sps:$4 sm:$0xff]   ;;  %v4941_v27 = vld [vmem:[#allocation5 + $0xf0] ss:$20 sps:$4 sm:$0xff]  }
 0x154   : > { %v4933_v22 = vld [vmem:[#allocation5 + $0x84c] ss:$20 sps:$4 sm:$0xff]   ;;  %v4939_v26 = vld [vmem:[#allocation5 + $0x874] ss:$20 sps:$4 sm:$0xff]   ;;  %v4942_v28 = vld [vmem:[#allocation5 + $0x870] ss:$20 sps:$4 sm:$0xff]  }
 0x155   : > { %2377 = vmatpush1.bf16.msra.mxu0 %v4917_v11  ;;  %v4943_v29 = vld [vmem:[#allocation5 + $0x11c] ss:$20 sps:$4 sm:$0xff]   ;;  %v4947_v31 = vld [vmem:[#allocation5 + $0x118] ss:$20 sps:$4 sm:$0xff]   ;;  %v4954_v38 = vld [vmem:[#allocation5 + $0x140] ss:$20 sps:$4 sm:$0xff]  }
 0x156   : > { %2500 = vmatpush1.bf16.msra.mxu1 %v4918_v12  ;;  %2378 = vmatprep.subr.bf16.mxu0 %v4919_v13  ;;  %v4945_v30 = vld [vmem:[#allocation5 + $0x89c] ss:$20 sps:$4 sm:$0xff]   ;;  %v4948_v32 = vld [vmem:[#allocation5 + $0x898] ss:$20 sps:$4 sm:$0xff]   ;;  %v4959_v40 = vld [vmem:[#allocation5 + $0x34] ss:$20 sps:$4 sm:$0xff]  }
 0x157   : > { %2501 = vmatprep.subr.bf16.mxu1 %v4921_v14  ;;  %v545_v33 = vld [vmem:[%s6269_s22 + $0x30] sm:$0xff]  ;;  %v4961_v43 = vld [vmem:[#allocation5 + $0x194] ss:$20 sps:$4 sm:$0xff]   ;;  %s4131_s0 = sshll.u32 %s6265_s30, 3  ;;  %s4528_s11 = sshll.u32 %s5963_s23, 7 }
 0x158   : > { %v4949_v34 = vld [vmem:[#allocation5 + $0x144] ss:$20 sps:$4 sm:$0xff]   ;;  %v4953_v35 = vld [vmem:[#allocation5 + $0xc] ss:$20 sps:$4 sm:$0xff]   ;;  %v6297_v36 = vpack.c.bf16 %v545_v33, %v545_v33  ;;  %v4951_v37 = vld [vmem:[#allocation5 + $0x8] ss:$20 sps:$4 sm:$0xff]  }
 0x159   : > { %2379 = vmatpush1.bf16.msra.mxu0 %v4923_v15  ;;  %v4955_v39 = vld [vmem:[#allocation5 + $0x16c] ss:$20 sps:$4 sm:$0xff]   ;;  %v4957_v41 = vld [vmem:[#allocation5 + $0x30] ss:$20 sps:$4 sm:$0xff]   ;;  %v4960_v42 = vld [vmem:[#allocation5 + $0x168] ss:$20 sps:$4 sm:$0xff]  }
 0x15a   : > { %2502 = vmatpush1.bf16.msra.mxu1 %v4924_v16  ;;  %2380 = vmatprep.subr.bf16.mxu0 %v4925_v17  ;;  %v4965_v44 = vld [vmem:[#allocation5 + $0x5c] ss:$20 sps:$4 sm:$0xff]   ;;  %v4963_v45 = vld [vmem:[#allocation5 + $0x58] ss:$20 sps:$4 sm:$0xff]   ;;  %v4969_v50 = vld [vmem:[#allocation5 + $0x80] ss:$20 sps:$4 sm:$0xff]  }
 0x15b   : > { %2503 = vmatprep.subr.bf16.mxu1 %v4927_v18  ;;  %v4966_v46 = vld [vmem:[#allocation5 + $0x190] ss:$20 sps:$4 sm:$0xff]   ;;  %v4972_v51 = vld [vmem:[#allocation5 + $0x1b8] ss:$20 sps:$4 sm:$0xff]   ;;  %v4975_v55 = vld [vmem:[#allocation5 + $0xa8] ss:$20 sps:$4 sm:$0xff]  }
 0x15c   : > { %v4967_v47 = vld [vmem:[#allocation5 + $0x1bc] ss:$20 sps:$4 sm:$0xff]   ;;  %v4971_v48 = vld [vmem:[#allocation5 + $0x84] ss:$20 sps:$4 sm:$0xff]   ;;  %v4977_v54 = vld [vmem:[#allocation5 + $0xac] ss:$20 sps:$4 sm:$0xff]  }
 0x15d   : > { %2381 = vmatpush1.bf16.msra.mxu0 %v4929_v19  ;;  %v540_v49 = vld [vmem:[%s6269_s22 + $0x8] sm:$0xff]  ;;  %v4979_v57 = vld [vmem:[#allocation5 + $0x20c] ss:$20 sps:$4 sm:$0xff]   ;;  %s537_s29 = scalar_lea.vmem [#allocation20], %s4131_s0  ;;  %s6498_s25 = sld [smem:[#allocation33_spill]] }
 0x15e   : > { %2504 = vmatpush1.bf16.msra.mxu1 %v4930_v20  ;;  %2382 = vmatprep.subr.bf16.mxu0 %v4931_v21  ;;  %v6301_v52 = vpack.c.bf16 %v540_v49, %v540_v49  ;;  %v4973_v53 = vld [vmem:[#allocation5 + $0x1e4] ss:$20 sps:$4 sm:$0xff]   ;;  %v4978_v56 = vld [vmem:[#allocation5 + $0x1e0] ss:$20 sps:$4 sm:$0xff]   ;;  %v4984_v60 = vld [vmem:[#allocation5 + $0x208] ss:$20 sps:$4 sm:$0xff]  }
 0x15f   : > { %2505 = vmatprep.subr.bf16.mxu1 %v4933_v22  ;;  %v4983_v58 = vld [vmem:[#allocation5 + $0xd4] ss:$20 sps:$4 sm:$0xff]   ;;  %v4981_v59 = vld [vmem:[#allocation5 + $0xd0] ss:$20 sps:$4 sm:$0xff]   ;;  %v4987_v63 = vld [vmem:[#allocation5 + $0xf8] ss:$20 sps:$4 sm:$0xff]  }
 0x160   : > { %2404 = vmatprep.mubr.bf16.mxu0 %v6301_v52  ;;  %v4985_v61 = vld [vmem:[#allocation5 + $0x234] ss:$20 sps:$4 sm:$0xff]   ;;  %v4989_v62 = vld [vmem:[#allocation5 + $0xfc] ss:$20 sps:$4 sm:$0xff]   ;;  %v4995_v3 = vld [vmem:[#allocation5 + $0x124] ss:$20 sps:$4 sm:$0xff]  }
 0x161   : > { %2383 = vmatpush1.bf16.msra.mxu0 %v4935_v23  ;;  %v4990_v1 = vld [vmem:[#allocation5 + $0x230] ss:$20 sps:$4 sm:$0xff]   ;;  %v4993_v4 = vld [vmem:[#allocation5 + $0x120] ss:$20 sps:$4 sm:$0xff]   ;;  %v4996_v5 = vld [vmem:[#allocation5 + $0x258] ss:$20 sps:$4 sm:$0xff]  }
 0x162   : > { %2506 = vmatpush1.bf16.msra.mxu1 %v4936_v24  ;;  %2384 = vmatprep.subr.bf16.mxu0 %v4937_v25  ;;  %v4991_v2 = vld [vmem:[#allocation5 + $0x25c] ss:$20 sps:$4 sm:$0xff]   ;;  %v4999_v6 = vld [vmem:[#allocation5 + $0x284] ss:$20 sps:$4 sm:$0xff]   ;;  %v5002_v8 = vld [vmem:[#allocation5 + $0x14c] ss:$20 sps:$4 sm:$0xff]  }
 0x163   : > { %2507 = vmatprep.subr.bf16.mxu1 %v4939_v26  ;;  %v539_v7 = vld [vmem:[%s6269_s22] sm:$0xff]  ;;  %v5020_v21 = vld [vmem:[#allocation5 + $0x1c4] ss:$20 sps:$4 sm:$0xff]   ;;  %s3941_s24 = sshll.u32 %s537_s29, 4  ;;  %s6406_s3 = scalar_lea.hbm %s6498_s25, %s4528_s11  ;;  %s6408_s24 = int_to_ptr.vmem [resolvable:$true] %s3941_s24 }
 0x164   : > { %v4997_v9 = vld [vmem:[#allocation5 + $0x280] ss:$20 sps:$4 sm:$0xff]   ;;  %v6306_v10 = vpack.c.bf16 %v539_v7, %v539_v7  ;;  %v5000_v11 = vld [vmem:[#allocation5 + $0x148] ss:$20 sps:$4 sm:$0xff]   ;;  %v5006_v15 = vld [vmem:[#allocation5 + $0x170] ss:$20 sps:$4 sm:$0xff]  }
 0x165   : > { %2385 = vmatpush1.bf16.msra.mxu0 %v4941_v27  ;;  %v5005_v12 = vld [vmem:[#allocation5 + $0x2ac] ss:$20 sps:$4 sm:$0xff]   ;;  %v5008_v13 = vld [vmem:[#allocation5 + $0x174] ss:$20 sps:$4 sm:$0xff]   ;;  %v5014_v17 = vld [vmem:[#allocation5 + $0x19c] ss:$20 sps:$4 sm:$0xff]  }
 0x166   : > { %2508 = vmatpush1.bf16.msra.mxu1 %v4942_v28  ;;  %2386 = vmatprep.subr.bf16.mxu0 %v4943_v29  ;;  %v5003_v14 = vld [vmem:[#allocation5 + $0x2a8] ss:$20 sps:$4 sm:$0xff]   ;;  %v5009_v18 = vld [vmem:[#allocation5 + $0x2d0] ss:$20 sps:$4 sm:$0xff]   ;;  %v5012_v19 = vld [vmem:[#allocation5 + $0x198] ss:$20 sps:$4 sm:$0xff]  }
 0x167   : > { %2509 = vmatprep.subr.bf16.mxu1 %v4945_v30  ;;  %v5011_v16 = vld [vmem:[#allocation5 + $0x2d4] ss:$20 sps:$4 sm:$0xff]   ;;  %v5017_v20 = vld [vmem:[#allocation5 + $0x2fc] ss:$20 sps:$4 sm:$0xff]   ;;  %v5015_v22 = vld [vmem:[#allocation5 + $0x2f8] ss:$20 sps:$4 sm:$0xff]  }
 0x168   : > { %v5018_v23 = vld [vmem:[#allocation5 + $0x1c0] ss:$20 sps:$4 sm:$0xff]   ;;  %v5023_v24 = vld [vmem:[#allocation5 + $0x324] ss:$20 sps:$4 sm:$0xff]   ;;  %v5024_v27 = vld [vmem:[#allocation5 + $0x1e8] ss:$20 sps:$4 sm:$0xff]  }
 0x169   : > { %2387 = vmatpush1.bf16.msra.mxu0 %v4947_v31  ;;  %v5026_v25 = vld [vmem:[#allocation5 + $0x1ec] ss:$20 sps:$4 sm:$0xff]   ;;  %v5032_v29 = vld [vmem:[#allocation5 + $0x214] ss:$20 sps:$4 sm:$0xff]   ;;  %v5030_v31 = vld [vmem:[#allocation5 + $0x210] ss:$20 sps:$4 sm:$0xff]  }
 0x16a   : > { %2510 = vmatpush1.bf16.msra.mxu1 %v4948_v32  ;;  %2388 = vmatprep.subr.bf16.mxu0 %v4949_v34  ;;  %v5021_v26 = vld [vmem:[#allocation5 + $0x320] ss:$20 sps:$4 sm:$0xff]   ;;  %v5027_v30 = vld [vmem:[#allocation5 + $0x348] ss:$20 sps:$4 sm:$0xff]   ;;  %v5081_v7 = vld [vmem:[#allocation5 + $0x4b0] ss:$20 sps:$4 sm:$0xff]  }
 0x16b   : > { %2536 = vmatprep.subr.bf16.mxu1 %v4953_v35  ;;  %v5029_v28 = vld [vmem:[#allocation5 + $0x34c] ss:$20 sps:$4 sm:$0xff]   ;;  %v5035_v32 = vld [vmem:[#allocation5 + $0x374] ss:$20 sps:$4 sm:$0xff]   ;;  %v5038_v33 = vld [vmem:[#allocation5 + $0x23c] ss:$20 sps:$4 sm:$0xff]  }
 0x16c   : > { %v542_v34 = vld [vmem:[%s6269_s22 + $0x18] sm:$0xff]  ;;  %s3928_s2 = scalar_lea.sflag [#allocation4], %s6265_s30  ;;  %s5773_s23 = scalar_lea.vmem %s6408_s24, 128 }
 0x16d   : > { %2528 = vmatmul.mubr.bf16.vlgmr.msra.gmra.mrb[0].mxu1 %v6297_v36  ;;  %2389 = vmatpush1.bf16.msra.mxu0 %v4954_v38  ;;  %v5033_v35 = vld [vmem:[#allocation5 + $0x370] ss:$20 sps:$4 sm:$0xff]   ;;  %v5036_v38 = vld [vmem:[#allocation5 + $0x238] ss:$20 sps:$4 sm:$0xff]   ;;  %v5051_v49 = vld [vmem:[#allocation5 + $0x3e8] ss:$20 sps:$4 sm:$0xff]   ;;  %p5774_p11 = scmp.ne.s32.totalorder %s6408_s24, %s5773_s23 }
 0x16e   : > { %2537 = vmatpush1.bf16.msra.mxu1 %v4951_v37  ;;  %2390 = vmatprep.subr.bf16.mxu0 %v4955_v39  ;;  %v6310_v37 = vpack.c.bf16 %v542_v34, %v542_v34  ;;  %v5041_v39 = vld [vmem:[#allocation5 + $0x39c] ss:$20 sps:$4 sm:$0xff]   ;;  %v5119_v34 = vld [vmem:[#allocation5 + $0x5a4] ss:$20 sps:$4 sm:$0xff]   ;;  %p6499_p12 = scmp.ne.s32.totalorder %s6482_s21, 0  ;;  %s5881_s26 = smov [#allocation20]  }
 0x16f   : > { %2538 = vmatprep.subr.bf16.mxu1 %v4959_v40  ;;  %2568 = vmatprep.mubr.bf16.mxu1 %v6301_v52  ;;  %v5044_v40 = vld [vmem:[#allocation5 + $0x264] ss:$20 sps:$4 sm:$0xff]   ;;  %s5777_s28 = sshll.u32 %s5881_s26, 4  ;;  %s5778_s28 = int_to_ptr.vmem [resolvable:$false] %s5777_s28 }
 0x170   : > { %p5775_p13 = pnand %p5774_p11, %p6499_p12  ;;  %s5779_s12 = scalar_lea.vmem %s5778_s28, 256 }
 0x171   : > { %2391 = vmatpush1.bf16.msra.mxu0 %v4960_v42  ;;  %v5042_v42 = vld [vmem:[#allocation5 + $0x260] ss:$20 sps:$4 sm:$0xff]   ;;  %p5780_p7 = scmp.lt.s32.totalorder %s6408_s24, %s5778_s28  ;;  %p5781_p9 = scmp.lt.s32.totalorder %s5779_s12, %s5773_s23 }
 0x172   : > { %2539 = vmatpush1.bf16.msra.mxu1 %v4957_v41  ;;  %2392 = vmatprep.subr.bf16.mxu0 %v4961_v43  ;;  %v5039_v41 = vld [vmem:[#allocation5 + $0x398] ss:$20 sps:$4 sm:$0xff]   ;;  %p5776_p3 = pneg %p5775_p13 }
 0x173   : > { %2540 = vmatprep.subr.bf16.mxu1 %v4965_v44  ;;  %v5047_v43 = vld [vmem:[#allocation5 + $0x3c4] ss:$20 sps:$4 sm:$0xff]   ;;  %v5050_v44 = vld [vmem:[#allocation5 + $0x28c] ss:$20 sps:$4 sm:$0xff]   ;;  %p5782_p4 = por %p5781_p9, %p5780_p7 }
 0x175   : > { %2393 = vmatpush1.bf16.msra.mxu0 %v4966_v46  ;;  %v5048_v46 = vld [vmem:[#allocation5 + $0x288] ss:$20 sps:$4 sm:$0xff]   ;;  %p5783_p8 = pnand %p5782_p4, %p5776_p3 }
 0x176   : > { %2541 = vmatpush1.bf16.msra.mxu1 %v4963_v45  ;;  %2394 = vmatprep.subr.bf16.mxu0 %v4967_v47  ;;  %v5045_v45 = vld [vmem:[#allocation5 + $0x3c0] ss:$20 sps:$4 sm:$0xff]  }
 0x177   : > { %2542 = vmatprep.subr.bf16.mxu1 %v4971_v48  ;;  %v5053_v47 = vld [vmem:[#allocation5 + $0x3ec] ss:$20 sps:$4 sm:$0xff]   ;;  %v5056_v48 = vld [vmem:[#allocation5 + $0x2b4] ss:$20 sps:$4 sm:$0xff]  }
 0x179   : > { %2395 = vmatpush1.bf16.msra.mxu0 %v4972_v51  ;;  %v5059_v51 = vld [vmem:[#allocation5 + $0x414] ss:$20 sps:$4 sm:$0xff]  }
 0x17a   : > { %2543 = vmatpush1.bf16.msra.mxu1 %v4969_v50  ;;  %2396 = vmatprep.subr.bf16.mxu0 %v4973_v53  ;;  %v5054_v50 = vld [vmem:[#allocation5 + $0x2b0] ss:$20 sps:$4 sm:$0xff]  }
 0x17b   : > { %2544 = vmatprep.subr.bf16.mxu1 %v4977_v54  ;;  %v5062_v53 = vld [vmem:[#allocation5 + $0x2dc] ss:$20 sps:$4 sm:$0xff]  }
 0x17c   : > { %v5057_v54 = vld [vmem:[#allocation5 + $0x410] ss:$20 sps:$4 sm:$0xff]  }
 0x17d   : > { %2397 = vmatpush1.bf16.msra.mxu0 %v4978_v56  ;;  %v5065_v56 = vld [vmem:[#allocation5 + $0x43c] ss:$20 sps:$4 sm:$0xff]  }
 0x17e   : > { %2545 = vmatpush1.bf16.msra.mxu1 %v4975_v55  ;;  %2398 = vmatprep.subr.bf16.mxu0 %v4979_v57  ;;  %v5060_v55 = vld [vmem:[#allocation5 + $0x2d8] ss:$20 sps:$4 sm:$0xff]  }
 0x17f   : > { %2546 = vmatprep.subr.bf16.mxu1 %v4983_v58  ;;  %v5068_v57 = vld [vmem:[#allocation5 + $0x304] ss:$20 sps:$4 sm:$0xff]  }
 0x180   : > { %v5063_v58 = vld [vmem:[#allocation5 + $0x438] ss:$20 sps:$4 sm:$0xff]  }
 0x181   : > { %2399 = vmatpush1.bf16.msra.mxu0 %v4984_v60  ;;  %v5071_v60 = vld [vmem:[#allocation5 + $0x464] ss:$20 sps:$4 sm:$0xff]  }
 0x182   : > { %2547 = vmatpush1.bf16.msra.mxu1 %v4981_v59  ;;  %2400 = vmatprep.subr.bf16.mxu0 %v4985_v61  ;;  %v5066_v59 = vld [vmem:[#allocation5 + $0x300] ss:$20 sps:$4 sm:$0xff]  }
 0x183   : > { %2548 = vmatprep.subr.bf16.mxu1 %v4989_v62  ;;  %v5074_v61 = vld [vmem:[#allocation5 + $0x32c] ss:$20 sps:$4 sm:$0xff]  }
 0x184   : > { %v5069_v62 = vld [vmem:[#allocation5 + $0x460] ss:$20 sps:$4 sm:$0xff]  }
 0x185   : > { %2401 = vmatpush1.bf16.msra.mxu0 %v4990_v1  ;;  %v5077_v1 = vld [vmem:[#allocation5 + $0x48c] ss:$20 sps:$4 sm:$0xff]  }
 0x186   : > { %2549 = vmatpush1.bf16.msra.mxu1 %v4987_v63  ;;  %2402 = vmatprep.subr.bf16.mxu0 %v4991_v2  ;;  %v5072_v63 = vld [vmem:[#allocation5 + $0x328] ss:$20 sps:$4 sm:$0xff]  }
 0x187   : > { %2550 = vmatprep.subr.bf16.mxu1 %v4995_v3  ;;  %v5080_v2 = vld [vmem:[#allocation5 + $0x354] ss:$20 sps:$4 sm:$0xff]  }
 0x188   : > { %v5075_v3 = vld [vmem:[#allocation5 + $0x488] ss:$20 sps:$4 sm:$0xff]  }
 0x189   : > { %2403 = vmatpush1.bf16.msra.mxu0 %v4996_v5  ;;  %v5083_v5 = vld [vmem:[#allocation5 + $0x4b4] ss:$20 sps:$4 sm:$0xff]  }
 0x18a   : > { %2551 = vmatpush1.bf16.msra.mxu1 %v4993_v4  ;;  %2413 = vmatprep.subr.bf16.mxu0 %v4999_v6  ;;  %v5078_v4 = vld [vmem:[#allocation5 + $0x350] ss:$20 sps:$4 sm:$0xff]  }
 0x18b   : > { %2552 = vmatprep.subr.bf16.mxu1 %v5002_v8  ;;  %v5086_v6 = vld [vmem:[#allocation5 + $0x37c] ss:$20 sps:$4 sm:$0xff]   ;;  %v5084_v8 = vld [vmem:[#allocation5 + $0x378] ss:$20 sps:$4 sm:$0xff]  }
 0x18c   : > { %2405 = vmatmul.mubr.bf16.vlgmr.msra.gmra.mrb[0].mxu0 %v6306_v10 }
 0x18d   : > { %2414 = vmatpush1.bf16.msra.mxu0 %v4997_v9  ;;  %2445 = vmatprep.mubr.bf16.mxu0 %v6310_v37  ;;  %v5089_v9 = vld [vmem:[#allocation5 + $0x4dc] ss:$20 sps:$4 sm:$0xff]  }
 0x18e   : > { %2553 = vmatpush1.bf16.msra.mxu1 %v5000_v11  ;;  %2415 = vmatprep.subr.bf16.mxu0 %v5005_v12  ;;  %v5092_v11 = vld [vmem:[#allocation5 + $0x3a4] ss:$20 sps:$4 sm:$0xff]  }
 0x18f   : > { %2554 = vmatprep.subr.bf16.mxu1 %v5008_v13  ;;  %v5087_v12 = vld [vmem:[#allocation5 + $0x4d8] ss:$20 sps:$4 sm:$0xff]   ;;  %v5090_v13 = vld [vmem:[#allocation5 + $0x3a0] ss:$20 sps:$4 sm:$0xff]  }
 0x191   : > { %2416 = vmatpush1.bf16.msra.mxu0 %v5003_v14  ;;  %v541_v14 = vld [vmem:[%s6269_s22 + $0x10] sm:$0xff] }
 0x192   : > { %2555 = vmatpush1.bf16.msra.mxu1 %v5006_v15  ;;  %2417 = vmatprep.subr.bf16.mxu0 %v5011_v16  ;;  %v5095_v15 = vld [vmem:[#allocation5 + $0x504] ss:$20 sps:$4 sm:$0xff]   ;;  %v5098_v16 = vld [vmem:[#allocation5 + $0x3cc] ss:$20 sps:$4 sm:$0xff]  }
 0x193   : > { %2556 = vmatprep.subr.bf16.mxu1 %v5014_v17  ;;  %v5093_v17 = vld [vmem:[#allocation5 + $0x500] ss:$20 sps:$4 sm:$0xff]  }
 0x195   : > { %2418 = vmatpush1.bf16.msra.mxu0 %v5009_v18  ;;  %v6316_v18 = vpack.c.bf16 %v541_v14, %v541_v14  ;;  %v5174_v14 = vld [vmem:[#allocation5 + $0x5d0] ss:$20 sps:$4 sm:$0xff]  }
 0x196   : > { %2557 = vmatpush1.bf16.msra.mxu1 %v5012_v19  ;;  %2419 = vmatprep.subr.bf16.mxu0 %v5017_v20  ;;  %v5096_v19 = vld [vmem:[#allocation5 + $0x3c8] ss:$20 sps:$4 sm:$0xff]   ;;  %v5101_v20 = vld [vmem:[#allocation5 + $0x52c] ss:$20 sps:$4 sm:$0xff]  }
 0x197   : > { %2558 = vmatprep.subr.bf16.mxu1 %v5020_v21  ;;  %v5104_v21 = vld [vmem:[#allocation5 + $0x3f4] ss:$20 sps:$4 sm:$0xff]  }
 0x199   : > { %2420 = vmatpush1.bf16.msra.mxu0 %v5015_v22  ;;  %v544_v22 = vld [vmem:[%s6269_s22 + $0x28] sm:$0xff] }
 0x19a   : > { %2559 = vmatpush1.bf16.msra.mxu1 %v5018_v23  ;;  %2421 = vmatprep.subr.bf16.mxu0 %v5023_v24  ;;  %v6319_v23 = vpack.c.bf16 %v544_v22, %v544_v22  ;;  %v5099_v24 = vld [vmem:[#allocation5 + $0x528] ss:$20 sps:$4 sm:$0xff]   ;;  %v5183_v22 = vld [vmem:[#allocation5 + $0x758] ss:$20 sps:$4 sm:$0xff]  }
 0x19b   : > { %2560 = vmatprep.subr.bf16.mxu1 %v5026_v25  ;;  %v5102_v25 = vld [vmem:[#allocation5 + $0x3f0] ss:$20 sps:$4 sm:$0xff]  }
 0x19d   : > { %2422 = vmatpush1.bf16.msra.mxu0 %v5021_v26  ;;  %v5107_v26 = vld [vmem:[#allocation5 + $0x554] ss:$20 sps:$4 sm:$0xff]  }
 0x19e   : > { %2561 = vmatpush1.bf16.msra.mxu1 %v5024_v27  ;;  %2423 = vmatprep.subr.bf16.mxu0 %v5029_v28  ;;  %v5110_v27 = vld [vmem:[#allocation5 + $0x41c] ss:$20 sps:$4 sm:$0xff]  }
 0x19f   : > { %2562 = vmatprep.subr.bf16.mxu1 %v5032_v29  ;;  %v5105_v28 = vld [vmem:[#allocation5 + $0x550] ss:$20 sps:$4 sm:$0xff]   ;;  %v5108_v29 = vld [vmem:[#allocation5 + $0x418] ss:$20 sps:$4 sm:$0xff]  }
 0x1a1   : > { %2424 = vmatpush1.bf16.msra.mxu0 %v5027_v30  ;;  %v5113_v30 = vld [vmem:[#allocation5 + $0x57c] ss:$20 sps:$4 sm:$0xff]  }
 0x1a2   : > { %2563 = vmatpush1.bf16.msra.mxu1 %v5030_v31  ;;  %2425 = vmatprep.subr.bf16.mxu0 %v5035_v32  ;;  %v5116_v31 = vld [vmem:[#allocation5 + $0x444] ss:$20 sps:$4 sm:$0xff]  }
 0x1a3   : > { %2564 = vmatprep.subr.bf16.mxu1 %v5038_v33  ;;  %v5111_v32 = vld [vmem:[#allocation5 + $0x578] ss:$20 sps:$4 sm:$0xff]   ;;  %v5114_v33 = vld [vmem:[#allocation5 + $0x440] ss:$20 sps:$4 sm:$0xff]  }
 0x1a5   : > { %2426 = vmatpush1.bf16.msra.mxu0 %v5033_v35  ;;  %v5122_v35 = vld [vmem:[#allocation5 + $0x46c] ss:$20 sps:$4 sm:$0xff]  }
 0x1a6   : > { %2565 = vmatpush1.bf16.msra.mxu1 %v5036_v38  ;;  %2427 = vmatprep.subr.bf16.mxu0 %v5041_v39  ;;  %v5117_v38 = vld [vmem:[#allocation5 + $0x5a0] ss:$20 sps:$4 sm:$0xff]   ;;  %v5120_v39 = vld [vmem:[#allocation5 + $0x468] ss:$20 sps:$4 sm:$0xff]  }
 0x1a7   : > { %2566 = vmatprep.subr.bf16.mxu1 %v5044_v40  ;;  %v5125_v40 = vld [vmem:[#allocation5 + $0x5cc] ss:$20 sps:$4 sm:$0xff]  }
 0x1a9   : > { %2428 = vmatpush1.bf16.msra.mxu0 %v5039_v41  ;;  %v5128_v41 = vld [vmem:[#allocation5 + $0x494] ss:$20 sps:$4 sm:$0xff]  }
 0x1aa   : > { %2567 = vmatpush1.bf16.msra.mxu1 %v5042_v42  ;;  %2429 = vmatprep.subr.bf16.mxu0 %v5047_v43  ;;  %v5123_v42 = vld [vmem:[#allocation5 + $0x5c8] ss:$20 sps:$4 sm:$0xff]   ;;  %v5126_v43 = vld [vmem:[#allocation5 + $0x490] ss:$20 sps:$4 sm:$0xff]  }
 0x1ab   : > { %2577 = vmatprep.subr.bf16.mxu1 %v5050_v44  ;;  %v5131_v44 = vld [vmem:[#allocation5 + $0x5f4] ss:$20 sps:$4 sm:$0xff]  }
 0x1ad   : > { %2569 = vmatmul.mubr.bf16.vlgmr.msra.gmra.mrb[4].mxu1 %v6306_v10  ;;  %2430 = vmatpush1.bf16.msra.mxu0 %v5045_v45  ;;  %v5134_v45 = vld [vmem:[#allocation5 + $0x4bc] ss:$20 sps:$4 sm:$0xff]  }
 0x1ae   : > { %2578 = vmatpush1.bf16.msra.mxu1 %v5048_v46  ;;  %2431 = vmatprep.subr.bf16.mxu0 %v5053_v47  ;;  %v5129_v46 = vld [vmem:[#allocation5 + $0x5f0] ss:$20 sps:$4 sm:$0xff]   ;;  %v5132_v47 = vld [vmem:[#allocation5 + $0x4b8] ss:$20 sps:$4 sm:$0xff]  }
 0x1af   : > { %2579 = vmatprep.subr.bf16.mxu1 %v5056_v48  ;;  %2609 = vmatprep.mubr.bf16.mxu1 %v6310_v37  ;;  %v5137_v48 = vld [vmem:[#allocation5 + $0x61c] ss:$20 sps:$4 sm:$0xff]  }
 0x1b1   : > { %2432 = vmatpush1.bf16.msra.mxu0 %v5051_v49  ;;  %v5140_v49 = vld [vmem:[#allocation5 + $0x4e4] ss:$20 sps:$4 sm:$0xff]  }
 0x1b2   : > { %2580 = vmatpush1.bf16.msra.mxu1 %v5054_v50  ;;  %2433 = vmatprep.subr.bf16.mxu0 %v5059_v51  ;;  %v5135_v50 = vld [vmem:[#allocation5 + $0x618] ss:$20 sps:$4 sm:$0xff]   ;;  %v5138_v51 = vld [vmem:[#allocation5 + $0x4e0] ss:$20 sps:$4 sm:$0xff]  }
 0x1b3   : > { %2581 = vmatprep.subr.bf16.mxu1 %v5062_v53  ;;  %v5143_v53 = vld [vmem:[#allocation5 + $0x644] ss:$20 sps:$4 sm:$0xff]  }
 0x1b5   : > { %2434 = vmatpush1.bf16.msra.mxu0 %v5057_v54  ;;  %v5146_v54 = vld [vmem:[#allocation5 + $0x50c] ss:$20 sps:$4 sm:$0xff]  }
 0x1b6   : > { %2582 = vmatpush1.bf16.msra.mxu1 %v5060_v55  ;;  %2435 = vmatprep.subr.bf16.mxu0 %v5065_v56  ;;  %v5141_v55 = vld [vmem:[#allocation5 + $0x640] ss:$20 sps:$4 sm:$0xff]   ;;  %v5144_v56 = vld [vmem:[#allocation5 + $0x508] ss:$20 sps:$4 sm:$0xff]  }
 0x1b7   : > { %2583 = vmatprep.subr.bf16.mxu1 %v5068_v57  ;;  %v5149_v57 = vld [vmem:[#allocation5 + $0x66c] ss:$20 sps:$4 sm:$0xff]  }
 0x1b9   : > { %2436 = vmatpush1.bf16.msra.mxu0 %v5063_v58  ;;  %v5152_v58 = vld [vmem:[#allocation5 + $0x534] ss:$20 sps:$4 sm:$0xff]  }
 0x1ba   : > { %2584 = vmatpush1.bf16.msra.mxu1 %v5066_v59  ;;  %2437 = vmatprep.subr.bf16.mxu0 %v5071_v60  ;;  %v5147_v59 = vld [vmem:[#allocation5 + $0x668] ss:$20 sps:$4 sm:$0xff]   ;;  %v5150_v60 = vld [vmem:[#allocation5 + $0x530] ss:$20 sps:$4 sm:$0xff]  }
 0x1bb   : > { %2585 = vmatprep.subr.bf16.mxu1 %v5074_v61  ;;  %v5155_v61 = vld [vmem:[#allocation5 + $0x694] ss:$20 sps:$4 sm:$0xff]  }
 0x1bd   : > { %2438 = vmatpush1.bf16.msra.mxu0 %v5069_v62  ;;  %v5158_v62 = vld [vmem:[#allocation5 + $0x55c] ss:$20 sps:$4 sm:$0xff]  }
 0x1be   : > { %2586 = vmatpush1.bf16.msra.mxu1 %v5072_v63  ;;  %2439 = vmatprep.subr.bf16.mxu0 %v5077_v1  ;;  %v5153_v63 = vld [vmem:[#allocation5 + $0x690] ss:$20 sps:$4 sm:$0xff]   ;;  %v5156_v1 = vld [vmem:[#allocation5 + $0x558] ss:$20 sps:$4 sm:$0xff]  }
 0x1bf   : > { %2587 = vmatprep.subr.bf16.mxu1 %v5080_v2  ;;  %v5161_v2 = vld [vmem:[#allocation5 + $0x6bc] ss:$20 sps:$4 sm:$0xff]  }
 0x1c1   : > { %2440 = vmatpush1.bf16.msra.mxu0 %v5075_v3  ;;  %v5164_v3 = vld [vmem:[#allocation5 + $0x584] ss:$20 sps:$4 sm:$0xff]  }
 0x1c2   : > { %2588 = vmatpush1.bf16.msra.mxu1 %v5078_v4  ;;  %2441 = vmatprep.subr.bf16.mxu0 %v5083_v5  ;;  %v5159_v4 = vld [vmem:[#allocation5 + $0x6b8] ss:$20 sps:$4 sm:$0xff]   ;;  %v5162_v5 = vld [vmem:[#allocation5 + $0x580] ss:$20 sps:$4 sm:$0xff]  }
 0x1c3   : > { %2589 = vmatprep.subr.bf16.mxu1 %v5086_v6  ;;  %v5167_v6 = vld [vmem:[#allocation5 + $0x6e4] ss:$20 sps:$4 sm:$0xff]  }
 0x1c5   : > { %2442 = vmatpush1.bf16.msra.mxu0 %v5081_v7  ;;  %v5170_v7 = vld [vmem:[#allocation5 + $0x5ac] ss:$20 sps:$4 sm:$0xff]  }
 0x1c6   : > { %2590 = vmatpush1.bf16.msra.mxu1 %v5084_v8  ;;  %2443 = vmatprep.subr.bf16.mxu0 %v5089_v9  ;;  %v5165_v8 = vld [vmem:[#allocation5 + $0x6e0] ss:$20 sps:$4 sm:$0xff]   ;;  %v5168_v9 = vld [vmem:[#allocation5 + $0x5a8] ss:$20 sps:$4 sm:$0xff]  }
 0x1c7   : > { %2591 = vmatprep.subr.bf16.mxu1 %v5092_v11  ;;  %v5173_v11 = vld [vmem:[#allocation5 + $0x70c] ss:$20 sps:$4 sm:$0xff]  }
 0x1c9   : > { %2444 = vmatpush1.bf16.msra.mxu0 %v5087_v12  ;;  %v5176_v12 = vld [vmem:[#allocation5 + $0x5d4] ss:$20 sps:$4 sm:$0xff]  }
 0x1ca   : > { %2592 = vmatpush1.bf16.msra.mxu1 %v5090_v13  ;;  %2454 = vmatprep.subr.bf16.mxu0 %v5095_v15  ;;  %v5171_v13 = vld [vmem:[#allocation5 + $0x708] ss:$20 sps:$4 sm:$0xff]  }
 0x1cb   : > { %2593 = vmatprep.subr.bf16.mxu1 %v5098_v16  ;;  %v5179_v15 = vld [vmem:[#allocation5 + $0x734] ss:$20 sps:$4 sm:$0xff]   ;;  %v5182_v16 = vld [vmem:[#allocation5 + $0x5fc] ss:$20 sps:$4 sm:$0xff]  }
 0x1cc   : > { %2446 = vmatmul.mubr.bf16.vlgmr.msra.gmra.mrb[0].mxu0 %v6316_v18 }
 0x1cd   : > { %2455 = vmatpush1.bf16.msra.mxu0 %v5093_v17  ;;  %2486 = vmatprep.mubr.bf16.mxu0 %v6319_v23  ;;  %v5177_v17 = vld [vmem:[#allocation5 + $0x730] ss:$20 sps:$4 sm:$0xff]  }
 0x1ce   : > { %2594 = vmatpush1.bf16.msra.mxu1 %v5096_v19  ;;  %2456 = vmatprep.subr.bf16.mxu0 %v5101_v20  ;;  %v5180_v19 = vld [vmem:[#allocation5 + $0x5f8] ss:$20 sps:$4 sm:$0xff]   ;;  %v5185_v20 = vld [vmem:[#allocation5 + $0x75c] ss:$20 sps:$4 sm:$0xff]  }
 0x1cf   : > { %2595 = vmatprep.subr.bf16.mxu1 %v5104_v21  ;;  %v5188_v21 = vld [vmem:[#allocation5 + $0x624] ss:$20 sps:$4 sm:$0xff]  }
 0x1d1   : > { %2457 = vmatpush1.bf16.msra.mxu0 %v5099_v24  ;;  %v5186_v24 = vld [vmem:[#allocation5 + $0x620] ss:$20 sps:$4 sm:$0xff]  }
 0x1d2   : > { %2596 = vmatpush1.bf16.msra.mxu1 %v5102_v25  ;;  %2458 = vmatprep.subr.bf16.mxu0 %v5107_v26  ;;  %v543_v25 = vld [vmem:[%s6269_s22 + $0x20] sm:$0xff] }
 0x1d3   : > { %2597 = vmatprep.subr.bf16.mxu1 %v5110_v27  ;;  %v5191_v26 = vld [vmem:[#allocation5 + $0x64c] ss:$20 sps:$4 sm:$0xff]   ;;  %v5216_v27 = vld [vmem:[#allocation5 + $0x150] ss:$20 sps:$4 sm:$0xff]  }
 0x1d5   : > { %2459 = vmatpush1.bf16.msra.mxu0 %v5105_v28  ;;  %v5189_v28 = vld [vmem:[#allocation5 + $0x648] ss:$20 sps:$4 sm:$0xff]  }
 0x1d6   : > { %2598 = vmatpush1.bf16.msra.mxu1 %v5108_v29  ;;  %2460 = vmatprep.subr.bf16.mxu0 %v5113_v30  ;;  %v6326_v29 = vpack.c.bf16 %v543_v25, %v543_v25  ;;  %v5194_v30 = vld [vmem:[#allocation5 + $0x674] ss:$20 sps:$4 sm:$0xff]  }
 0x1d7   : > { %2599 = vmatprep.subr.bf16.mxu1 %v5116_v31  ;;  %v5217_v31 = vld [vmem:[#allocation5 + $0x10] ss:$20 sps:$4 sm:$0xff]  }
 0x1d9   : > { %2461 = vmatpush1.bf16.msra.mxu0 %v5111_v32  ;;  %v5221_v32 = vld [vmem:[#allocation5 + $0x178] ss:$20 sps:$4 sm:$0xff]  }
 0x1da   : > { %2600 = vmatpush1.bf16.msra.mxu1 %v5114_v33  ;;  %2462 = vmatprep.subr.bf16.mxu0 %v5119_v34  ;;  %v5192_v33 = vld [vmem:[#allocation5 + $0x670] ss:$20 sps:$4 sm:$0xff]  }
 0x1db   : > { %2601 = vmatprep.subr.bf16.mxu1 %v5122_v35  ;;  %v5197_v34 = vld [vmem:[#allocation5 + $0x69c] ss:$20 sps:$4 sm:$0xff]   ;;  %v5222_v35 = vld [vmem:[#allocation5 + $0x38] ss:$20 sps:$4 sm:$0xff]  }
 0x1dd   : > { %2463 = vmatpush1.bf16.msra.mxu0 %v5117_v38  ;;  %v5226_v38 = vld [vmem:[#allocation5 + $0x1a0] ss:$20 sps:$4 sm:$0xff]  }
 0x1de   : > { %2602 = vmatpush1.bf16.msra.mxu1 %v5120_v39  ;;  %2464 = vmatprep.subr.bf16.mxu0 %v5125_v40  ;;  %v5195_v39 = vld [vmem:[#allocation5 + $0x698] ss:$20 sps:$4 sm:$0xff]  }
 0x1df   : > { %2603 = vmatprep.subr.bf16.mxu1 %v5128_v41  ;;  %v5200_v40 = vld [vmem:[#allocation5 + $0x6c4] ss:$20 sps:$4 sm:$0xff]   ;;  %v5227_v41 = vld [vmem:[#allocation5 + $0x60] ss:$20 sps:$4 sm:$0xff]  }
 0x1e1   : > { %2465 = vmatpush1.bf16.msra.mxu0 %v5123_v42  ;;  %v5231_v42 = vld [vmem:[#allocation5 + $0x1c8] ss:$20 sps:$4 sm:$0xff]  }
 0x1e2   : > { %2604 = vmatpush1.bf16.msra.mxu1 %v5126_v43  ;;  %2466 = vmatprep.subr.bf16.mxu0 %v5131_v44  ;;  %v5198_v43 = vld [vmem:[#allocation5 + $0x6c0] ss:$20 sps:$4 sm:$0xff]  }
 0x1e3   : > { %2605 = vmatprep.subr.bf16.mxu1 %v5134_v45  ;;  %v5203_v44 = vld [vmem:[#allocation5 + $0x6ec] ss:$20 sps:$4 sm:$0xff]   ;;  %v5232_v45 = vld [vmem:[#allocation5 + $0x88] ss:$20 sps:$4 sm:$0xff]  }
 0x1e5   : > { %2467 = vmatpush1.bf16.msra.mxu0 %v5129_v46  ;;  %v5236_v46 = vld [vmem:[#allocation5 + $0x1f0] ss:$20 sps:$4 sm:$0xff]  }
 0x1e6   : > { %2606 = vmatpush1.bf16.msra.mxu1 %v5132_v47  ;;  %2468 = vmatprep.subr.bf16.mxu0 %v5137_v48  ;;  %v5201_v47 = vld [vmem:[#allocation5 + $0x6e8] ss:$20 sps:$4 sm:$0xff]  }
 0x1e7   : > { %2607 = vmatprep.subr.bf16.mxu1 %v5140_v49  ;;  %v5206_v48 = vld [vmem:[#allocation5 + $0x714] ss:$20 sps:$4 sm:$0xff]   ;;  %v5241_v49 = vld [vmem:[#allocation5 + $0x218] ss:$20 sps:$4 sm:$0xff]  }
 0x1e9   : > { %2469 = vmatpush1.bf16.msra.mxu0 %v5135_v50  ;;  %v5204_v50 = vld [vmem:[#allocation5 + $0x710] ss:$20 sps:$4 sm:$0xff]  }
 0x1ea   : > { %2608 = vmatpush1.bf16.msra.mxu1 %v5138_v51  ;;  %2470 = vmatprep.subr.bf16.mxu0 %v5143_v53  ;;  %v5209_v51 = vld [vmem:[#allocation5 + $0x73c] ss:$20 sps:$4 sm:$0xff]   ;;  %v5242_v53 = vld [vmem:[#allocation5 + $0xd8] ss:$20 sps:$4 sm:$0xff]  }
 0x1eb   : > { %2618 = vmatprep.subr.bf16.mxu1 %v5146_v54  ;;  %v5246_v54 = vld [vmem:[#allocation5 + $0x240] ss:$20 sps:$4 sm:$0xff]  }
 0x1ed   : > { %2610 = vmatmul.mubr.bf16.vlgmr.msra.gmra.mrb[4].mxu1 %v6316_v18  ;;  %2471 = vmatpush1.bf16.msra.mxu0 %v5141_v55  ;;  %v5207_v55 = vld [vmem:[#allocation5 + $0x738] ss:$20 sps:$4 sm:$0xff]  }
 0x1ee   : > { %2619 = vmatpush1.bf16.msra.mxu1 %v5144_v56  ;;  %2472 = vmatprep.subr.bf16.mxu0 %v5149_v57  ;;  %v5212_v56 = vld [vmem:[#allocation5 + $0x764] ss:$20 sps:$4 sm:$0xff]   ;;  %v5247_v57 = vld [vmem:[#allocation5 + $0x100] ss:$20 sps:$4 sm:$0xff]  }
 0x1ef   : > { %2620 = vmatprep.subr.bf16.mxu1 %v5152_v58  ;;  %2650 = vmatprep.mubr.bf16.mxu1 %v6319_v23  ;;  %v5251_v58 = vld [vmem:[#allocation5 + $0x268] ss:$20 sps:$4 sm:$0xff]  }
 0x1f1   : > { %2473 = vmatpush1.bf16.msra.mxu0 %v5147_v59  ;;  %v5210_v59 = vld [vmem:[#allocation5 + $0x760] ss:$20 sps:$4 sm:$0xff]  }
 0x1f2   : > { %2621 = vmatpush1.bf16.msra.mxu1 %v5150_v60  ;;  %2474 = vmatprep.subr.bf16.mxu0 %v5155_v61  ;;  %v5215_v60 = vld [vmem:[#allocation5 + $0x78c] ss:$20 sps:$4 sm:$0xff]   ;;  %v5252_v61 = vld [vmem:[#allocation5 + $0x128] ss:$20 sps:$4 sm:$0xff]  }
 0x1f3   : > { %2622 = vmatprep.subr.bf16.mxu1 %v5158_v62  ;;  %v5255_v62 = vld [vmem:[#allocation5 + $0x650] ss:$20 sps:$4 sm:$0xff]  }
 0x1f5   : > { %2475 = vmatpush1.bf16.msra.mxu0 %v5153_v63  ;;  %v5213_v63 = vld [vmem:[#allocation5 + $0x788] ss:$20 sps:$4 sm:$0xff]  }
 0x1f6   : > { %2623 = vmatpush1.bf16.msra.mxu1 %v5156_v1  ;;  %2476 = vmatprep.subr.bf16.mxu0 %v5161_v2  ;;  %v5220_v1 = vld [vmem:[#allocation5 + $0x7b4] ss:$20 sps:$4 sm:$0xff]   ;;  %v5256_v2 = vld [vmem:[#allocation5 + $0x510] ss:$20 sps:$4 sm:$0xff]  }
 0x1f7   : > { %2624 = vmatprep.subr.bf16.mxu1 %v5164_v3  ;;  %v5259_v3 = vld [vmem:[#allocation5 + $0x678] ss:$20 sps:$4 sm:$0xff]  }
 0x1f9   : > { %2477 = vmatpush1.bf16.msra.mxu0 %v5159_v4  ;;  %v5218_v4 = vld [vmem:[#allocation5 + $0x7b0] ss:$20 sps:$4 sm:$0xff]  }
 0x1fa   : > { %2625 = vmatpush1.bf16.msra.mxu1 %v5162_v5  ;;  %2478 = vmatprep.subr.bf16.mxu0 %v5167_v6  ;;  %v5225_v5 = vld [vmem:[#allocation5 + $0x7dc] ss:$20 sps:$4 sm:$0xff]   ;;  %v5260_v6 = vld [vmem:[#allocation5 + $0x538] ss:$20 sps:$4 sm:$0xff]  }
 0x1fb   : > { %2626 = vmatprep.subr.bf16.mxu1 %v5170_v7  ;;  %v5263_v7 = vld [vmem:[#allocation5 + $0x6a0] ss:$20 sps:$4 sm:$0xff]  }
 0x1fd   : > { %2479 = vmatpush1.bf16.msra.mxu0 %v5165_v8  ;;  %v5223_v8 = vld [vmem:[#allocation5 + $0x7d8] ss:$20 sps:$4 sm:$0xff]  }
 0x1fe   : > { %2627 = vmatpush1.bf16.msra.mxu1 %v5168_v9  ;;  %2480 = vmatprep.subr.bf16.mxu0 %v5173_v11  ;;  %v5230_v9 = vld [vmem:[#allocation5 + $0x804] ss:$20 sps:$4 sm:$0xff]   ;;  %v5264_v11 = vld [vmem:[#allocation5 + $0x560] ss:$20 sps:$4 sm:$0xff]  }
 0x1ff   : > { %2628 = vmatprep.subr.bf16.mxu1 %v5176_v12  ;;  %v5267_v12 = vld [vmem:[#allocation5 + $0x6c8] ss:$20 sps:$4 sm:$0xff]  }
 0x201   : > { %2481 = vmatpush1.bf16.msra.mxu0 %v5171_v13  ;;  %v5228_v13 = vld [vmem:[#allocation5 + $0x800] ss:$20 sps:$4 sm:$0xff]  }
 0x202   : > { %2629 = vmatpush1.bf16.msra.mxu1 %v5174_v14  ;;  %2482 = vmatprep.subr.bf16.mxu0 %v5179_v15  ;;  %v5268_v14 = vld [vmem:[#allocation5 + $0x588] ss:$20 sps:$4 sm:$0xff]   ;;  %v5271_v15 = vld [vmem:[#allocation5 + $0x6f0] ss:$20 sps:$4 sm:$0xff]  }
 0x203   : > { %2630 = vmatprep.subr.bf16.mxu1 %v5182_v16  ;;  %v5233_v16 = vld [vmem:[#allocation5 + $0x828] ss:$20 sps:$4 sm:$0xff]  }
 0x205   : > { %2483 = vmatpush1.bf16.msra.mxu0 %v5177_v17  ;;  %v5240_v17 = vld [vmem:[#allocation5 + $0x854] ss:$20 sps:$4 sm:$0xff]  }
 0x206   : > { %2631 = vmatpush1.bf16.msra.mxu1 %v5180_v19  ;;  %2484 = vmatprep.subr.bf16.mxu0 %v5185_v20  ;;  %v5272_v19 = vld [vmem:[#allocation5 + $0x5b0] ss:$20 sps:$4 sm:$0xff]  }
 0x207   : > { %2632 = vmatprep.subr.bf16.mxu1 %v5188_v21  ;;  %v5238_v20 = vld [vmem:[#allocation5 + $0x850] ss:$20 sps:$4 sm:$0xff]  }
 0x208   : > { %v5245_v21 = vld [vmem:[#allocation5 + $0x87c] ss:$20 sps:$4 sm:$0xff]  }
 0x209   : > { %2485 = vmatpush1.bf16.msra.mxu0 %v5183_v22  ;;  %v5276_v22 = vld [vmem:[#allocation5 + $0x5d8] ss:$20 sps:$4 sm:$0xff]  }
 0x20a   : > { %2633 = vmatpush1.bf16.msra.mxu1 %v5186_v24  ;;  %4531 = vmatprep.subr.bf16.mxu0 %v5216_v27  ;;  %v5279_v24 = vld [vmem:[#allocation5 + $0x740] ss:$20 sps:$4 sm:$0xff]  }
 0x20b   : > { %2634 = vmatprep.subr.bf16.mxu1 %v5191_v26  ;;  %v5243_v26 = vld [vmem:[#allocation5 + $0x878] ss:$20 sps:$4 sm:$0xff]  }
 0x20c   : > { %2487 = vmatmul.mubr.bf16.vlgmr.msra.gmra.mrb[0].mxu0 %v6326_v29 }
 0x20d   : > { %4532 = vmatpush3.bf16.msra.mxu0 %v5217_v31  ;;  %2732 = vmatprep.mubr.bf16.mxu0 %v6301_v52  ;;  %v5237_v52 = vld [vmem:[#allocation5 + $0xb0] ss:$20 sps:$4 sm:$0xff]  }
 0x20e   : > { %2635 = vmatpush1.bf16.msra.mxu1 %v5189_v28  ;;  %4533 = vmatprep.subr.bf16.mxu0 %v5221_v32  ;;  %v5250_v28 = vld [vmem:[#allocation5 + $0x8a4] ss:$20 sps:$4 sm:$0xff]   ;;  %v5283_v32 = vld [vmem:[#allocation5 + $0x768] ss:$20 sps:$4 sm:$0xff]  }
 0x20f   : > { %2636 = vmatprep.subr.bf16.mxu1 %v5194_v30  ;;  %v5280_v30 = vld [vmem:[#allocation5 + $0x600] ss:$20 sps:$4 sm:$0xff]  }
 0x211   : > { %4534 = vmatpush3.bf16.msra.mxu0 %v5222_v35  ;;  %v5253_v35 = vld [vmem:[#allocation5 + $0x3d0] ss:$20 sps:$4 sm:$0xff]  }
 0x212   : > { %2637 = vmatpush1.bf16.msra.mxu1 %v5192_v33  ;;  %4535 = vmatprep.subr.bf16.mxu0 %v5226_v38  ;;  %v5284_v38 = vld [vmem:[#allocation5 + $0x628] ss:$20 sps:$4 sm:$0xff]  }
 0x213   : > { %2638 = vmatprep.subr.bf16.mxu1 %v5197_v34  ;;  %v5248_v34 = vld [vmem:[#allocation5 + $0x8a0] ss:$20 sps:$4 sm:$0xff]  }
 0x215   : > { %4536 = vmatpush3.bf16.msra.mxu0 %v5227_v41  ;;  %v5257_v41 = vld [vmem:[#allocation5 + $0x3f8] ss:$20 sps:$4 sm:$0xff]  }
 0x216   : > { %2639 = vmatpush1.bf16.msra.mxu1 %v5195_v39  ;;  %4537 = vmatprep.subr.bf16.mxu0 %v5231_v42  ;;  %v5295_v39 = vld [vmem:[#allocation8 + $0x4] ss:$8 sps:$4 sm:$0xff]   ;;  %v5293_v42 = vld [vmem:[#allocation8] ss:$8 sps:$4 sm:$0xff]  }
 0x217   : > { %2640 = vmatprep.subr.bf16.mxu1 %v5200_v40  ;;  %v5254_v40 = vld [vmem:[#allocation5 + $0x290] ss:$20 sps:$4 sm:$0xff]  }
 0x219   : > { %4538 = vmatpush3.bf16.msra.mxu0 %v5232_v45  ;;  %v5261_v45 = vld [vmem:[#allocation5 + $0x420] ss:$20 sps:$4 sm:$0xff]  }
 0x21a   : > { %2641 = vmatpush1.bf16.msra.mxu1 %v5198_v43  ;;  %4539 = vmatprep.subr.bf16.mxu0 %v5236_v46  ;;  %v5298_v43 = vld [vmem:[#allocation8 + $0x14] ss:$8 sps:$4 sm:$0xff]   ;;  %v5296_v46 = vld [vmem:[#allocation8 + $0x10] ss:$8 sps:$4 sm:$0xff]  }
 0x21b   : > { %2642 = vmatprep.subr.bf16.mxu1 %v5203_v44  ;;  %v5258_v44 = vld [vmem:[#allocation5 + $0x2b8] ss:$20 sps:$4 sm:$0xff]  }
 0x21d   : > { %4540 = vmatpush3.bf16.msra.mxu0 %v5237_v52  ;;  %v5265_v52 = vld [vmem:[#allocation5 + $0x448] ss:$20 sps:$4 sm:$0xff]  }
 0x21e   : > { %2643 = vmatpush1.bf16.msra.mxu1 %v5201_v47  ;;  %4541 = vmatprep.subr.bf16.mxu0 %v5241_v49  ;;  %v5301_v47 = vld [vmem:[#allocation8 + $0x24] ss:$8 sps:$4 sm:$0xff]   ;;  %v5299_v49 = vld [vmem:[#allocation8 + $0x20] ss:$8 sps:$4 sm:$0xff]  }
 0x21f   : > { %2644 = vmatprep.subr.bf16.mxu1 %v5206_v48  ;;  %v5262_v48 = vld [vmem:[#allocation5 + $0x2e0] ss:$20 sps:$4 sm:$0xff]  }
 0x221   : > { %4542 = vmatpush3.bf16.msra.mxu0 %v5242_v53  ;;  %v5269_v53 = vld [vmem:[#allocation5 + $0x470] ss:$20 sps:$4 sm:$0xff]  }
 0x222   : > { %2645 = vmatpush1.bf16.msra.mxu1 %v5204_v50  ;;  %4543 = vmatprep.subr.bf16.mxu0 %v5246_v54  ;;  %v5304_v50 = vld [vmem:[#allocation8 + $0x34] ss:$8 sps:$4 sm:$0xff]   ;;  %v5307_v54 = vld [vmem:[#allocation8 + $0x44] ss:$8 sps:$4 sm:$0xff]  }
 0x223   : > { %2646 = vmatprep.subr.bf16.mxu1 %v5209_v51  ;;  %v5266_v51 = vld [vmem:[#allocation5 + $0x308] ss:$20 sps:$4 sm:$0xff]  }
 0x225   : > { %4544 = vmatpush3.bf16.msra.mxu0 %v5247_v57  ;;  %v5310_v57 = vld [vmem:[#allocation8 + $0x54] ss:$8 sps:$4 sm:$0xff]  }
 0x226   : > { %2647 = vmatpush1.bf16.msra.mxu1 %v5207_v55  ;;  %4545 = vmatprep.subr.bf16.mxu0 %v5251_v58  ;;  %v5273_v55 = vld [vmem:[#allocation5 + $0x498] ss:$20 sps:$4 sm:$0xff]  }
 0x227   : > { %2648 = vmatprep.subr.bf16.mxu1 %v5212_v56  ;;  %v5305_v56 = vld [vmem:[#allocation8 + $0x40] ss:$8 sps:$4 sm:$0xff]  }
 0x228   : > { %v5274_v58 = vld [vmem:[#allocation5 + $0x358] ss:$20 sps:$4 sm:$0xff]  }
 0x229   : > { %4546 = vmatpush3.bf16.msra.mxu0 %v5252_v61  ;;  %v5313_v61 = vld [vmem:[#allocation8 + $0x64] ss:$8 sps:$4 sm:$0xff]  }
 0x22a   : > { %2649 = vmatpush1.bf16.msra.mxu1 %v5210_v59  ;;  %4575 = vmatprep.subr.bf16.mxu0 %v5255_v62  ;;  %v5277_v59 = vld [vmem:[#allocation5 + $0x4c0] ss:$20 sps:$4 sm:$0xff]  }
 0x22b   : > { %2659 = vmatprep.subr.bf16.mxu1 %v5215_v60  ;;  %v5308_v60 = vld [vmem:[#allocation8 + $0x50] ss:$8 sps:$4 sm:$0xff]  }
 0x22c   : > { %2733 = vmatmul.mubr.bf16.vlgmr.msra.gmra.mrb[4].mxu0 %v6306_v10  ;;  %v5235_v10 = vld [vmem:[#allocation5 + $0x82c] ss:$20 sps:$4 sm:$0xff]  }
 0x22d   : > { %2651 = vmatmul.mubr.bf16.vlgmr.msra.gmra.mrb[4].mxu1 %v6326_v29  ;;  %4576 = vmatpush3.bf16.msra.mxu0 %v5256_v2  ;;  %v5278_v62 = vld [vmem:[#allocation5 + $0x380] ss:$20 sps:$4 sm:$0xff]  }
 0x22e   : > { %2660 = vmatpush1.bf16.msra.mxu1 %v5213_v63  ;;  %2691 = vmatprep.mubr.bf16.mxu1 %v5878_v0  ;;  %v5281_v63 = vld [vmem:[#allocation5 + $0x4e8] ss:$20 sps:$4 sm:$0xff]  }
 0x22f   : > { %2661 = vmatprep.subr.bf16.mxu1 %v5220_v1  ;;  %4577 = vmatprep.subr.bf16.mxu0 %v5259_v3  ;;  %v5311_v1 = vld [vmem:[#allocation8 + $0x60] ss:$8 sps:$4 sm:$0xff]   ;;  %v5316_v2 = vld [vmem:[#allocation8 + $0x74] ss:$8 sps:$4 sm:$0xff]  }
 0x230   : > { %2812 = vmatprep.mubr.bf16.mxu0 %v6319_v23  ;;  %v5275_v23 = vld [vmem:[#allocation5 + $0x718] ss:$20 sps:$4 sm:$0xff]   ;;  %v5282_v3 = vld [vmem:[#allocation5 + $0x3a8] ss:$20 sps:$4 sm:$0xff]  }
 0x231   : > { %4578 = vmatpush3.bf16.msra.mxu0 %v5260_v6  ;;  %v5285_v6 = vld [vmem:[#allocation5 + $0x790] ss:$20 sps:$4 sm:$0xff]  }
 0x232   : > { %2662 = vmatpush1.bf16.msra.mxu1 %v5218_v4  ;;  %4579 = vmatprep.subr.bf16.mxu0 %v5263_v7  ;;  %v5314_v4 = vld [vmem:[#allocation8 + $0x70] ss:$8 sps:$4 sm:$0xff]   ;;  %v5879_v7 = vmov 0.0  }
 0x233   : > { %2663 = vmatprep.subr.bf16.mxu1 %v5225_v5  ;;  %v5319_v5 = vld [vmem:[#allocation8 + $0x84] ss:$8 sps:$4 sm:$0xff]  }
 0x235   : > { %4580 = vmatpush3.bf16.msra.mxu0 %v5264_v11  ;;  %v5286_v11 = vld [vmem:[#allocation5 + $0x7b8] ss:$20 sps:$4 sm:$0xff]  }
 0x236   : > { %2664 = vmatpush1.bf16.msra.mxu1 %v5223_v8  ;;  %4581 = vmatprep.subr.bf16.mxu0 %v5267_v12  ;;  %v5317_v8 = vld [vmem:[#allocation8 + $0x80] ss:$8 sps:$4 sm:$0xff]   ;;  %v5320_v12 = vld [vmem:[#allocation8 + $0x90] ss:$8 sps:$4 sm:$0xff]  }
 0x237   : > { %2665 = vmatprep.subr.bf16.mxu1 %v5230_v9  ;;  %v5322_v9 = vld [vmem:[#allocation8 + $0x94] ss:$8 sps:$4 sm:$0xff]  }
 0x239   : > { %4582 = vmatpush3.bf16.msra.mxu0 %v5268_v14  ;;  %v5328_v14 = vld [vmem:[#allocation8 + $0xb4] ss:$8 sps:$4 sm:$0xff]  }
 0x23a   : > { %2666 = vmatpush1.bf16.msra.mxu1 %v5228_v13  ;;  %4583 = vmatprep.subr.bf16.mxu0 %v5271_v15  ;;  %v5325_v13 = vld [vmem:[#allocation8 + $0xa4] ss:$8 sps:$4 sm:$0xff]  }
 0x23b   : > { %2667 = vmatprep.subr.bf16.mxu1 %v5235_v10  ;;  %v5287_v10 = vld [vmem:[#allocation5 + $0x7e0] ss:$20 sps:$4 sm:$0xff]   ;;  %v5288_v15 = vld [vmem:[#allocation5 + $0x808] ss:$20 sps:$4 sm:$0xff]  }
 0x23d   : > { %4584 = vmatpush3.bf16.msra.mxu0 %v5272_v19  ;;  %v5289_v19 = vld [vmem:[#allocation5 + $0x830] ss:$20 sps:$4 sm:$0xff]  }
 0x23e   : > { %2668 = vmatpush1.bf16.msra.mxu1 %v5233_v16  ;;  %4585 = vmatprep.subr.bf16.mxu0 %v5275_v23  ;;  %v5326_v16 = vld [vmem:[#allocation8 + $0xb0] ss:$8 sps:$4 sm:$0xff]   ;;  %v5329_v23 = vld [vmem:[#allocation8 + $0xc0] ss:$8 sps:$4 sm:$0xff]  }
 0x23f   : > { %2669 = vmatprep.subr.bf16.mxu1 %v5240_v17  ;;  %v5331_v17 = vld [vmem:[#allocation8 + $0xc4] ss:$8 sps:$4 sm:$0xff]  }
 0x240   : > { %v6334_v25 = vpop.f32.mrb[0].mxu1 }
 0x241   : > { %v6336_v27 = vpop.f32.mrb[1].mxu1  ;;  %4586 = vmatpush3.bf16.msra.mxu0 %v5276_v22  ;;  %v5332_v22 = vld [vmem:[#allocation8 + $0xd0] ss:$8 sps:$4 sm:$0xff]  }
 0x242   : > { %v2533_v31 = vpop.f32.mrb[2].mxu1  ;;  %2670 = vmatpush1.bf16.msra.mxu1 %v5238_v20  ;;  %4587 = vmatprep.subr.bf16.mxu0 %v5279_v24  ;;  %v5334_v20 = vld [vmem:[#allocation8 + $0xd4] ss:$8 sps:$4 sm:$0xff]   ;;  %v5337_v24 = vld [vmem:[#allocation8 + $0xe4] ss:$8 sps:$4 sm:$0xff]  }
 0x243   : > { %v2534_v33 = vpop.f32.mrb[3].mxu1  ;;  %2671 = vmatprep.subr.bf16.mxu1 %v5245_v21  ;;  %v5290_v21 = vld [vmem:[#allocation5 + $0x858] ss:$20 sps:$4 sm:$0xff]   ;;  %v5292_v31 = vld [vmem:[#allocation5 + $0x8a8] ss:$20 sps:$4 sm:$0xff]  }
 0x244   : > { %v5343_v33 = vld [vmem:[#allocation8 + $0x104] ss:$8 sps:$4 sm:$0xff]  }
 0x245   : > { %4588 = vmatpush3.bf16.msra.mxu0 %v5280_v30  ;;  %v5340_v30 = vld [vmem:[#allocation8 + $0xf4] ss:$8 sps:$4 sm:$0xff]  }
 0x246   : > { %2672 = vmatpush1.bf16.msra.mxu1 %v5243_v26  ;;  %4589 = vmatprep.subr.bf16.mxu0 %v5283_v32  ;;  %v5291_v26 = vld [vmem:[#allocation5 + $0x880] ss:$20 sps:$4 sm:$0xff]  }
 0x247   : > { %2673 = vmatprep.subr.bf16.mxu1 %v5250_v28  ;;  %v5335_v28 = vld [vmem:[#allocation8 + $0xe0] ss:$8 sps:$4 sm:$0xff]   ;;  %v5338_v32 = vld [vmem:[#allocation8 + $0xf0] ss:$8 sps:$4 sm:$0xff]  }
 0x249   : > { %4590 = vmatpush3.bf16.msra.mxu0 %v5284_v38 }
 0x24a   : > { %2674 = vmatpush1.bf16.msra.mxu1 %v5248_v34  ;;  %3382 = vmatprep.subr.bf16.mxu0 %v5295_v39  ;;  %v891_v34 = vlaneseq  ;;  %v6356_v39 = vld [vmem:[#allocation7] sm:$0x1f] }
 0x24b   : > { %4553 = vmatprep.subr.bf16.mxu1 %v5253_v35 }
 0x24c   : > { %2813 = vmatmul.mubr.bf16.vlgmr.msra.gmra.mrb[8].mxu0 %v6326_v29  ;;  %v5270_v29 = vld [vmem:[#allocation5 + $0x330] ss:$20 sps:$4 sm:$0xff]   ;;  %v6353_v35 = vshrl.u32 %v891_v34, 7 }
 0x24d   : > { %2692 = vmatmul.mubr.bf16.vlgmr.msra.gmra.mrb[4].mxu1 %v6297_v36  ;;  %3383 = vmatpush1.bf16.msra.mxu0 %v5293_v42  ;;  %v5376_v34 = vld [vmem:[#allocation8 + $0x1b4] ss:$8 sps:$4 sm:$0xff]  }
 0x24e   : > { %4554 = vmatpush3.bf16.msra.mxu1 %v5254_v40  ;;  %2772 = vmatprep.mubr.bf16.mxu1 %v6310_v37  ;;  %v5302_v37 = vld [vmem:[#allocation8 + $0x30] ss:$8 sps:$4 sm:$0xff]   ;;  %v893_v38 = vsub.s32 0, %v6353_v35  ;;  %v897_v40 = vsub.s32 1, %v6353_v35 }
 0x24f   : > { %4555 = vmatprep.subr.bf16.mxu1 %v5257_v41  ;;  %3384 = vmatprep.subr.bf16.mxu0 %v5298_v43 }
 0x250   : > { %v894_v41 = vrot.slane %v6356_v39, %v893_v38  ;;  %v898_v42 = vrot.slane %v6356_v39, %v897_v40 }
 0x251   : > { %3385 = vmatpush1.bf16.msra.mxu0 %v5296_v46 }
 0x252   : > { %4556 = vmatpush3.bf16.msra.mxu1 %v5258_v44  ;;  %3386 = vmatprep.subr.bf16.mxu0 %v5301_v47 }
 0x253   : > { %4557 = vmatprep.subr.bf16.mxu1 %v5261_v45 }
 0x255   : > { %3387 = vmatpush1.bf16.msra.mxu0 %v5299_v49 }
 0x256   : > { %4558 = vmatpush3.bf16.msra.mxu1 %v5262_v48  ;;  %3388 = vmatprep.subr.bf16.mxu0 %v5304_v50 }
 0x257   : > { %4559 = vmatprep.subr.bf16.mxu1 %v5265_v52 }
 0x259   : > { %3389 = vmatpush1.bf16.msra.mxu0 %v5302_v37 }
 0x25a   : > { %4560 = vmatpush3.bf16.msra.mxu1 %v5266_v51  ;;  %3390 = vmatprep.subr.bf16.mxu0 %v5307_v54 }
 0x25b   : > { %4561 = vmatprep.subr.bf16.mxu1 %v5269_v53 }
 0x25d   : > { %3391 = vmatpush1.bf16.msra.mxu0 %v5305_v56 }
 0x25e   : > { %4562 = vmatpush3.bf16.msra.mxu1 %v5270_v29  ;;  %3392 = vmatprep.subr.bf16.mxu0 %v5310_v57 }
 0x25f   : > { %4563 = vmatprep.subr.bf16.mxu1 %v5273_v55 }
 0x261   : > { %3393 = vmatpush1.bf16.msra.mxu0 %v5308_v60  ;;  %v5415_v60 = vld [vmem:[#allocation11 + $0x48] sm:$0xff]  }
 0x262   : > { %4564 = vmatpush3.bf16.msra.mxu1 %v5274_v58  ;;  %3394 = vmatprep.subr.bf16.mxu0 %v5313_v61  ;;  %v5413_v58 = vld [vmem:[#allocation11 + $0x40] sm:$0xff]  }
 0x263   : > { %4565 = vmatprep.subr.bf16.mxu1 %v5277_v59  ;;  %v5414_v59 = vld [vmem:[#allocation11] sm:$0xff]  }
 0x265   : > { %3395 = vmatpush1.bf16.msra.mxu0 %v5311_v1  ;;  %v5344_v1 = vld [vmem:[#allocation8 + $0x110] ss:$8 sps:$4 sm:$0xff]  }
 0x266   : > { %4566 = vmatpush3.bf16.msra.mxu1 %v5278_v62  ;;  %3396 = vmatprep.subr.bf16.mxu0 %v5316_v2  ;;  %v5349_v2 = vld [vmem:[#allocation8 + $0x124] ss:$8 sps:$4 sm:$0xff]  }
 0x267   : > { %4567 = vmatprep.subr.bf16.mxu1 %v5281_v63  ;;  %v5346_v63 = vld [vmem:[#allocation8 + $0x114] ss:$8 sps:$4 sm:$0xff]  }
 0x269   : > { %3397 = vmatpush1.bf16.msra.mxu0 %v5314_v4  ;;  %v5352_v4 = vld [vmem:[#allocation8 + $0x134] ss:$8 sps:$4 sm:$0xff]  }
 0x26a   : > { %4568 = vmatpush3.bf16.msra.mxu1 %v5282_v3  ;;  %3398 = vmatprep.subr.bf16.mxu0 %v5319_v5  ;;  %v5347_v3 = vld [vmem:[#allocation8 + $0x120] ss:$8 sps:$4 sm:$0xff]  }
 0x26b   : > { %4646 = vmatprep.subr.bf16.mxu1 %v5879_v7 }
 0x26d   : > { %2773 = vmatmul.mubr.bf16.vlgmr.msra.gmra.mrb[8].mxu1 %v6316_v18  ;;  %3399 = vmatpush1.bf16.msra.mxu0 %v5317_v8  ;;  %v5323_v18 = vld [vmem:[#allocation8 + $0xa0] ss:$8 sps:$4 sm:$0xff]  }
 0x26e   : > { %4647 = vmatpush3.bf16.msra.mxu1 %v5285_v6  ;;  %4662 = vmatprep.mubr.msk.bf16.mxu1 %vm5880_vm0, %v5879_v7 }
 0x26f   : > { %4648 = vmatprep.subr.bf16.mxu1 %v5879_v7  ;;  %3400 = vmatprep.subr.bf16.mxu0 %v5322_v9 }
 0x271   : > { %3401 = vmatpush1.bf16.msra.mxu0 %v5320_v12 }
 0x272   : > { %4649 = vmatpush3.bf16.msra.mxu1 %v5286_v11  ;;  %3402 = vmatprep.subr.bf16.mxu0 %v5325_v13  ;;  %v5350_v11 = vld [vmem:[#allocation8 + $0x130] ss:$8 sps:$4 sm:$0xff]   ;;  %v5355_v13 = vld [vmem:[#allocation8 + $0x144] ss:$8 sps:$4 sm:$0xff]  }
 0x273   : > { %4650 = vmatprep.subr.bf16.mxu1 %v5879_v7 }
 0x275   : > { %3403 = vmatpush1.bf16.msra.mxu0 %v5323_v18  ;;  %v5358_v18 = vld [vmem:[#allocation8 + $0x154] ss:$8 sps:$4 sm:$0xff]  }
 0x276   : > { %4651 = vmatpush3.bf16.msra.mxu1 %v5287_v10  ;;  %3404 = vmatprep.subr.bf16.mxu0 %v5328_v14  ;;  %v5353_v10 = vld [vmem:[#allocation8 + $0x140] ss:$8 sps:$4 sm:$0xff]   ;;  %v5356_v14 = vld [vmem:[#allocation8 + $0x150] ss:$8 sps:$4 sm:$0xff]  }
 0x277   : > { %4652 = vmatprep.subr.bf16.mxu1 %v5879_v7 }
 0x279   : > { %3405 = vmatpush1.bf16.msra.mxu0 %v5326_v16  ;;  %v5359_v16 = vld [vmem:[#allocation8 + $0x160] ss:$8 sps:$4 sm:$0xff]  }
 0x27a   : > { %4653 = vmatpush3.bf16.msra.mxu1 %v5288_v15  ;;  %3406 = vmatprep.subr.bf16.mxu0 %v5331_v17  ;;  %v5361_v15 = vld [vmem:[#allocation8 + $0x164] ss:$8 sps:$4 sm:$0xff]   ;;  %v5364_v17 = vld [vmem:[#allocation8 + $0x174] ss:$8 sps:$4 sm:$0xff]  }
 0x27b   : > { %4654 = vmatprep.subr.bf16.mxu1 %v5879_v7 }
 0x27d   : > { %3407 = vmatpush1.bf16.msra.mxu0 %v5329_v23  ;;  %v5367_v23 = vld [vmem:[#allocation8 + $0x184] ss:$8 sps:$4 sm:$0xff]  }
 0x27e   : > { %4655 = vmatpush3.bf16.msra.mxu1 %v5289_v19  ;;  %3408 = vmatprep.subr.bf16.mxu0 %v5334_v20  ;;  %v5362_v19 = vld [vmem:[#allocation8 + $0x170] ss:$8 sps:$4 sm:$0xff]   ;;  %v5365_v20 = vld [vmem:[#allocation8 + $0x180] ss:$8 sps:$4 sm:$0xff]  }
 0x27f   : > { %4656 = vmatprep.subr.bf16.mxu1 %v5879_v7 }
 0x281   : > { %3409 = vmatpush1.bf16.msra.mxu0 %v5332_v22  ;;  %v901_v22 = vsub.s32 2, %v6353_v35 }
 0x282   : > { %4657 = vmatpush3.bf16.msra.mxu1 %v5290_v21  ;;  %3410 = vmatprep.subr.bf16.mxu0 %v5337_v24  ;;  %v5370_v21 = vld [vmem:[#allocation8 + $0x194] ss:$8 sps:$4 sm:$0xff]   ;;  %v905_v24 = vsub.s32 3, %v6353_v35 }
 0x283   : > { %4658 = vmatprep.subr.bf16.mxu1 %v5879_v7 }
 0x285   : > { %3411 = vmatpush1.bf16.msra.mxu0 %v5335_v28  ;;  %v5373_v28 = vld [vmem:[#allocation8 + $0x1a4] ss:$8 sps:$4 sm:$0xff]  }
 0x286   : > { %4659 = vmatpush3.bf16.msra.mxu1 %v5291_v26  ;;  %3412 = vmatprep.subr.bf16.mxu0 %v5340_v30  ;;  %v5368_v26 = vld [vmem:[#allocation8 + $0x190] ss:$8 sps:$4 sm:$0xff]   ;;  %v902_v30 = vrot.slane %v6356_v39, %v901_v22 }
 0x287   : > { %4660 = vmatprep.subr.bf16.mxu1 %v5879_v7 }
 0x289   : > { %3413 = vmatpush1.bf16.msra.mxu0 %v5338_v32  ;;  %v5371_v32 = vld [vmem:[#allocation8 + $0x1a0] ss:$8 sps:$4 sm:$0xff]  }
 0x28a   : > { %4661 = vmatpush3.bf16.msra.mxu1 %v5292_v31  ;;  %3423 = vmatprep.subr.bf16.mxu0 %v5343_v33  ;;  %v906_v31 = vrot.slane %v6356_v39, %v905_v24  ;;  %v5401_v24 = vld [vmem:[#allocation8 + $0x240] ss:$8 sps:$4 sm:$0xff]  }
 0x28b   : > { %4606 = vmatprep.subr.bf16.mxu1 %v5413_v58 }
 0x28d   : > { %4663 = vmatmul.mubr.bf16.vlgmr.msra.gmra.mrb[12].mxu1 %v6297_v36 }
 0x28e   : > { %4607 = vmatpush3.bf16.msra.mxu1 %v5414_v59 }
 0x28f   : > { %4608 = vmatprep.subr.bf16.mxu1 %v5415_v60  ;;  %v5388_v60 = vld [vmem:[#allocation8 + $0x1f4] ss:$8 sps:$4 sm:$0xff]  }
 0x2df   : > { %v2488_v43 = vpop.f32.mrb[0].mxu0 }
 0x2e0   : > { %v4706_v36 = vadd.f32 %v2488_v43, %v894_v41  ;;  %v2490_v44 = vpop.f32.mrb[1].mxu0 }
 0x2e1   : > { %v4708_v45 = vadd.f32 %v2490_v44, %v898_v42  ;;  %v2492_v46 = vpop.f32.mrb[2].mxu0 }
 0x2e2   : > { %v4707_v47 = vadd.f32 %v4706_v36, %v6334_v25  ;;  %v2493_v48 = vpop.f32.mrb[3].mxu0  ;;  %v5341_v25 = vld [vmem:[#allocation8 + $0x100] ss:$8 sps:$4 sm:$0xff]  }
 0x2e3   : > { %v4709_v52 = vadd.f32 %v4708_v45, %v6336_v27  ;;  %v5416_v27 = vld [vmem:[#allocation11 + $0x8] sm:$0xff]  }
 0x2e4   : > { %v2865_v49 = vmul.f32 0.70710677, %v4707_v47  ;;  %v2860_v37 = vmul.f32 0.5, %v4707_v47  ;;  %4609 = vmatpush3.bf16.msra.mxu1 %v5416_v27  ;;  %v5374_v47 = vld [vmem:[#allocation8 + $0x1b0] ss:$8 sps:$4 sm:$0xff]  }
 0x2e5   : > { %v2866_v50 = vmul.f32 0.70710677, %v4709_v52  ;;  %v2861_v29 = vmul.f32 0.5, %v4709_v52 }
 0x2e6   : > { %5445 = verf.f32 %v2865_v49  ;;  %v5379_v49 = vld [vmem:[#allocation8 + $0x1c4] ss:$8 sps:$4 sm:$0xff]  }
 0x2e7   : > { %5447 = verf.f32 %v2866_v50 }
 0x2f0   : > { %v5446_v51 = vpop.eup %5445 }
 0x2f1   : > { %v5448_v53 = vpop.eup %5447  ;;  %v2875_v54 = vadd.f32 1.0, %v5446_v51 }
 0x2f2   : > { %v2876_v55 = vadd.f32 1.0, %v5448_v53 }
 0x2f3   : > { %v2880_v56 = vmul.f32 %v2875_v54, %v2860_v37  ;;  %v5377_v37 = vld [vmem:[#allocation8 + $0x1c0] ss:$8 sps:$4 sm:$0xff]   ;;  %v5382_v54 = vld [vmem:[#allocation8 + $0x1d4] ss:$8 sps:$4 sm:$0xff]  }
 0x2f4   : > { %v2881_v57 = vmul.f32 %v2876_v55, %v2861_v29  ;;  %v5380_v29 = vld [vmem:[#allocation8 + $0x1d0] ss:$8 sps:$4 sm:$0xff]   ;;  %v5385_v55 = vld [vmem:[#allocation8 + $0x1e4] ss:$8 sps:$4 sm:$0xff]  }
 0x2f5   : > { %v2885_v62 = vpack.c.bf16 %v2880_v56, %v2880_v56 }
 0x2f6   : > { %v2886_v61 = vpack.c.bf16 %v2881_v57, %v2881_v57  ;;  %v5383_v57 = vld [vmem:[#allocation8 + $0x1e0] ss:$8 sps:$4 sm:$0xff]  }
 0x2f8   : > { %3414 = vmatprep.mubr.bf16.mxu0 %v2886_v61 }
 0x2f9   : > { %3415 = vmatmul.mubr.bf16.vlgmr.msra.gmra.mrb[12].mxu0 %v2885_v62 }
 0x2fa   : > { %3424 = vmatpush1.bf16.msra.mxu0 %v5341_v25 }
 0x2fb   : > { %3425 = vmatprep.subr.bf16.mxu0 %v5346_v63  ;;  %v5386_v63 = vld [vmem:[#allocation8 + $0x1f0] ss:$8 sps:$4 sm:$0xff]  }
 0x2fe   : > { %3426 = vmatpush1.bf16.msra.mxu0 %v5344_v1 }
 0x2ff   : > { %3427 = vmatprep.subr.bf16.mxu0 %v5349_v2  ;;  %v4547_v5 = vpop.f32.mrb[4].mxu0  ;;  %v5391_v2 = vld [vmem:[#allocation8 + $0x204] ss:$8 sps:$4 sm:$0xff]  }
 0x300   : > { %v4548_v6 = vpop.f32.mrb[5].mxu0 }
 0x301   : > { %v6367_v8 = vadd.f32 %v4548_v6, %v4547_v5  ;;  %v4550_v9 = vpop.f32.mrb[6].mxu0  ;;  %v5394_v6 = vld [vmem:[#allocation8 + $0x214] ss:$8 sps:$4 sm:$0xff]  }
 0x302   : > { %3428 = vmatpush1.bf16.msra.mxu0 %v5347_v3  ;;  %v4551_v12 = vpop.f32.mrb[7].mxu0  ;;  %v909_v9 = vsub.s32 4, %v6353_v35 }
 0x303   : > { %3429 = vmatprep.subr.bf16.mxu0 %v5352_v4  ;;  %v5389_v4 = vld [vmem:[#allocation8 + $0x200] ss:$8 sps:$4 sm:$0xff]   ;;  %v5397_v12 = vld [vmem:[#allocation8 + $0x224] ss:$8 sps:$4 sm:$0xff]  }
 0x306   : > { %3430 = vmatpush1.bf16.msra.mxu0 %v5350_v11  ;;  %v5392_v11 = vld [vmem:[#allocation8 + $0x210] ss:$8 sps:$4 sm:$0xff]  }
 0x307   : > { %3431 = vmatprep.subr.bf16.mxu0 %v5355_v13  ;;  %v910_v13 = vrot.slane %v6356_v39, %v909_v9  ;;  %v5406_v39 = vld [vmem:[#allocation8 + $0x254] ss:$8 sps:$4 sm:$0xff]  }
 0x30a   : > { %3432 = vmatpush1.bf16.msra.mxu0 %v5353_v10  ;;  %v5395_v10 = vld [vmem:[#allocation8 + $0x220] ss:$8 sps:$4 sm:$0xff]  }
 0x30b   : > { %3433 = vmatprep.subr.bf16.mxu0 %v5358_v18 }
 0x30e   : > { %3434 = vmatpush1.bf16.msra.mxu0 %v5356_v14  ;;  %v5400_v14 = vld [vmem:[#allocation8 + $0x234] ss:$8 sps:$4 sm:$0xff]  }
 0x30f   : > { %3435 = vmatprep.subr.bf16.mxu0 %v5361_v15 }
 0x312   : > { %3436 = vmatpush1.bf16.msra.mxu0 %v5359_v16  ;;  %v2735_v16 = vadd.f32 %v6367_v8, %v910_v13  ;;  %v5412_v8 = vld [vmem:[#allocation8 + $0x274] ss:$8 sps:$4 sm:$0xff]  }
 0x313   : > { %3437 = vmatprep.subr.bf16.mxu0 %v5364_v17 }
 0x316   : > { %3438 = vmatpush1.bf16.msra.mxu0 %v5362_v19 }
 0x317   : > { %3439 = vmatprep.subr.bf16.mxu0 %v5367_v23 }
 0x31a   : > { %3440 = vmatpush1.bf16.msra.mxu0 %v5365_v20  ;;  %v5398_v20 = vld [vmem:[#allocation8 + $0x230] ss:$8 sps:$4 sm:$0xff]  }
 0x31b   : > { %3441 = vmatprep.subr.bf16.mxu0 %v5370_v21 }
 0x31e   : > { %3442 = vmatpush1.bf16.msra.mxu0 %v5368_v26  ;;  %v5404_v26 = vld [vmem:[#allocation8 + $0x250] ss:$8 sps:$4 sm:$0xff]  }
 0x31f   : > { %3443 = vmatprep.subr.bf16.mxu0 %v5373_v28  ;;  %v4591_v44 = vpop.f32.mrb[8].mxu0  ;;  %v5409_v28 = vld [vmem:[#allocation8 + $0x264] ss:$8 sps:$4 sm:$0xff]  }
 0x320   : > { %v2693_v33 = vpop.f32.mrb[4].mxu1  ;;  %v4592_v48 = vpop.f32.mrb[9].mxu0 }
 0x321   : > { %v4710_v41 = vadd.f32 %v2693_v33, %v902_v30  ;;  %v2695_v42 = vpop.f32.mrb[5].mxu1  ;;  %v4593_v50 = vadd.f32 %v4592_v48, %v4591_v44  ;;  %v4594_v51 = vpop.f32.mrb[10].mxu0  ;;  %v5407_v30 = vld [vmem:[#allocation8 + $0x260] ss:$8 sps:$4 sm:$0xff]   ;;  %v5417_v48 = vld [vmem:[#allocation11 + $0x50] sm:$0xff]  }
 0x322   : > { %v4711_v43 = vadd.f32 %v2695_v42, %v906_v31  ;;  %v2697_v36 = vpop.f32.mrb[6].mxu1  ;;  %3444 = vmatpush1.bf16.msra.mxu0 %v5371_v32  ;;  %v4595_v53 = vpop.f32.mrb[11].mxu0  ;;  %v5410_v31 = vld [vmem:[#allocation8 + $0x270] ss:$8 sps:$4 sm:$0xff]   ;;  %4610 = vmatprep.subr.bf16.mxu1 %v5417_v48  ;;  %v5421_v51 = vld [vmem:[#allocation11 + $0x60] sm:$0xff]  }
 0x323   : > { %v2867_v45 = vmul.f32 0.70710677, %v4710_v41  ;;  %v2698_v46 = vpop.f32.mrb[7].mxu1  ;;  %3445 = vmatprep.subr.bf16.mxu0 %v5376_v34  ;;  %v2862_v62 = vmul.f32 0.5, %v4710_v41  ;;  %v5422_v53 = vld [vmem:[#allocation11 + $0x20] sm:$0xff]  }
 0x324   : > { %v2868_v52 = vmul.f32 0.70710677, %v4711_v43  ;;  %v2863_v61 = vmul.f32 0.5, %v4711_v43 }
 0x325   : > { %5449 = verf.f32 %v2867_v45 }
 0x326   : > { %5451 = verf.f32 %v2868_v52  ;;  %3446 = vmatpush1.bf16.msra.mxu0 %v5374_v47  ;;  %v5418_v52 = vld [vmem:[#allocation11 + $0x10] sm:$0xff]  }
 0x327   : > { %3447 = vmatprep.subr.bf16.mxu0 %v5379_v49  ;;  %4611 = vmatpush3.bf16.msra.mxu1 %v5418_v52  ;;  %v5419_v49 = vld [vmem:[#allocation11 + $0x58] sm:$0xff]  }
 0x328   : > { %4612 = vmatprep.subr.bf16.mxu1 %v5419_v49 }
 0x32a   : > { %3448 = vmatpush1.bf16.msra.mxu0 %v5377_v37  ;;  %v5423_v37 = vld [vmem:[#allocation11 + $0x68] sm:$0xff]  }
 0x32b   : > { %3449 = vmatprep.subr.bf16.mxu0 %v5382_v54  ;;  %v5424_v54 = vld [vmem:[#allocation11 + $0x28] sm:$0xff]  }
 0x32e   : > { %3450 = vmatpush1.bf16.msra.mxu0 %v5380_v29  ;;  %v5425_v29 = vld [vmem:[#allocation11 + $0x70] sm:$0xff]  }
 0x32f   : > { %v5450_v56 = vpop.eup %5449  ;;  %3451 = vmatprep.subr.bf16.mxu0 %v5385_v55  ;;  %v5426_v55 = vld [vmem:[#allocation11 + $0x30] sm:$0xff]  }
 0x330   : > { %v5452_v58 = vpop.eup %5451  ;;  %v2877_v59 = vadd.f32 1.0, %v5450_v56  ;;  %v5427_v56 = vld [vmem:[#allocation11 + $0x78] sm:$0xff]  }
 0x331   : > { %v2878_v25 = vadd.f32 1.0, %v5452_v58  ;;  %v2970_v58 = vld [vmem:[#allocation10] sm:$0x3] }
 0x332   : > { %3452 = vmatpush1.bf16.msra.mxu0 %v5383_v57  ;;  %v2882_v1 = vmul.f32 %v2877_v59, %v2862_v62  ;;  %v5428_v57 = vld [vmem:[#allocation11 + $0x38] sm:$0xff]   ;;  %v2975_v59 = vrot.slane %v2970_v58, %v893_v38 }
 0x333   : > { %v2883_v27 = vmul.f32 %v2878_v25, %v2863_v61  ;;  %3453 = vmatprep.subr.bf16.mxu0 %v5388_v60  ;;  %v2979_v60 = vrot.slane %v2970_v58, %v897_v40  ;;  %v5429_v40 = vld [vmem:[#allocation14] sm:$0xff]  }
 0x334   : > { %v2887_v5 = vpack.c.bf16 %v2882_v1, %v2882_v1 }
 0x335   : > { %v2888_v3 = vpack.c.bf16 %v2883_v27, %v2883_v27 }
 0x336   : > { %3454 = vmatpush1.bf16.msra.mxu0 %v5386_v63 }
 0x337   : > { %3455 = vmatprep.mubr.bf16.mxu0 %v2888_v3  ;;  %3464 = vmatprep.subr.bf16.mxu0 %v5391_v2 }
 0x339   : > { %3456 = vmatmul.mubr.bf16.vlgmr.msra.gmra.mrb[12].mxu0 %v2887_v5 }
 0x33a   : > { %3465 = vmatpush1.bf16.msra.mxu0 %v5389_v4  ;;  %3496 = vmatprep.mubr.bf16.mxu0 %v5878_v0  ;;  %v5403_v0 = vld [vmem:[#allocation8 + $0x244] ss:$8 sps:$4 sm:$0xff]  }
 0x33b   : > { %3466 = vmatprep.subr.bf16.mxu0 %v5394_v6 }
 0x33e   : > { %3467 = vmatpush1.bf16.msra.mxu0 %v5392_v11 }
 0x33f   : > { %3468 = vmatprep.subr.bf16.mxu0 %v5397_v12 }
 0x340   : > { %v4569_v18 = vpop.f32.mrb[8].mxu1 }
 0x341   : > { %v4570_v15 = vpop.f32.mrb[9].mxu1 }
 0x342   : > { %v4571_v17 = vadd.f32 %v4570_v15, %v4569_v18  ;;  %v4572_v19 = vpop.f32.mrb[10].mxu1  ;;  %3469 = vmatpush1.bf16.msra.mxu0 %v5395_v10  ;;  %v5430_v18 = vld [vmem:[#allocation14 + $0x8] sm:$0xff]   ;;  %v5432_v15 = vld [vmem:[#allocation14 + $0x18] sm:$0xff]  }
 0x343   : > { %v4573_v23 = vpop.f32.mrb[11].mxu1  ;;  %3470 = vmatprep.subr.bf16.mxu0 %v5400_v14  ;;  %v5431_v14 = vld [vmem:[#allocation14 + $0x10] sm:$0xff]  }
 0x344   : > { %v2775_v21 = vadd.f32 %v4571_v17, %v2735_v16  ;;  %v5433_v16 = vld [vmem:[#allocation14 + $0x20] sm:$0xff]   ;;  %v5434_v17 = vld [vmem:[#allocation14 + $0x28] sm:$0xff]   ;;  %v5435_v19 = vld [vmem:[#allocation14 + $0x30] sm:$0xff]  }
 0x345   : > { %v5436_v23 = vld [vmem:[#allocation14 + $0x38] sm:$0xff]  }
 0x346   : > { %v2815_v22 = vadd.f32 %v4593_v50, %v2775_v21  ;;  %3471 = vmatpush1.bf16.msra.mxu0 %v5398_v20  ;;  %v5420_v50 = vld [vmem:[#allocation11 + $0x18] sm:$0xff]   ;;  %v4492_v21 = vld [vmem:[#allocation13] ss:$0 sm:$0xff] }
 0x347   : > { %3472 = vmatprep.subr.bf16.mxu0 %v5403_v0  ;;  %4613 = vmatpush3.bf16.msra.mxu1 %v5420_v50 }
 0x348   : > { %4614 = vmatprep.subr.bf16.mxu1 %v5421_v51 }
 0x34a   : > { %3473 = vmatpush1.bf16.msra.mxu0 %v5401_v24 }
 0x34b   : > { %3474 = vmatprep.subr.bf16.mxu0 %v5406_v39  ;;  %4615 = vmatpush3.bf16.msra.mxu1 %v5422_v53 }
 0x34c   : > { %4616 = vmatprep.subr.bf16.mxu1 %v5423_v37 }
 0x34e   : > { %3475 = vmatpush1.bf16.msra.mxu0 %v5404_v26 }
 0x34f   : > { %3476 = vmatprep.subr.bf16.mxu0 %v5409_v28  ;;  %4617 = vmatpush3.bf16.msra.mxu1 %v5424_v54 }
 0x350   : > { %4618 = vmatprep.subr.bf16.mxu1 %v5425_v29 }
 0x352   : > { %3477 = vmatpush1.bf16.msra.mxu0 %v5407_v30 }
 0x353   : > { %3478 = vmatprep.subr.bf16.mxu0 %v5412_v8  ;;  %4619 = vmatpush3.bf16.msra.mxu1 %v5426_v55 }
 0x354   : > { %4620 = vmatprep.subr.bf16.mxu1 %v5427_v56 }
 0x356   : > { %3479 = vmatpush1.bf16.msra.mxu0 %v5410_v31 }
 0x357   : > { %4621 = vmatpush3.bf16.msra.mxu1 %v5428_v57 }
 0x358   : > { %4666 = vmatprep.subr.bf16.mxu1 %v5879_v7 }
 0x360   : > { %v2854_v32 = vpop.f32.mrb[12].mxu1 }
 0x361   : > { %v2855_v33 = vadd.f32 %v2854_v32, %v2815_v22  ;;  %v4664_v34 = vpop.f32.mrb[13].mxu1 }
 0x362   : > { %v2857_v41 = vpop.f32.mrb[14].mxu1 }
 0x363   : > { %v2869_v42 = vmul.f32 0.70710677, %v2855_v33  ;;  %v4665_v43 = vpop.f32.mrb[15].mxu1  ;;  %v2864_v44 = vmul.f32 0.5, %v2855_v33  ;;  %v5437_v33 = vld [vmem:[#allocation17] sm:$0xff]   ;;  %v5438_v41 = vld [vmem:[#allocation17 + $0x8] sm:$0xff]  }
 0x364   : > { %v5440_v43 = vld [vmem:[#allocation17 + $0x18] sm:$0xff]  }
 0x365   : > { %5453 = verf.f32 %v2869_v42  ;;  %v5439_v42 = vld [vmem:[#allocation17 + $0x10] sm:$0xff]  }
 0x36f   : > { %v5454_v36 = vpop.eup %5453 }
 0x370   : > { %v2879_v45 = vadd.f32 1.0, %v5454_v36  ;;  %v5441_v36 = vld [vmem:[#allocation17 + $0x20] sm:$0xff]  }
 0x372   : > { %v2884_v46 = vmul.f32 %v2879_v45, %v2864_v44  ;;  %v5442_v44 = vld [vmem:[#allocation17 + $0x28] sm:$0xff]   ;;  %v5443_v45 = vld [vmem:[#allocation17 + $0x30] sm:$0xff]  }
 0x374   : > { %v2889_v47 = vpack.c.bf16 %v2884_v46, %v2884_v46  ;;  %v5444_v46 = vld [vmem:[#allocation17 + $0x38] sm:$0xff]  }
 0x376   : > { %3497 = vmatmul.mubr.bf16.vlgmr.msra.gmra.mrb[12].mxu0 %v2889_v47  ;;  %v4509_v47 = vld [vmem:[#allocation16] ss:$0 sm:$0xff] }
 0x449   : > { %v3498_v61 = vpop.f32.mrb[12].mxu0 }
 0x44a   : > { %v4712_v25 = vadd.f32 %v3498_v61, %v2975_v59  ;;  %v3500_v62 = vpop.f32.mrb[13].mxu0 }
 0x44b   : > { %v4713_v63 = vadd.f32 %v3500_v62, %v2979_v60  ;;  %v3502_v27 = vpop.f32.mrb[14].mxu0 }
 0x44c   : > { %v3507_v1 = vmul.f32 0.70710677, %v4712_v25  ;;  %v3503_v2 = vpop.f32.mrb[15].mxu0  ;;  %v3505_v6 = vmul.f32 0.5, %v4712_v25 }
 0x44d   : > { %v3508_v3 = vmul.f32 0.70710677, %v4713_v63  ;;  %v3506_v11 = vmul.f32 0.5, %v4713_v63 }
 0x44e   : > { %5455 = verf.f32 %v3507_v1 }
 0x44f   : > { %5457 = verf.f32 %v3508_v3 }
 0x458   : > { %v5456_v4 = vpop.eup %5455 }
 0x459   : > { %v5458_v5 = vpop.eup %5457  ;;  %v3511_v9 = vadd.f32 1.0, %v5456_v4 }
 0x45a   : > { %v3512_v12 = vadd.f32 1.0, %v5458_v5 }
 0x45b   : > { %v3513_v38 = vmul.f32 %v3511_v9, %v3505_v6 }
 0x45c   : > { %v3514_v13 = vmul.f32 %v3512_v12, %v3506_v11 }
 0x45d   : > { %v3515_v10 = vpack.c.bf16 %v3513_v38, %v3513_v38 }
 0x45e   : > { %v3516_v35 = vpack.c.bf16 %v3514_v13, %v3514_v13 }
 0x460   : > { %3684 = vmatprep.mubr.bf16.mxu1 %v3516_v35 }
 0x461   : > { %3685 = vmatmul.mubr.bf16.vlgmr.msra.gmra.mrb[16].mxu1 %v3515_v10 }
 0x462   : > { %4667 = vmatpush3.bf16.msra.mxu1 %v5429_v40  ;;  %4682 = vmatprep.mubr.msk.bf16.mxu1 %vm5880_vm0, %v5879_v7 }
 0x463   : > { %4668 = vmatprep.subr.bf16.mxu1 %v5879_v7 }
 0x466   : > { %4669 = vmatpush3.bf16.msra.mxu1 %v5430_v18 }
 0x467   : > { %4670 = vmatprep.subr.bf16.mxu1 %v5879_v7 }
 0x46a   : > { %4671 = vmatpush3.bf16.msra.mxu1 %v5431_v14 }
 0x46b   : > { %4672 = vmatprep.subr.bf16.mxu1 %v5879_v7 }
 0x46e   : > { %4673 = vmatpush3.bf16.msra.mxu1 %v5432_v15 }
 0x46f   : > { %4674 = vmatprep.subr.bf16.mxu1 %v5879_v7 }
 0x472   : > { %4675 = vmatpush3.bf16.msra.mxu1 %v5433_v16 }
 0x473   : > { %4676 = vmatprep.subr.bf16.mxu1 %v5879_v7 }
 0x476   : > { %4677 = vmatpush3.bf16.msra.mxu1 %v5434_v17 }
 0x477   : > { %4678 = vmatprep.subr.bf16.mxu1 %v5879_v7 }
 0x47a   : > { %4679 = vmatpush3.bf16.msra.mxu1 %v5435_v19 }
 0x47b   : > { %4680 = vmatprep.subr.bf16.mxu1 %v5879_v7 }
 0x47e   : > { %4681 = vmatpush3.bf16.msra.mxu1 %v5436_v23 }
 0x47f   : > { %4686 = vmatprep.subr.bf16.mxu1 %v5879_v7 }
 0x534   : > { %v4622_v20 = vpop.f32.mrb[16].mxu1 }
 0x535   : > { %v4623_v0 = vpop.f32.mrb[17].mxu1 }
 0x536   : > { %v4624_v22 = vadd.f32 %v4623_v0, %v4622_v20  ;;  %v4625_v24 = vpop.f32.mrb[18].mxu1 }
 0x537   : > { %v4626_v39 = vpop.f32.mrb[19].mxu1 }
 0x538   : > { %v3687_v26 = vadd.f32 %v4624_v22, %v4492_v21 }
 0x53a   : > { %v3693_v28 = vmul.f32 0.70710677, %v3687_v26  ;;  %v3692_v8 = vmul.f32 0.5, %v3687_v26 }
 0x53c   : > { %5459 = verf.f32 %v3693_v28 }
 0x546   : > { %v5460_v30 = vpop.eup %5459 }
 0x547   : > { %v3695_v31 = vadd.f32 1.0, %v5460_v30 }
 0x549   : > { %v3696_v32 = vmul.f32 %v3695_v31, %v3692_v8 }
 0x54b   : > { %v3697_v34 = vpack.c.bf16 %v3696_v32, %v3696_v32 }
 0x54d   : > { %4683 = vmatmul.mubr.bf16.vlgmr.msra.gmra.mrb[20].mxu1 %v3697_v34 }
 0x54e   : > { %4687 = vmatpush3.bf16.msra.mxu1 %v5437_v33  ;;  %4702 = vmatprep.mubr.msk.bf16.mxu1 %vm5880_vm0, %v5879_v7 }
 0x54f   : > { %4688 = vmatprep.subr.bf16.mxu1 %v5879_v7 }
 0x552   : > { %4689 = vmatpush3.bf16.msra.mxu1 %v5438_v41 }
 0x553   : > { %4690 = vmatprep.subr.bf16.mxu1 %v5879_v7 }
 0x556   : > { %4691 = vmatpush3.bf16.msra.mxu1 %v5439_v42 }
 0x557   : > { %4692 = vmatprep.subr.bf16.mxu1 %v5879_v7 }
 0x55a   : > { %4693 = vmatpush3.bf16.msra.mxu1 %v5440_v43 }
 0x55b   : > { %4694 = vmatprep.subr.bf16.mxu1 %v5879_v7 }
 0x55e   : > { %4695 = vmatpush3.bf16.msra.mxu1 %v5441_v36 }
 0x55f   : > { %4696 = vmatprep.subr.bf16.mxu1 %v5879_v7 }
 0x562   : > { %4697 = vmatpush3.bf16.msra.mxu1 %v5442_v44 }
 0x563   : > { %4698 = vmatprep.subr.bf16.mxu1 %v5879_v7 }
 0x566   : > { %4699 = vmatpush3.bf16.msra.mxu1 %v5443_v45 }
 0x567   : > { %4700 = vmatprep.subr.bf16.mxu1 %v5879_v7  ;;  %v4518_v7 = vld [vmem:[#allocation19] ss:$0 sm:$0xff] }
 0x56a   : > { %4701 = vmatpush3.bf16.msra.mxu1 %v5444_v46 }
 0x620   : > { %v3803_v48 = vpop.f32.mrb[20].mxu1 }
 0x621   : > { %v3804_v52 = vadd.f32 %v4509_v47, %v3803_v48  ;;  %v4684_v49 = vpop.f32.mrb[21].mxu1 }
 0x622   : > { %v3806_v50 = vpop.f32.mrb[22].mxu1 }
 0x623   : > { %v3810_v51 = vmul.f32 0.70710677, %v3804_v52  ;;  %v4685_v53 = vpop.f32.mrb[23].mxu1  ;;  %v3809_v54 = vmul.f32 0.5, %v3804_v52 }
 0x625   : > { %5461 = verf.f32 %v3810_v51 }
 0x62f   : > { %v5462_v37 = vpop.eup %5461 }
 0x630   : > { %v3812_v29 = vadd.f32 1.0, %v5462_v37 }
 0x632   : > { %v3813_v55 = vmul.f32 %v3812_v29, %v3809_v54 }
 0x634   : > { %v3814_v56 = vpack.c.bf16 %v3813_v55, %v3813_v55 }
 0x636   : > { %4703 = vmatmul.mubr.bf16.vlgmr.msra.gmra.mrb[24].mxu1 %v3814_v56 }
 0x709   : > { %v3920_v57 = vpop.f32.mrb[24].mxu1 }
 0x70a   : > { %v3921_v58 = vadd.f32 %v4518_v7, %v3920_v57  ;;  %v4704_v59 = vpop.f32.mrb[25].mxu1 }
 0x70b   : > { %v3923_v60 = vpop.f32.mrb[26].mxu1 }
 0x70c   : > { %3926 = vst [vmem:[%s537_s29] sm:$0xff] %v3921_v58  ;;  %v4705_v61 = vpop.f32.mrb[27].mxu1 }
 0x70d   : > { %5786 = shalt.err (!%p5783_p8)
}
 0x70e   : > { %s5787_s30 = scalar_lea.hbm %s6406_s3, 128  ;;  %s5791_s11 = scalar_lea.hbm %s6498_s25, 256 }
 0x70f   : > { %p5788_p6 = scmp.ne.s32.totalorder %s6406_s3, %s5787_s30  ;;  %p5792_p5 = scmp.lt.u32.totalorder %s6406_s3, %s6498_s25 }
 0x710   : > { %p5793_p10 = scmp.lt.u32.totalorder %s5791_s11, %s5787_s30  ;;  %p5795_p11 = scmp.lt.u32.totalorder %s5787_s30, %s6406_s3 }
 0x711   : > { %p5789_p2 = pnand %p5788_p6, %p6499_p12 }
 0x712   : > { %p5794_p1 = por %p5793_p10, %p5792_p5 }
 0x713   : > { %p5790_p0 = pneg %p5789_p2 }
 0x714   : > { %p5796_p13 = por %p5795_p11, %p5794_p1 }
 0x716   : > { %p5797_p3 = pnand %p5796_p13, %p5790_p0 }
 0x718   : > { %5800 = shalt.err (!%p5797_p3)
}
 0x719   : > { %4787 = dma.vmem_to_hbm [thread:$0]  (%p6499_p12), %s6408_s24, 128, %s6406_s3, %s3928_s2  }
 0x71a PF: > { %s3953_s15 = sand.u32 1, %s5847_s17   ;;  %p6500_p7 = scmp.ne.s32.totalorder %s6483_s1, 0 }
 0x71b   : > { %p6501_p9 = scmp.ge.s32.totalorder %s5859_s20, 2  ;;  %s3954_s23 = scalar_lea.sflag [#allocation4], %s3953_s15 }
 0x71d   : > { %p4825_p4 = pnand %p6501_p9, %p6500_p7 }
 0x71f   : > { %5842 = dma.done.wait (!%p4825_p4), %s3954_s23, 128  }
 0x720   : > { %5844 = vsyncadd (!%p4825_p4), %s3954_s23, 4294967168  ;;  %p29_p8 = scmp.ge.s32.totalorder %s6195_s27, 4   ;;  %s6502_s17 = smov %s5851_s18 }
 0x721   : > { %s6503_s18 = smov %s5855_s19  ;;  %s6504_s19 = smov %s6206_s13 }
 0x722   : > { %s6505_s20 = smov %s6195_s27  ;;  %31 = sbr.rel (!%p29_p8) target bundleno = 16 (0x10), region = 149 }
 0x729   :  { %3959 = vsyncpa [#allocation3], 1 }
 0x72a   :  { %3961 = vsyncpa [#allocation3 + $0x1], 1 }
 0x72b   :  { %3962 = vsyncpa [#allocation6], 1 }
 0x72c   :  { %3963 = vsyncpa [#allocation9], 1 }
 0x72d   :  { %3964 = vsyncpa [#allocation12], 1 }
 0x72e   :  { %3965 = vsyncpa [#allocation15], 1 }
 0x72f   :  { %3966 = vsyncpa [#allocation18], 1 }
 0x730   :  { %3967 = vsyncpa [#allocation4], 1 }
 0x731   :  { %3969 = vsyncpa [#allocation4 + $0x1], 1 }

// kernel: tpu_custom_call.1
= control target key start
LH: loop header
LB: loop body
LE: loop exit
PB: predicated region body
PF: predicated region fallthrough
CT: control target
= control target key end

     0   :  { %s6450_s0 = inlined_call_operand.hbm [shape: f32[16,896], index: 0, kind: input, shape index: {}]   ;;  %s6451_s1 = inlined_call_operand.hbm [shape: bf16[896,640], index: 1, kind: input, shape index: {}]   ;;  %s6452_s2 = inlined_call_operand.hbm [shape: f32[1,640], index: 2, kind: input, shape index: {}]   ;;  %s6453_s3 = inlined_call_operand.hbm [shape: bf16[640,256], index: 3, kind: input, shape index: {}]   ;;  %s6454_s4 = inlined_call_operand.hbm [shape: f32[1,256], index: 4, kind: input, shape index: {}]   ;;  %s6455_s5 = inlined_call_operand.hbm [shape: bf16[256,128], index: 5, kind: input, shape index: {}]   ;;  %s6456_s6 = inlined_call_operand.hbm [shape: f32[1,128], index: 6, kind: input, shape index: {}]   ;;  %s6457_s7 = inlined_call_operand.hbm [shape: bf16[128,128], index: 7, kind: input, shape index: {}]   ;;  %s6458_s8 = inlined_call_operand.hbm [shape: f32[1,128], index: 8, kind: input, shape index: {}]   ;;  %s6459_s9 = inlined_call_operand.hbm [shape: bf16[128,128], index: 9, kind: input, shape index: {}]   ;;  %s6460_s10 = inlined_call_operand.hbm [shape: f32[1,128], index: 10, kind: input, shape index: {}]   ;;  %s6461_s11 = inlined_call_operand.hbm [shape: f32[16,128], index: 11, kind: output, shape index: {}]  }
   0x1   :  { %6468 = sst [smem:[#allocation29_spill]] %s6450_s0 }
   0x2   :  { %6469 = sst [smem:[#allocation30_spill]] %s6451_s1 }
   0x3   :  { %6470 = sst [smem:[#allocation31_spill]] %s6452_s2 }
   0x4   :  { %6471 = sst [smem:[#allocation32_spill]] %s6453_s3 }
   0x5   :  { %6472 = sst [smem:[#allocation33_spill]] %s6461_s11 }
   0x6   :  { %16 = vsyncpa [#allocation3], 0 }
   0x7   :  { %18 = vsyncpa [#allocation3 + $0x1], 0 }
   0x8   :  { %19 = vsyncpa [#allocation6], 0 }
   0x9   :  { %20 = vsyncpa [#allocation9], 0 }
   0xa   :  { %21 = vsyncpa [#allocation12], 0 }
   0xb   :  { %22 = vsyncpa [#allocation15], 0 }
   0xc   :  { %23 = vsyncpa [#allocation18], 0 }
   0xd   :  { %24 = vsyncpa [#allocation4], 0 }
   0xe   :  { %26 = vsyncpa [#allocation4 + $0x1], 0  ;;  %s5942_s17 = smov 0   ;;  %s5944_s18 = smov 0  }
   0xf   :  { %s5946_s19 = smov 0   ;;  %s5948_s20 = smov 0  }
  0x10 LB: > { %s5861_s21 = smov [#allocation5]   ;;  %s5963_s23 = sadd.s32 4294967295, %s5859_s20   ;;  %s5859_s20 = sphi %s5948_s20, %s6505_s20   ;;  %s5855_s19 = sphi %s5946_s19, %s6504_s19   ;;  %s5851_s18 = sphi %s5944_s18, %s6503_s18   ;;  %s5847_s17 = sphi %s5942_s17, %s6502_s17  }
  0x11   : > { %s311_s22 = sshll.u32 %s5861_s21, 4  ;;  %p4107_p0 = scmp.ge.s32.totalorder %s5859_s20, 1  ;;  %s5968_s22 = int_to_ptr.vmem [resolvable:$true] %s311_s22 }
  0x12   : > { %p6465_p1 = scmp.eq.s32.totalorder %s5963_s23, 0  ;;  %p299_p2 = scmp.lt.s32.totalorder %s5859_s20, 3 }
  0x13   : > { %s5862_s25 = smov [#allocation8]   ;;  %s5863_s28 = smov [#allocation11]  }
  0x14   : > { %p5970_p3 = pnand %p4107_p0, %p299_p2  ;;  %s335_s26 = sshll.u32 %s5862_s25, 4  ;;  %s5983_s26 = int_to_ptr.vmem [resolvable:$true] %s335_s26 }
  0x15   : > { %s5985_s29 = sshll.u32 %s5863_s28, 4  ;;  %s6476_s1 = sld [smem:[#allocation30_spill]]  ;;  %s360_s29 = int_to_ptr.vmem [resolvable:$true] %s5985_s29 }
  0x16   : > { %s6473_s24 = scalar_select %p5970_p3, 1, 0 }
  0x17   : > { %p4789_p5 = pneg %p5970_p3 }
  0x18   : > { %6474 = sst [smem:[#allocation28_spill]] %s6473_s24 }
  0x19   : > { %p5979_p6 = pnand %p4789_p5, %p6465_p1 }
  0x1b   : > { %s5463_s13 = scalar_lea.hbm %s6476_s1, 35840  ;;  %p5995_p8 = pneg %p5979_p6 }
  0x1c   : > { %p5464_p7 = scmp.ne.s32.totalorder %s6476_s1, %s5463_s13  ;;  %p5470_p11 = scmp.lt.u32.totalorder %s5463_s13, %s6476_s1 }
  0x1e   : > { %p5466_p9 = pnand %p5995_p8, %p5464_p7 }
  0x20   : > { %p5467_p10 = pneg %p5466_p9 }
  0x22   : > { %p5472_p12 = pnand %p5470_p11, %p5467_p10 }
  0x24   : > { %5475 = shalt.err (!%p5472_p12)
}
  0x25   : > { %s5476_s28 = scalar_lea.vmem %s5968_s22, 35840  ;;  %p5484_p5 = scmp.lt.s32.totalorder %s5968_s22, %s5968_s22 }
  0x26   : > { %p5477_p13 = scmp.ne.s32.totalorder %s5968_s22, %s5476_s28  ;;  %p5485_p4 = scmp.lt.s32.totalorder %s5476_s28, %s5476_s28 }
  0x28   : > { %p5479_p0 = pnand %p5477_p13, %p5995_p8  ;;  %p5486_p7 = por %p5485_p4, %p5484_p5 }
  0x2a   : > { %p5480_p2 = pneg %p5479_p0 }
  0x2c   : > { %p5487_p9 = pnand %p5486_p7, %p5480_p2 }
  0x2e   : > { %5490 = shalt.err (!%p5487_p9)
}
  0x2f   : > { %s5864_s30 = smov 320   ;;  %s5865_s12 = smov 20  }
  0x30   : > { %4792 = dma.hbm_to_vmem [thread:$0]  (!%p5979_p6), %s6476_s1, 35840, %s5968_s22, [#allocation6], %s5864_s30, %s5864_s30, %s5865_s12  }
  0x31   : > { %s6478_s3 = sld [smem:[#allocation32_spill]] }
  0x37   : > { %s5491_s25 = scalar_lea.hbm %s6478_s3, 10240 }
  0x38   : > { %p5492_p4 = scmp.ne.s32.totalorder %s6478_s3, %s5491_s25  ;;  %p5498_p12 = scmp.lt.u32.totalorder %s5491_s25, %s6478_s3 }
  0x3a   : > { %p5494_p10 = pnand %p5492_p4, %p5995_p8 }
  0x3c   : > { %p5495_p11 = pneg %p5494_p10 }
  0x3e   : > { %p5500_p13 = pnand %p5498_p12, %p5495_p11 }
  0x40   : > { %5503 = shalt.err (!%p5500_p13)
}
  0x41   : > { %s5504_s22 = scalar_lea.vmem %s5983_s26, 10240  ;;  %p5512_p7 = scmp.lt.s32.totalorder %s5983_s26, %s5983_s26 }
  0x42   : > { %p5505_p0 = scmp.ne.s32.totalorder %s5983_s26, %s5504_s22  ;;  %p5513_p9 = scmp.lt.s32.totalorder %s5504_s22, %s5504_s22 }
  0x44   : > { %p5507_p2 = pnand %p5505_p0, %p5995_p8  ;;  %p5514_p4 = por %p5513_p9, %p5512_p7 }
  0x46   : > { %p5508_p5 = pneg %p5507_p2 }
  0x48   : > { %p5515_p10 = pnand %p5514_p4, %p5508_p5 }
  0x4a   : > { %5518 = shalt.err (!%p5515_p10)
}
  0x4b   : > { %s5866_s11 = smov 128   ;;  %s5867_s0 = smov 8  }
  0x4c   : > { %4798 = dma.hbm_to_vmem [thread:$0]  (!%p5979_p6), %s6478_s3, 10240, %s5983_s26, [#allocation9], %s5866_s11, %s5866_s11, %s5867_s0  }
  0x4d   : > { %s5519_s14 = scalar_lea.hbm %s6455_s5, 2048 }
  0x4e   : > { %p5520_p11 = scmp.ne.s32.totalorder %s6455_s5, %s5519_s14  ;;  %p5526_p0 = scmp.lt.u32.totalorder %s5519_s14, %s6455_s5 }
  0x50   : > { %p5522_p12 = pnand %p5520_p11, %p5995_p8 }
  0x52   : > { %p5523_p13 = pneg %p5522_p12 }
  0x54   : > { %p5528_p2 = pnand %p5526_p0, %p5523_p13 }
  0x56   : > { %5531 = shalt.err (!%p5528_p2)
}
  0x57   : > { %s5532_s22 = scalar_lea.vmem %s360_s29, 2048  ;;  %p5540_p4 = scmp.lt.s32.totalorder %s360_s29, %s360_s29 }
  0x58   : > { %p5533_p5 = scmp.ne.s32.totalorder %s360_s29, %s5532_s22  ;;  %p5541_p10 = scmp.lt.s32.totalorder %s5532_s22, %s5532_s22 }
  0x5a   : > { %p5535_p7 = pnand %p5533_p5, %p5995_p8  ;;  %p5542_p1 = por %p5541_p10, %p5540_p4 }
  0x5c   : > { %p5536_p9 = pneg %p5535_p7 }
  0x5e   : > { %p5543_p3 = pnand %p5542_p1, %p5536_p9 }
  0x60   : > { %5546 = shalt.err (!%p5543_p3)
}
  0x61   : > { %s5868_s26 = smov 64   ;;  %s5869_s11 = smov 4  }
  0x62   : > { %4804 = dma.hbm_to_vmem [thread:$0]  (!%p5979_p6), %s6455_s5, 2048, %s360_s29, [#allocation12], %s5868_s26, %s5868_s26, %s5869_s11  }
  0x63   : > { %s5870_s30 = smov [#allocation14]   ;;  %s5871_s13 = smov [#allocation17]  }
  0x64   : > { %s383_s12 = sshll.u32 %s5870_s30, 4  ;;  %s407_s14 = sshll.u32 %s5871_s13, 4  ;;  %s384_s12 = int_to_ptr.vmem [resolvable:$true] %s383_s12  ;;  %s408_s14 = int_to_ptr.vmem [resolvable:$true] %s407_s14 }
  0x65   : > { %s5547_s25 = scalar_lea.hbm %s6457_s7, 1024 }
  0x66   : > { %p5548_p1 = scmp.ne.s32.totalorder %s6457_s7, %s5547_s25  ;;  %p5554_p12 = scmp.lt.u32.totalorder %s5547_s25, %s6457_s7 }
  0x68   : > { %p5550_p3 = pnand %p5548_p1, %p5995_p8 }
  0x6a   : > { %p5551_p11 = pneg %p5550_p3 }
  0x6c   : > { %p5556_p13 = pnand %p5554_p12, %p5551_p11 }
  0x6e   : > { %5559 = shalt.err (!%p5556_p13)
}
  0x6f   : > { %s5560_s29 = scalar_lea.vmem %s384_s12, 1024  ;;  %p5568_p7 = scmp.lt.s32.totalorder %s384_s12, %s384_s12 }
  0x70   : > { %p5561_p0 = scmp.ne.s32.totalorder %s384_s12, %s5560_s29  ;;  %p5569_p9 = scmp.lt.s32.totalorder %s5560_s29, %s5560_s29 }
  0x72   : > { %p5563_p2 = pnand %p5561_p0, %p5995_p8  ;;  %p5570_p4 = por %p5569_p9, %p5568_p7 }
  0x74   : > { %p5564_p5 = pneg %p5563_p2 }
  0x76   : > { %p5571_p10 = pnand %p5570_p4, %p5564_p5 }
  0x78   : > { %5574 = shalt.err (!%p5571_p10)
}
  0x79   : > { %4810 = dma.hbm_to_vmem [thread:$0]  (!%p5979_p6), %s6457_s7, 1024, %s384_s12, [#allocation15], %s5868_s26, %s5868_s26, %s5869_s11  }
  0x7a   : > { %s5575_s30 = scalar_lea.hbm %s6459_s9, 1024 }
  0x7b   : > { %p5576_p1 = scmp.ne.s32.totalorder %s6459_s9, %s5575_s30  ;;  %p5582_p12 = scmp.lt.u32.totalorder %s5575_s30, %s6459_s9 }
  0x7d   : > { %p5578_p3 = pnand %p5576_p1, %p5995_p8 }
  0x7f   : > { %p5579_p11 = pneg %p5578_p3 }
  0x81   : > { %p5584_p13 = pnand %p5582_p12, %p5579_p11 }
  0x83   : > { %5587 = shalt.err (!%p5584_p13)
}
  0x84   : > { %s5588_s28 = scalar_lea.vmem %s408_s14, 1024  ;;  %p5596_p7 = scmp.lt.s32.totalorder %s408_s14, %s408_s14 }
  0x85   : > { %p5589_p0 = scmp.ne.s32.totalorder %s408_s14, %s5588_s28  ;;  %p5597_p9 = scmp.lt.s32.totalorder %s5588_s28, %s5588_s28 }
  0x87   : > { %p5591_p2 = pnand %p5589_p0, %p5995_p8  ;;  %p5598_p4 = por %p5597_p9, %p5596_p7 }
  0x89   : > { %p5592_p5 = pneg %p5591_p2 }
  0x8b   : > { %p5599_p10 = pnand %p5598_p4, %p5592_p5 }
  0x8d   : > { %5602 = shalt.err (!%p5599_p10)
}
  0x8e   : > { %4816 = dma.hbm_to_vmem [thread:$0]  (!%p5979_p6), %s6459_s9, 1024, %s408_s14, [#allocation18], %s5868_s26, %s5868_s26, %s5869_s11  }
  0x8f   : > { %s5872_s29 = smov [#allocation7]   ;;  %s5873_s3 = smov [#allocation10]  }
  0x90   : > { %s325_s1 = sshll.u32 %s5872_s29, 4  ;;  %s349_s0 = sshll.u32 %s5873_s3, 4  ;;  %s326_s1 = int_to_ptr.vmem [resolvable:$true] %s325_s1  ;;  %s350_s0 = int_to_ptr.vmem [resolvable:$true] %s349_s0 }
  0x91   : > { %s6479_s2 = sld [smem:[#allocation31_spill]] }
  0x97   : > { %s5603_s13 = scalar_lea.hbm %s6479_s2, 80 }
  0x98   : > { %p5604_p1 = scmp.ne.s32.totalorder %s6479_s2, %s5603_s13  ;;  %p5610_p12 = scmp.lt.u32.totalorder %s5603_s13, %s6479_s2 }
  0x9a   : > { %p5606_p3 = pnand %p5604_p1, %p5995_p8 }
  0x9c   : > { %p5607_p11 = pneg %p5606_p3 }
  0x9e   : > { %p5612_p13 = pnand %p5610_p12, %p5607_p11 }
  0xa0   : > { %5615 = shalt.err (!%p5612_p13)
}
  0xa1   : > { %s5616_s26 = scalar_lea.vmem %s326_s1, 80  ;;  %s5623_s11 = scalar_lea.vmem %s326_s1, 96 }
  0xa2   : > { %p5617_p0 = scmp.ne.s32.totalorder %s326_s1, %s5616_s26  ;;  %p5624_p7 = scmp.lt.s32.totalorder %s326_s1, %s326_s1 }
  0xa3   : > { %p5625_p9 = scmp.lt.s32.totalorder %s5623_s11, %s5616_s26 }
  0xa4   : > { %p5619_p2 = pnand %p5617_p0, %p5995_p8 }
  0xa5   : > { %p5626_p4 = por %p5625_p9, %p5624_p7 }
  0xa6   : > { %p5620_p5 = pneg %p5619_p2 }
  0xa8   : > { %p5627_p10 = pnand %p5626_p4, %p5620_p5 }
  0xaa   : > { %5630 = shalt.err (!%p5627_p10)
}
  0xab   : > { %4795 = dma.hbm_to_vmem [thread:$0]  (!%p5979_p6), %s6479_s2, 80, %s326_s1, [#allocation6]  }
  0xac   : > { %s5631_s3 = scalar_lea.hbm %s6454_s4, 32 }
  0xad   : > { %p5632_p1 = scmp.ne.s32.totalorder %s6454_s4, %s5631_s3  ;;  %p5638_p12 = scmp.lt.u32.totalorder %s5631_s3, %s6454_s4 }
  0xaf   : > { %p5634_p3 = pnand %p5632_p1, %p5995_p8 }
  0xb1   : > { %p5635_p11 = pneg %p5634_p3 }
  0xb3   : > { %p5640_p13 = pnand %p5638_p12, %p5635_p11 }
  0xb5   : > { %5643 = shalt.err (!%p5640_p13)
}
  0xb6   : > { %s5644_s21 = scalar_lea.vmem %s350_s0, 32  ;;  %p5652_p7 = scmp.lt.s32.totalorder %s350_s0, %s350_s0 }
  0xb7   : > { %p5645_p0 = scmp.ne.s32.totalorder %s350_s0, %s5644_s21  ;;  %p5653_p9 = scmp.lt.s32.totalorder %s5644_s21, %s5644_s21 }
  0xb9   : > { %p5647_p2 = pnand %p5645_p0, %p5995_p8  ;;  %p5654_p4 = por %p5653_p9, %p5652_p7 }
  0xbb   : > { %p5648_p5 = pneg %p5647_p2 }
  0xbd   : > { %p5655_p10 = pnand %p5654_p4, %p5648_p5 }
  0xbf   : > { %5658 = shalt.err (!%p5655_p10)
}
  0xc0   : > { %4801 = dma.hbm_to_vmem [thread:$0]  (!%p5979_p6), %s6454_s4, 32, %s350_s0, [#allocation9]  }
  0xc1   : > { %s5874_s28 = smov [#allocation13]   ;;  %s5875_s11 = smov [#allocation16]  }
  0xc2   : > { %s373_s26 = sshll.u32 %s5874_s28, 4  ;;  %s397_s14 = sshll.u32 %s5875_s11, 4  ;;  %s374_s26 = int_to_ptr.vmem [resolvable:$true] %s373_s26  ;;  %s398_s14 = int_to_ptr.vmem [resolvable:$true] %s397_s14 }
  0xc3   : > { %s5659_s29 = scalar_lea.hbm %s6456_s6, 16 }
  0xc4   : > { %p5660_p1 = scmp.ne.s32.totalorder %s6456_s6, %s5659_s29  ;;  %p5666_p12 = scmp.lt.u32.totalorder %s5659_s29, %s6456_s6 }
  0xc6   : > { %p5662_p3 = pnand %p5660_p1, %p5995_p8 }
  0xc8   : > { %p5663_p11 = pneg %p5662_p3 }
  0xca   : > { %p5668_p13 = pnand %p5666_p12, %p5663_p11 }
  0xcc   : > { %5671 = shalt.err (!%p5668_p13)
}
  0xcd   : > { %s5672_s0 = scalar_lea.vmem %s374_s26, 16  ;;  %s5679_s15 = scalar_lea.vmem %s374_s26, 32 }
  0xce   : > { %p5673_p0 = scmp.ne.s32.totalorder %s374_s26, %s5672_s0  ;;  %p5680_p7 = scmp.lt.s32.totalorder %s374_s26, %s374_s26 }
  0xcf   : > { %p5681_p9 = scmp.lt.s32.totalorder %s5679_s15, %s5672_s0 }
  0xd0   : > { %p5675_p2 = pnand %p5673_p0, %p5995_p8 }
  0xd1   : > { %p5682_p4 = por %p5681_p9, %p5680_p7 }
  0xd2   : > { %p5676_p5 = pneg %p5675_p2 }
  0xd4   : > { %p5683_p10 = pnand %p5682_p4, %p5676_p5 }
  0xd6   : > { %5686 = shalt.err (!%p5683_p10)
}
  0xd7   : > { %4807 = dma.hbm_to_vmem [thread:$0]  (!%p5979_p6), %s6456_s6, 16, %s374_s26, [#allocation12]  }
  0xd8   : > { %s5687_s11 = scalar_lea.hbm %s6458_s8, 16 }
  0xd9   : > { %p5688_p1 = scmp.ne.s32.totalorder %s6458_s8, %s5687_s11  ;;  %p5694_p12 = scmp.lt.u32.totalorder %s5687_s11, %s6458_s8 }
  0xdb   : > { %p5690_p3 = pnand %p5688_p1, %p5995_p8 }
  0xdd   : > { %p5691_p11 = pneg %p5690_p3 }
  0xdf   : > { %p5696_p13 = pnand %p5694_p12, %p5691_p11 }
  0xe1   : > { %5699 = shalt.err (!%p5696_p13)
}
  0xe2   : > { %s5700_s24 = scalar_lea.vmem %s398_s14, 16  ;;  %s5707_s26 = scalar_lea.vmem %s398_s14, 32 }
  0xe3   : > { %p5701_p0 = scmp.ne.s32.totalorder %s398_s14, %s5700_s24  ;;  %p5708_p7 = scmp.lt.s32.totalorder %s398_s14, %s398_s14 }
  0xe4   : > { %p5709_p9 = scmp.lt.s32.totalorder %s5707_s26, %s5700_s24 }
  0xe5   : > { %p5703_p2 = pnand %p5701_p0, %p5995_p8 }
  0xe6   : > { %p5710_p4 = por %p5709_p9, %p5708_p7 }
  0xe7   : > { %p5704_p5 = pneg %p5703_p2 }
  0xe9   : > { %p5711_p10 = pnand %p5710_p4, %p5704_p5 }
  0xeb   : > { %5714 = shalt.err (!%p5711_p10)
}
  0xec   : > { %4813 = dma.hbm_to_vmem [thread:$0]  (!%p5979_p6), %s6458_s8, 16, %s398_s14, [#allocation15]  }
  0xed   : > { %s5876_s0 = smov [#allocation19]   ;;  %s5715_s25 = scalar_lea.hbm %s6460_s10, 16 }
  0xee   : > { %s421_s15 = sshll.u32 %s5876_s0, 4  ;;  %p5716_p1 = scmp.ne.s32.totalorder %s6460_s10, %s5715_s25  ;;  %s422_s15 = int_to_ptr.vmem [resolvable:$true] %s421_s15 }
  0xef   : > { %p5722_p12 = scmp.lt.u32.totalorder %s5715_s25, %s6460_s10 }
  0xf0   : > { %p5718_p3 = pnand %p5716_p1, %p5995_p8 }
  0xf2   : > { %p5719_p11 = pneg %p5718_p3 }
  0xf4   : > { %p5724_p13 = pnand %p5722_p12, %p5719_p11 }
  0xf6   : > { %5727 = shalt.err (!%p5724_p13)
}
  0xf7   : > { %s5728_s14 = scalar_lea.vmem %s422_s15, 16  ;;  %s5735_s29 = scalar_lea.vmem %s422_s15, 32 }
  0xf8   : > { %p5729_p0 = scmp.ne.s32.totalorder %s422_s15, %s5728_s14  ;;  %p5736_p7 = scmp.lt.s32.totalorder %s422_s15, %s422_s15 }
  0xf9   : > { %p5737_p9 = scmp.lt.s32.totalorder %s5735_s29, %s5728_s14 }
  0xfa   : > { %p5731_p2 = pnand %p5729_p0, %p5995_p8 }
  0xfb   : > { %p5738_p4 = por %p5737_p9, %p5736_p7 }
  0xfc   : > { %p5732_p5 = pneg %p5731_p2 }
  0xfe   : > { %p5739_p10 = pnand %p5738_p4, %p5732_p5 }
 0x100   : > { %5742 = shalt.err (!%p5739_p10)
}
 0x101   : > { %4819 = dma.hbm_to_vmem [thread:$0]  (!%p5979_p6), %s6460_s10, 16, %s422_s15, [#allocation18]  }
 0x102   : > { %s4106_s16 = sadd.s32 4294967294, %s5859_s20   ;;  %s6195_s27 = sadd.s32 1, %s5859_s20  }
 0x103   : > { %s36_s26 = ssub.s32 %s5859_s20, %s6195_s27  ;;  %s39_s30 = sadd.s32 1, %s5855_s19 }
 0x104   : > { %p37_p8 = scmp.eq.s32.totalorder %s36_s26, 0  ;;  %p46_p1 = scmp.ne.s32.totalorder %s5855_s19, %s5851_s18 }
 0x105   : > { %p47_p3 = scmp.eq.s32.totalorder %s5859_s20, 0  ;;  %p52_p11 = scmp.ne.s32.totalorder %s5851_s18, %s5847_s17 }
 0x106   : > { %s6206_s13 = scalar_select %p37_p8, %s5855_s19, %s39_s30  }
 0x107   : > { %p48_p12 = por %p47_p3, %p46_p1  ;;  %p6480_p13 = scmp.eq.s32.totalorder %s5963_s23, 0 }
 0x108   : > { %p286_p6 = scmp.eq.s32.totalorder %s5963_s23, 1  ;;  %p292_p2 = scmp.eq.s32.totalorder %s4106_s16, 1 }
 0x109   : > { %p6210_p0 = por %p6480_p13, %p52_p11  ;;  %p4838_p5 = scmp.lt.s32.totalorder %s5859_s20, 2 }
 0x10a   : > { %s432_s15 = sand.u32 1, %s5855_s19   ;;  %p6217_p7 = por %p286_p6, %p46_p1 }
 0x10b   : > { %p6221_p9 = por %p292_p2, %p52_p11  ;;  %s4742_s25 = smul.u32 56, %s432_s15 }
 0x10c   : > { %s6482_s21 = scalar_select %p6217_p7, 1, 0 }
 0x10d   : > { %s6483_s1 = scalar_select %p6221_p9, 1, 0 }
 0x10e   : > { %s4743_s28 = smul.u32 896, %s5859_s20  ;;  %p6226_p4 = pnand %p4838_p5, %p48_p12 }
 0x10f   : > { %s6485_s14 = sld [smem:[#allocation29_spill]]  ;;  %s436_s3 = scalar_lea.vmem [#allocation2], %s4742_s25 }
 0x110   : > { %s444_s24 = sshll.u32 %s436_s3, 4  ;;  %s433_s16 = scalar_lea.sflag [#allocation3], %s432_s15  ;;  %s6235_s24 = int_to_ptr.vmem [resolvable:$true] %s444_s24 }
 0x111   : > { %p5745_p8 = pneg %p6226_p4 }
 0x115   : > { %s6233_s29 = scalar_lea.hbm %s6485_s14, %s4743_s28  ;;  %s5748_s12 = scalar_lea.hbm %s6485_s14, 1792 }
 0x116   : > { %s5743_s26 = scalar_lea.hbm %s6233_s29, 896  ;;  %p5749_p11 = scmp.lt.u32.totalorder %s6233_s29, %s6485_s14 }
 0x117   : > { %p5744_p10 = scmp.ne.s32.totalorder %s6233_s29, %s5743_s26  ;;  %p5750_p12 = scmp.lt.u32.totalorder %s5748_s12, %s5743_s26 }
 0x118   : > { %p5752_p6 = scmp.lt.u32.totalorder %s5743_s26, %s6233_s29 }
 0x119   : > { %p5746_p1 = pnand %p5745_p8, %p5744_p10  ;;  %p5751_p13 = por %p5750_p12, %p5749_p11 }
 0x11b   : > { %p5747_p3 = pneg %p5746_p1  ;;  %p5753_p2 = por %p5752_p6, %p5751_p13 }
 0x11d   : > { %p5754_p5 = pnand %p5753_p2, %p5747_p3 }
 0x11f   : > { %5757 = shalt.err (!%p5754_p5)
}
 0x120   : > { %s5758_s15 = scalar_lea.vmem %s6235_s24, 896  ;;  %s5877_s25 = smov [#allocation2]  }
 0x121   : > { %p5759_p10 = scmp.ne.s32.totalorder %s6235_s24, %s5758_s15  ;;  %s5763_s3 = sshll.u32 %s5877_s25, 4  ;;  %s5764_s3 = int_to_ptr.vmem [resolvable:$false] %s5763_s3 }
 0x122   : > { %s5765_s2 = scalar_lea.vmem %s5764_s3, 1792  ;;  %p5766_p7 = scmp.lt.s32.totalorder %s6235_s24, %s5764_s3 }
 0x123   : > { %p5761_p1 = pnand %p5759_p10, %p5745_p8  ;;  %p5767_p11 = scmp.lt.s32.totalorder %s5765_s2, %s5758_s15 }
 0x125   : > { %p5762_p9 = pneg %p5761_p1  ;;  %p5768_p12 = por %p5767_p11, %p5766_p7 }
 0x127   : > { %p5769_p13 = pnand %p5768_p12, %p5762_p9 }
 0x129   : > { %5772 = shalt.err (!%p5769_p13)
}
 0x12a   : > { %4823 = dma.hbm_to_vmem [thread:$0]  (!%p6226_p4), %s6233_s29, 896, %s6235_s24, %s433_s16  }
 0x12b   : > { %s6486_s26 = sld [smem:[#allocation28_spill]] }
 0x131   : > { %p6487_p3 = scmp.ne.s32.totalorder %s6486_s26, 0 }
 0x132   : > { %s6265_s30 = sand.u32 (!%p6487_p3), 1, %s5851_s18  }
 0x133   : > { %453 = sbr.rel (%p6487_p3) target bundleno = 1818 (0x71a), region = 64  ;;  %s456_s12 = scalar_lea.sflag (!%p6487_p3), [#allocation3], %s6265_s30 }
 0x134   : > { %s4744_s28 = smul.u32 (!%p6487_p3), 56, %s6265_s30 }
 0x136   : > { %s6269_s22 = scalar_lea.vmem (!%p6487_p3), [#allocation2], %s4744_s28 }
 0x13a   : > { %5818 = dma.done.wait (%p6210_p0), %s456_s12, 896  }
 0x13b   : > { %5820 = vsyncadd (%p6210_p0), %s456_s12, 4294966400  ;;  %p6488_p7 = scmp.eq.s32.totalorder %s5963_s23, 0 }
 0x13d   : > { %5822 = dma.done.wait (%p6488_p7), [#allocation6], 35920   ;;  %p6489_p9 = pmov %p6488_p7 }
 0x13e   : > { %p6490_p4 = pmov %p6488_p7 }
 0x13f   : > { %5824 = vsyncadd (%p6489_p9), [#allocation6], 4294931376 }
 0x140   : > { %5826 = dma.done.wait (%p6490_p4), [#allocation9], 10272   ;;  %p6491_p8 = pmov %p6490_p4 }
 0x141   : > { %p6492_p6 = pmov %p6490_p4 }
 0x142   : > { %5828 = vsyncadd (%p6491_p8), [#allocation9], 4294957024 }
 0x143   : > { %5830 = dma.done.wait (%p6492_p6), [#allocation12], 2064   ;;  %p6493_p2 = pmov %p6490_p4 }
 0x145   : > { %5832 = vsyncadd (%p6493_p2), [#allocation12], 4294965232  ;;  %p6494_p0 = pmov %p6493_p2 }
 0x147   : > { %5834 = dma.done.wait (%p6494_p0), [#allocation15], 1040   ;;  %p6495_p5 = pmov %p6494_p0 }
 0x148   : > { %p6496_p10 = pmov %p6494_p0 }
 0x149   : > { %5836 = vsyncadd (%p6495_p5), [#allocation15], 4294966256 }
 0x14a   : > { %5838 = dma.done.wait (%p6496_p10), [#allocation18], 1040   ;;  %p6497_p1 = pmov %p6494_p0 }
 0x14b   : > { %v5878_v0 = vmov 0   ;;  %v4901_v1 = vld [vmem:[#allocation5 + $0x4] ss:$20 sps:$4 sm:$0xff]   ;;  %v4905_v3 = vld [vmem:[#allocation5] ss:$20 sps:$4 sm:$0xff]   ;;  %vm5880_vm0 = vmmov 0  }
 0x14c   : > { %5840 = vsyncadd (%p6497_p1), [#allocation18], 4294966256  ;;  %2527 = vmatprep.mubr.bf16.mxu1 %v5878_v0  ;;  %v4903_v2 = vld [vmem:[#allocation5 + $0x784] ss:$20 sps:$4 sm:$0xff]   ;;  %2372 = vmatprep.subr.bf16.mxu0 %v4901_v1  ;;  %v4906_v4 = vld [vmem:[#allocation5 + $0x780] ss:$20 sps:$4 sm:$0xff]  }
 0x14d   : > { %2495 = vmatprep.subr.bf16.mxu1 %v4903_v2  ;;  %v4907_v5 = vld [vmem:[#allocation5 + $0x2c] ss:$20 sps:$4 sm:$0xff]   ;;  %2373 = vmatpush1.bf16.msra.mxu0 %v4905_v3  ;;  %v4911_v7 = vld [vmem:[#allocation5 + $0x28] ss:$20 sps:$4 sm:$0xff]   ;;  %v4917_v11 = vld [vmem:[#allocation5 + $0x50] ss:$20 sps:$4 sm:$0xff]  }
 0x14e   : > { %2496 = vmatpush1.bf16.msra.mxu1 %v4906_v4  ;;  %v4909_v6 = vld [vmem:[#allocation5 + $0x7ac] ss:$20 sps:$4 sm:$0xff]   ;;  %2374 = vmatprep.subr.bf16.mxu0 %v4907_v5  ;;  %v4912_v8 = vld [vmem:[#allocation5 + $0x7a8] ss:$20 sps:$4 sm:$0xff]   ;;  %v4918_v12 = vld [vmem:[#allocation5 + $0x7d0] ss:$20 sps:$4 sm:$0xff]  }
 0x14f   : > { %2497 = vmatprep.subr.bf16.mxu1 %v4909_v6  ;;  %v4913_v9 = vld [vmem:[#allocation5 + $0x54] ss:$20 sps:$4 sm:$0xff]   ;;  %v4919_v13 = vld [vmem:[#allocation5 + $0x7c] ss:$20 sps:$4 sm:$0xff]   ;;  %v4923_v15 = vld [vmem:[#allocation5 + $0x78] ss:$20 sps:$4 sm:$0xff]  }
 0x150   : > { %v4915_v10 = vld [vmem:[#allocation5 + $0x7d4] ss:$20 sps:$4 sm:$0xff]   ;;  %v4921_v14 = vld [vmem:[#allocation5 + $0x7fc] ss:$20 sps:$4 sm:$0xff]   ;;  %v4924_v16 = vld [vmem:[#allocation5 + $0x7f8] ss:$20 sps:$4 sm:$0xff]  }
 0x151   : > { %2375 = vmatpush1.bf16.msra.mxu0 %v4911_v7  ;;  %v4925_v17 = vld [vmem:[#allocation5 + $0xa4] ss:$20 sps:$4 sm:$0xff]   ;;  %v4929_v19 = vld [vmem:[#allocation5 + $0xa0] ss:$20 sps:$4 sm:$0xff]   ;;  %v4935_v23 = vld [vmem:[#allocation5 + $0xc8] ss:$20 sps:$4 sm:$0xff]  }
 0x152   : > { %2498 = vmatpush1.bf16.msra.mxu1 %v4912_v8  ;;  %2376 = vmatprep.subr.bf16.mxu0 %v4913_v9  ;;  %v4927_v18 = vld [vmem:[#allocation5 + $0x824] ss:$20 sps:$4 sm:$0xff]   ;;  %v4930_v20 = vld [vmem:[#allocation5 + $0x820] ss:$20 sps:$4 sm:$0xff]   ;;  %v4936_v24 = vld [vmem:[#allocation5 + $0x848] ss:$20 sps:$4 sm:$0xff]  }
 0x153   : > { %2499 = vmatprep.subr.bf16.mxu1 %v4915_v10  ;;  %v4931_v21 = vld [vmem:[#allocation5 + $0xcc] ss:$20 sps:$4 sm:$0xff]   ;;  %v4937_v25 = vld [vmem:[#allocation5 + $0xf4] ss:$20 sps:$4 sm:$0xff]   ;;  %v4941_v27 = vld [vmem:[#allocation5 + $0xf0] ss:$20 sps:$4 sm:$0xff]  }
 0x154   : > { %v4933_v22 = vld [vmem:[#allocation5 + $0x84c] ss:$20 sps:$4 sm:$0xff]   ;;  %v4939_v26 = vld [vmem:[#allocation5 + $0x874] ss:$20 sps:$4 sm:$0xff]   ;;  %v4942_v28 = vld [vmem:[#allocation5 + $0x870] ss:$20 sps:$4 sm:$0xff]  }
 0x155   : > { %2377 = vmatpush1.bf16.msra.mxu0 %v4917_v11  ;;  %v4943_v29 = vld [vmem:[#allocation5 + $0x11c] ss:$20 sps:$4 sm:$0xff]   ;;  %v4947_v31 = vld [vmem:[#allocation5 + $0x118] ss:$20 sps:$4 sm:$0xff]   ;;  %v4954_v38 = vld [vmem:[#allocation5 + $0x140] ss:$20 sps:$4 sm:$0xff]  }
 0x156   : > { %2500 = vmatpush1.bf16.msra.mxu1 %v4918_v12  ;;  %2378 = vmatprep.subr.bf16.mxu0 %v4919_v13  ;;  %v4945_v30 = vld [vmem:[#allocation5 + $0x89c] ss:$20 sps:$4 sm:$0xff]   ;;  %v4948_v32 = vld [vmem:[#allocation5 + $0x898] ss:$20 sps:$4 sm:$0xff]   ;;  %v4959_v40 = vld [vmem:[#allocation5 + $0x34] ss:$20 sps:$4 sm:$0xff]  }
 0x157   : > { %2501 = vmatprep.subr.bf16.mxu1 %v4921_v14  ;;  %v545_v33 = vld [vmem:[%s6269_s22 + $0x30] sm:$0xff]  ;;  %v4961_v43 = vld [vmem:[#allocation5 + $0x194] ss:$20 sps:$4 sm:$0xff]   ;;  %s4131_s0 = sshll.u32 %s6265_s30, 3  ;;  %s4528_s11 = sshll.u32 %s5963_s23, 7 }
 0x158   : > { %v4949_v34 = vld [vmem:[#allocation5 + $0x144] ss:$20 sps:$4 sm:$0xff]   ;;  %v4953_v35 = vld [vmem:[#allocation5 + $0xc] ss:$20 sps:$4 sm:$0xff]   ;;  %v6297_v36 = vpack.c.bf16 %v545_v33, %v545_v33  ;;  %v4951_v37 = vld [vmem:[#allocation5 + $0x8] ss:$20 sps:$4 sm:$0xff]  }
 0x159   : > { %2379 = vmatpush1.bf16.msra.mxu0 %v4923_v15  ;;  %v4955_v39 = vld [vmem:[#allocation5 + $0x16c] ss:$20 sps:$4 sm:$0xff]   ;;  %v4957_v41 = vld [vmem:[#allocation5 + $0x30] ss:$20 sps:$4 sm:$0xff]   ;;  %v4960_v42 = vld [vmem:[#allocation5 + $0x168] ss:$20 sps:$4 sm:$0xff]  }
 0x15a   : > { %2502 = vmatpush1.bf16.msra.mxu1 %v4924_v16  ;;  %2380 = vmatprep.subr.bf16.mxu0 %v4925_v17  ;;  %v4965_v44 = vld [vmem:[#allocation5 + $0x5c] ss:$20 sps:$4 sm:$0xff]   ;;  %v4963_v45 = vld [vmem:[#allocation5 + $0x58] ss:$20 sps:$4 sm:$0xff]   ;;  %v4969_v50 = vld [vmem:[#allocation5 + $0x80] ss:$20 sps:$4 sm:$0xff]  }
 0x15b   : > { %2503 = vmatprep.subr.bf16.mxu1 %v4927_v18  ;;  %v4966_v46 = vld [vmem:[#allocation5 + $0x190] ss:$20 sps:$4 sm:$0xff]   ;;  %v4972_v51 = vld [vmem:[#allocation5 + $0x1b8] ss:$20 sps:$4 sm:$0xff]   ;;  %v4975_v55 = vld [vmem:[#allocation5 + $0xa8] ss:$20 sps:$4 sm:$0xff]  }
 0x15c   : > { %v4967_v47 = vld [vmem:[#allocation5 + $0x1bc] ss:$20 sps:$4 sm:$0xff]   ;;  %v4971_v48 = vld [vmem:[#allocation5 + $0x84] ss:$20 sps:$4 sm:$0xff]   ;;  %v4977_v54 = vld [vmem:[#allocation5 + $0xac] ss:$20 sps:$4 sm:$0xff]  }
 0x15d   : > { %2381 = vmatpush1.bf16.msra.mxu0 %v4929_v19  ;;  %v540_v49 = vld [vmem:[%s6269_s22 + $0x8] sm:$0xff]  ;;  %v4979_v57 = vld [vmem:[#allocation5 + $0x20c] ss:$20 sps:$4 sm:$0xff]   ;;  %s537_s29 = scalar_lea.vmem [#allocation20], %s4131_s0  ;;  %s6498_s25 = sld [smem:[#allocation33_spill]] }
 0x15e   : > { %2504 = vmatpush1.bf16.msra.mxu1 %v4930_v20  ;;  %2382 = vmatprep.subr.bf16.mxu0 %v4931_v21  ;;  %v6301_v52 = vpack.c.bf16 %v540_v49, %v540_v49  ;;  %v4973_v53 = vld [vmem:[#allocation5 + $0x1e4] ss:$20 sps:$4 sm:$0xff]   ;;  %v4978_v56 = vld [vmem:[#allocation5 + $0x1e0] ss:$20 sps:$4 sm:$0xff]   ;;  %v4984_v60 = vld [vmem:[#allocation5 + $0x208] ss:$20 sps:$4 sm:$0xff]  }
 0x15f   : > { %2505 = vmatprep.subr.bf16.mxu1 %v4933_v22  ;;  %v4983_v58 = vld [vmem:[#allocation5 + $0xd4] ss:$20 sps:$4 sm:$0xff]   ;;  %v4981_v59 = vld [vmem:[#allocation5 + $0xd0] ss:$20 sps:$4 sm:$0xff]   ;;  %v4987_v63 = vld [vmem:[#allocation5 + $0xf8] ss:$20 sps:$4 sm:$0xff]  }
 0x160   : > { %2404 = vmatprep.mubr.bf16.mxu0 %v6301_v52  ;;  %v4985_v61 = vld [vmem:[#allocation5 + $0x234] ss:$20 sps:$4 sm:$0xff]   ;;  %v4989_v62 = vld [vmem:[#allocation5 + $0xfc] ss:$20 sps:$4 sm:$0xff]   ;;  %v4995_v3 = vld [vmem:[#allocation5 + $0x124] ss:$20 sps:$4 sm:$0xff]  }
 0x161   : > { %2383 = vmatpush1.bf16.msra.mxu0 %v4935_v23  ;;  %v4990_v1 = vld [vmem:[#allocation5 + $0x230] ss:$20 sps:$4 sm:$0xff]   ;;  %v4993_v4 = vld [vmem:[#allocation5 + $0x120] ss:$20 sps:$4 sm:$0xff]   ;;  %v4996_v5 = vld [vmem:[#allocation5 + $0x258] ss:$20 sps:$4 sm:$0xff]  }
 0x162   : > { %2506 = vmatpush1.bf16.msra.mxu1 %v4936_v24  ;;  %2384 = vmatprep.subr.bf16.mxu0 %v4937_v25  ;;  %v4991_v2 = vld [vmem:[#allocation5 + $0x25c] ss:$20 sps:$4 sm:$0xff]   ;;  %v4999_v6 = vld [vmem:[#allocation5 + $0x284] ss:$20 sps:$4 sm:$0xff]   ;;  %v5002_v8 = vld [vmem:[#allocation5 + $0x14c] ss:$20 sps:$4 sm:$0xff]  }
 0x163   : > { %2507 = vmatprep.subr.bf16.mxu1 %v4939_v26  ;;  %v539_v7 = vld [vmem:[%s6269_s22] sm:$0xff]  ;;  %v5020_v21 = vld [vmem:[#allocation5 + $0x1c4] ss:$20 sps:$4 sm:$0xff]   ;;  %s3941_s24 = sshll.u32 %s537_s29, 4  ;;  %s6406_s3 = scalar_lea.hbm %s6498_s25, %s4528_s11  ;;  %s6408_s24 = int_to_ptr.vmem [resolvable:$true] %s3941_s24 }
 0x164   : > { %v4997_v9 = vld [vmem:[#allocation5 + $0x280] ss:$20 sps:$4 sm:$0xff]   ;;  %v6306_v10 = vpack.c.bf16 %v539_v7, %v539_v7  ;;  %v5000_v11 = vld [vmem:[#allocation5 + $0x148] ss:$20 sps:$4 sm:$0xff]   ;;  %v5006_v15 = vld [vmem:[#allocation5 + $0x170] ss:$20 sps:$4 sm:$0xff]  }
 0x165   : > { %2385 = vmatpush1.bf16.msra.mxu0 %v4941_v27  ;;  %v5005_v12 = vld [vmem:[#allocation5 + $0x2ac] ss:$20 sps:$4 sm:$0xff]   ;;  %v5008_v13 = vld [vmem:[#allocation5 + $0x174] ss:$20 sps:$4 sm:$0xff]   ;;  %v5014_v17 = vld [vmem:[#allocation5 + $0x19c] ss:$20 sps:$4 sm:$0xff]  }
 0x166   : > { %2508 = vmatpush1.bf16.msra.mxu1 %v4942_v28  ;;  %2386 = vmatprep.subr.bf16.mxu0 %v4943_v29  ;;  %v5003_v14 = vld [vmem:[#allocation5 + $0x2a8] ss:$20 sps:$4 sm:$0xff]   ;;  %v5009_v18 = vld [vmem:[#allocation5 + $0x2d0] ss:$20 sps:$4 sm:$0xff]   ;;  %v5012_v19 = vld [vmem:[#allocation5 + $0x198] ss:$20 sps:$4 sm:$0xff]  }
 0x167   : > { %2509 = vmatprep.subr.bf16.mxu1 %v4945_v30  ;;  %v5011_v16 = vld [vmem:[#allocation5 + $0x2d4] ss:$20 sps:$4 sm:$0xff]   ;;  %v5017_v20 = vld [vmem:[#allocation5 + $0x2fc] ss:$20 sps:$4 sm:$0xff]   ;;  %v5015_v22 = vld [vmem:[#allocation5 + $0x2f8] ss:$20 sps:$4 sm:$0xff]  }
 0x168   : > { %v5018_v23 = vld [vmem:[#allocation5 + $0x1c0] ss:$20 sps:$4 sm:$0xff]   ;;  %v5023_v24 = vld [vmem:[#allocation5 + $0x324] ss:$20 sps:$4 sm:$0xff]   ;;  %v5024_v27 = vld [vmem:[#allocation5 + $0x1e8] ss:$20 sps:$4 sm:$0xff]  }
 0x169   : > { %2387 = vmatpush1.bf16.msra.mxu0 %v4947_v31  ;;  %v5026_v25 = vld [vmem:[#allocation5 + $0x1ec] ss:$20 sps:$4 sm:$0xff]   ;;  %v5032_v29 = vld [vmem:[#allocation5 + $0x214] ss:$20 sps:$4 sm:$0xff]   ;;  %v5030_v31 = vld [vmem:[#allocation5 + $0x210] ss:$20 sps:$4 sm:$0xff]  }
 0x16a   : > { %2510 = vmatpush1.bf16.msra.mxu1 %v4948_v32  ;;  %2388 = vmatprep.subr.bf16.mxu0 %v4949_v34  ;;  %v5021_v26 = vld [vmem:[#allocation5 + $0x320] ss:$20 sps:$4 sm:$0xff]   ;;  %v5027_v30 = vld [vmem:[#allocation5 + $0x348] ss:$20 sps:$4 sm:$0xff]   ;;  %v5081_v7 = vld [vmem:[#allocation5 + $0x4b0] ss:$20 sps:$4 sm:$0xff]  }
 0x16b   : > { %2536 = vmatprep.subr.bf16.mxu1 %v4953_v35  ;;  %v5029_v28 = vld [vmem:[#allocation5 + $0x34c] ss:$20 sps:$4 sm:$0xff]   ;;  %v5035_v32 = vld [vmem:[#allocation5 + $0x374] ss:$20 sps:$4 sm:$0xff]   ;;  %v5038_v33 = vld [vmem:[#allocation5 + $0x23c] ss:$20 sps:$4 sm:$0xff]  }
 0x16c   : > { %v542_v34 = vld [vmem:[%s6269_s22 + $0x18] sm:$0xff]  ;;  %s3928_s2 = scalar_lea.sflag [#allocation4], %s6265_s30  ;;  %s5773_s23 = scalar_lea.vmem %s6408_s24, 128 }
 0x16d   : > { %2528 = vmatmul.mubr.bf16.vlgmr.msra.gmra.mrb[0].mxu1 %v6297_v36  ;;  %2389 = vmatpush1.bf16.msra.mxu0 %v4954_v38  ;;  %v5033_v35 = vld [vmem:[#allocation5 + $0x370] ss:$20 sps:$4 sm:$0xff]   ;;  %v5036_v38 = vld [vmem:[#allocation5 + $0x238] ss:$20 sps:$4 sm:$0xff]   ;;  %v5051_v49 = vld [vmem:[#allocation5 + $0x3e8] ss:$20 sps:$4 sm:$0xff]   ;;  %p5774_p11 = scmp.ne.s32.totalorder %s6408_s24, %s5773_s23 }
 0x16e   : > { %2537 = vmatpush1.bf16.msra.mxu1 %v4951_v37  ;;  %2390 = vmatprep.subr.bf16.mxu0 %v4955_v39  ;;  %v6310_v37 = vpack.c.bf16 %v542_v34, %v542_v34  ;;  %v5041_v39 = vld [vmem:[#allocation5 + $0x39c] ss:$20 sps:$4 sm:$0xff]   ;;  %v5119_v34 = vld [vmem:[#allocation5 + $0x5a4] ss:$20 sps:$4 sm:$0xff]   ;;  %p6499_p12 = scmp.ne.s32.totalorder %s6482_s21, 0  ;;  %s5881_s26 = smov [#allocation20]  }
 0x16f   : > { %2538 = vmatprep.subr.bf16.mxu1 %v4959_v40  ;;  %2568 = vmatprep.mubr.bf16.mxu1 %v6301_v52  ;;  %v5044_v40 = vld [vmem:[#allocation5 + $0x264] ss:$20 sps:$4 sm:$0xff]   ;;  %s5777_s28 = sshll.u32 %s5881_s26, 4  ;;  %s5778_s28 = int_to_ptr.vmem [resolvable:$false] %s5777_s28 }
 0x170   : > { %p5775_p13 = pnand %p5774_p11, %p6499_p12  ;;  %s5779_s12 = scalar_lea.vmem %s5778_s28, 256 }
 0x171   : > { %2391 = vmatpush1.bf16.msra.mxu0 %v4960_v42  ;;  %v5042_v42 = vld [vmem:[#allocation5 + $0x260] ss:$20 sps:$4 sm:$0xff]   ;;  %p5780_p7 = scmp.lt.s32.totalorder %s6408_s24, %s5778_s28  ;;  %p5781_p9 = scmp.lt.s32.totalorder %s5779_s12, %s5773_s23 }
 0x172   : > { %2539 = vmatpush1.bf16.msra.mxu1 %v4957_v41  ;;  %2392 = vmatprep.subr.bf16.mxu0 %v4961_v43  ;;  %v5039_v41 = vld [vmem:[#allocation5 + $0x398] ss:$20 sps:$4 sm:$0xff]   ;;  %p5776_p3 = pneg %p5775_p13 }
 0x173   : > { %2540 = vmatprep.subr.bf16.mxu1 %v4965_v44  ;;  %v5047_v43 = vld [vmem:[#allocation5 + $0x3c4] ss:$20 sps:$4 sm:$0xff]   ;;  %v5050_v44 = vld [vmem:[#allocation5 + $0x28c] ss:$20 sps:$4 sm:$0xff]   ;;  %p5782_p4 = por %p5781_p9, %p5780_p7 }
 0x175   : > { %2393 = vmatpush1.bf16.msra.mxu0 %v4966_v46  ;;  %v5048_v46 = vld [vmem:[#allocation5 + $0x288] ss:$20 sps:$4 sm:$0xff]   ;;  %p5783_p8 = pnand %p5782_p4, %p5776_p3 }
 0x176   : > { %2541 = vmatpush1.bf16.msra.mxu1 %v4963_v45  ;;  %2394 = vmatprep.subr.bf16.mxu0 %v4967_v47  ;;  %v5045_v45 = vld [vmem:[#allocation5 + $0x3c0] ss:$20 sps:$4 sm:$0xff]  }
 0x177   : > { %2542 = vmatprep.subr.bf16.mxu1 %v4971_v48  ;;  %v5053_v47 = vld [vmem:[#allocation5 + $0x3ec] ss:$20 sps:$4 sm:$0xff]   ;;  %v5056_v48 = vld [vmem:[#allocation5 + $0x2b4] ss:$20 sps:$4 sm:$0xff]  }
 0x179   : > { %2395 = vmatpush1.bf16.msra.mxu0 %v4972_v51  ;;  %v5059_v51 = vld [vmem:[#allocation5 + $0x414] ss:$20 sps:$4 sm:$0xff]  }
 0x17a   : > { %2543 = vmatpush1.bf16.msra.mxu1 %v4969_v50  ;;  %2396 = vmatprep.subr.bf16.mxu0 %v4973_v53  ;;  %v5054_v50 = vld [vmem:[#allocation5 + $0x2b0] ss:$20 sps:$4 sm:$0xff]  }
 0x17b   : > { %2544 = vmatprep.subr.bf16.mxu1 %v4977_v54  ;;  %v5062_v53 = vld [vmem:[#allocation5 + $0x2dc] ss:$20 sps:$4 sm:$0xff]  }
 0x17c   : > { %v5057_v54 = vld [vmem:[#allocation5 + $0x410] ss:$20 sps:$4 sm:$0xff]  }
 0x17d   : > { %2397 = vmatpush1.bf16.msra.mxu0 %v4978_v56  ;;  %v5065_v56 = vld [vmem:[#allocation5 + $0x43c] ss:$20 sps:$4 sm:$0xff]  }
 0x17e   : > { %2545 = vmatpush1.bf16.msra.mxu1 %v4975_v55  ;;  %2398 = vmatprep.subr.bf16.mxu0 %v4979_v57  ;;  %v5060_v55 = vld [vmem:[#allocation5 + $0x2d8] ss:$20 sps:$4 sm:$0xff]  }
 0x17f   : > { %2546 = vmatprep.subr.bf16.mxu1 %v4983_v58  ;;  %v5068_v57 = vld [vmem:[#allocation5 + $0x304] ss:$20 sps:$4 sm:$0xff]  }
 0x180   : > { %v5063_v58 = vld [vmem:[#allocation5 + $0x438] ss:$20 sps:$4 sm:$0xff]  }
 0x181   : > { %2399 = vmatpush1.bf16.msra.mxu0 %v4984_v60  ;;  %v5071_v60 = vld [vmem:[#allocation5 + $0x464] ss:$20 sps:$4 sm:$0xff]  }
 0x182   : > { %2547 = vmatpush1.bf16.msra.mxu1 %v4981_v59  ;;  %2400 = vmatprep.subr.bf16.mxu0 %v4985_v61  ;;  %v5066_v59 = vld [vmem:[#allocation5 + $0x300] ss:$20 sps:$4 sm:$0xff]  }
 0x183   : > { %2548 = vmatprep.subr.bf16.mxu1 %v4989_v62  ;;  %v5074_v61 = vld [vmem:[#allocation5 + $0x32c] ss:$20 sps:$4 sm:$0xff]  }
 0x184   : > { %v5069_v62 = vld [vmem:[#allocation5 + $0x460] ss:$20 sps:$4 sm:$0xff]  }
 0x185   : > { %2401 = vmatpush1.bf16.msra.mxu0 %v4990_v1  ;;  %v5077_v1 = vld [vmem:[#allocation5 + $0x48c] ss:$20 sps:$4 sm:$0xff]  }
 0x186   : > { %2549 = vmatpush1.bf16.msra.mxu1 %v4987_v63  ;;  %2402 = vmatprep.subr.bf16.mxu0 %v4991_v2  ;;  %v5072_v63 = vld [vmem:[#allocation5 + $0x328] ss:$20 sps:$4 sm:$0xff]  }
 0x187   : > { %2550 = vmatprep.subr.bf16.mxu1 %v4995_v3  ;;  %v5080_v2 = vld [vmem:[#allocation5 + $0x354] ss:$20 sps:$4 sm:$0xff]  }
 0x188   : > { %v5075_v3 = vld [vmem:[#allocation5 + $0x488] ss:$20 sps:$4 sm:$0xff]  }
 0x189   : > { %2403 = vmatpush1.bf16.msra.mxu0 %v4996_v5  ;;  %v5083_v5 = vld [vmem:[#allocation5 + $0x4b4] ss:$20 sps:$4 sm:$0xff]  }
 0x18a   : > { %2551 = vmatpush1.bf16.msra.mxu1 %v4993_v4  ;;  %2413 = vmatprep.subr.bf16.mxu0 %v4999_v6  ;;  %v5078_v4 = vld [vmem:[#allocation5 + $0x350] ss:$20 sps:$4 sm:$0xff]  }
 0x18b   : > { %2552 = vmatprep.subr.bf16.mxu1 %v5002_v8  ;;  %v5086_v6 = vld [vmem:[#allocation5 + $0x37c] ss:$20 sps:$4 sm:$0xff]   ;;  %v5084_v8 = vld [vmem:[#allocation5 + $0x378] ss:$20 sps:$4 sm:$0xff]  }
 0x18c   : > { %2405 = vmatmul.mubr.bf16.vlgmr.msra.gmra.mrb[0].mxu0 %v6306_v10 }
 0x18d   : > { %2414 = vmatpush1.bf16.msra.mxu0 %v4997_v9  ;;  %2445 = vmatprep.mubr.bf16.mxu0 %v6310_v37  ;;  %v5089_v9 = vld [vmem:[#allocation5 + $0x4dc] ss:$20 sps:$4 sm:$0xff]  }
 0x18e   : > { %2553 = vmatpush1.bf16.msra.mxu1 %v5000_v11  ;;  %2415 = vmatprep.subr.bf16.mxu0 %v5005_v12  ;;  %v5092_v11 = vld [vmem:[#allocation5 + $0x3a4] ss:$20 sps:$4 sm:$0xff]  }
 0x18f   : > { %2554 = vmatprep.subr.bf16.mxu1 %v5008_v13  ;;  %v5087_v12 = vld [vmem:[#allocation5 + $0x4d8] ss:$20 sps:$4 sm:$0xff]   ;;  %v5090_v13 = vld [vmem:[#allocation5 + $0x3a0] ss:$20 sps:$4 sm:$0xff]  }
 0x191   : > { %2416 = vmatpush1.bf16.msra.mxu0 %v5003_v14  ;;  %v541_v14 = vld [vmem:[%s6269_s22 + $0x10] sm:$0xff] }
 0x192   : > { %2555 = vmatpush1.bf16.msra.mxu1 %v5006_v15  ;;  %2417 = vmatprep.subr.bf16.mxu0 %v5011_v16  ;;  %v5095_v15 = vld [vmem:[#allocation5 + $0x504] ss:$20 sps:$4 sm:$0xff]   ;;  %v5098_v16 = vld [vmem:[#allocation5 + $0x3cc] ss:$20 sps:$4 sm:$0xff]  }
 0x193   : > { %2556 = vmatprep.subr.bf16.mxu1 %v5014_v17  ;;  %v5093_v17 = vld [vmem:[#allocation5 + $0x500] ss:$20 sps:$4 sm:$0xff]  }
 0x195   : > { %2418 = vmatpush1.bf16.msra.mxu0 %v5009_v18  ;;  %v6316_v18 = vpack.c.bf16 %v541_v14, %v541_v14  ;;  %v5174_v14 = vld [vmem:[#allocation5 + $0x5d0] ss:$20 sps:$4 sm:$0xff]  }
 0x196   : > { %2557 = vmatpush1.bf16.msra.mxu1 %v5012_v19  ;;  %2419 = vmatprep.subr.bf16.mxu0 %v5017_v20  ;;  %v5096_v19 = vld [vmem:[#allocation5 + $0x3c8] ss:$20 sps:$4 sm:$0xff]   ;;  %v5101_v20 = vld [vmem:[#allocation5 + $0x52c] ss:$20 sps:$4 sm:$0xff]  }
 0x197   : > { %2558 = vmatprep.subr.bf16.mxu1 %v5020_v21  ;;  %v5104_v21 = vld [vmem:[#allocation5 + $0x3f4] ss:$20 sps:$4 sm:$0xff]  }
 0x199   : > { %2420 = vmatpush1.bf16.msra.mxu0 %v5015_v22  ;;  %v544_v22 = vld [vmem:[%s6269_s22 + $0x28] sm:$0xff] }
 0x19a   : > { %2559 = vmatpush1.bf16.msra.mxu1 %v5018_v23  ;;  %2421 = vmatprep.subr.bf16.mxu0 %v5023_v24  ;;  %v6319_v23 = vpack.c.bf16 %v544_v22, %v544_v22  ;;  %v5099_v24 = vld [vmem:[#allocation5 + $0x528] ss:$20 sps:$4 sm:$0xff]   ;;  %v5183_v22 = vld [vmem:[#allocation5 + $0x758] ss:$20 sps:$4 sm:$0xff]  }
 0x19b   : > { %2560 = vmatprep.subr.bf16.mxu1 %v5026_v25  ;;  %v5102_v25 = vld [vmem:[#allocation5 + $0x3f0] ss:$20 sps:$4 sm:$0xff]  }
 0x19d   : > { %2422 = vmatpush1.bf16.msra.mxu0 %v5021_v26  ;;  %v5107_v26 = vld [vmem:[#allocation5 + $0x554] ss:$20 sps:$4 sm:$0xff]  }
 0x19e   : > { %2561 = vmatpush1.bf16.msra.mxu1 %v5024_v27  ;;  %2423 = vmatprep.subr.bf16.mxu0 %v5029_v28  ;;  %v5110_v27 = vld [vmem:[#allocation5 + $0x41c] ss:$20 sps:$4 sm:$0xff]  }
 0x19f   : > { %2562 = vmatprep.subr.bf16.mxu1 %v5032_v29  ;;  %v5105_v28 = vld [vmem:[#allocation5 + $0x550] ss:$20 sps:$4 sm:$0xff]   ;;  %v5108_v29 = vld [vmem:[#allocation5 + $0x418] ss:$20 sps:$4 sm:$0xff]  }
 0x1a1   : > { %2424 = vmatpush1.bf16.msra.mxu0 %v5027_v30  ;;  %v5113_v30 = vld [vmem:[#allocation5 + $0x57c] ss:$20 sps:$4 sm:$0xff]  }
 0x1a2   : > { %2563 = vmatpush1.bf16.msra.mxu1 %v5030_v31  ;;  %2425 = vmatprep.subr.bf16.mxu0 %v5035_v32  ;;  %v5116_v31 = vld [vmem:[#allocation5 + $0x444] ss:$20 sps:$4 sm:$0xff]  }
 0x1a3   : > { %2564 = vmatprep.subr.bf16.mxu1 %v5038_v33  ;;  %v5111_v32 = vld [vmem:[#allocation5 + $0x578] ss:$20 sps:$4 sm:$0xff]   ;;  %v5114_v33 = vld [vmem:[#allocation5 + $0x440] ss:$20 sps:$4 sm:$0xff]  }
 0x1a5   : > { %2426 = vmatpush1.bf16.msra.mxu0 %v5033_v35  ;;  %v5122_v35 = vld [vmem:[#allocation5 + $0x46c] ss:$20 sps:$4 sm:$0xff]  }
 0x1a6   : > { %2565 = vmatpush1.bf16.msra.mxu1 %v5036_v38  ;;  %2427 = vmatprep.subr.bf16.mxu0 %v5041_v39  ;;  %v5117_v38 = vld [vmem:[#allocation5 + $0x5a0] ss:$20 sps:$4 sm:$0xff]   ;;  %v5120_v39 = vld [vmem:[#allocation5 + $0x468] ss:$20 sps:$4 sm:$0xff]  }
 0x1a7   : > { %2566 = vmatprep.subr.bf16.mxu1 %v5044_v40  ;;  %v5125_v40 = vld [vmem:[#allocation5 + $0x5cc] ss:$20 sps:$4 sm:$0xff]  }
 0x1a9   : > { %2428 = vmatpush1.bf16.msra.mxu0 %v5039_v41  ;;  %v5128_v41 = vld [vmem:[#allocation5 + $0x494] ss:$20 sps:$4 sm:$0xff]  }
 0x1aa   : > { %2567 = vmatpush1.bf16.msra.mxu1 %v5042_v42  ;;  %2429 = vmatprep.subr.bf16.mxu0 %v5047_v43  ;;  %v5123_v42 = vld [vmem:[#allocation5 + $0x5c8] ss:$20 sps:$4 sm:$0xff]   ;;  %v5126_v43 = vld [vmem:[#allocation5 + $0x490] ss:$20 sps:$4 sm:$0xff]  }
 0x1ab   : > { %2577 = vmatprep.subr.bf16.mxu1 %v5050_v44  ;;  %v5131_v44 = vld [vmem:[#allocation5 + $0x5f4] ss:$20 sps:$4 sm:$0xff]  }
 0x1ad   : > { %2569 = vmatmul.mubr.bf16.vlgmr.msra.gmra.mrb[4].mxu1 %v6306_v10  ;;  %2430 = vmatpush1.bf16.msra.mxu0 %v5045_v45  ;;  %v5134_v45 = vld [vmem:[#allocation5 + $0x4bc] ss:$20 sps:$4 sm:$0xff]  }
 0x1ae   : > { %2578 = vmatpush1.bf16.msra.mxu1 %v5048_v46  ;;  %2431 = vmatprep.subr.bf16.mxu0 %v5053_v47  ;;  %v5129_v46 = vld [vmem:[#allocation5 + $0x5f0] ss:$20 sps:$4 sm:$0xff]   ;;  %v5132_v47 = vld [vmem:[#allocation5 + $0x4b8] ss:$20 sps:$4 sm:$0xff]  }
 0x1af   : > { %2579 = vmatprep.subr.bf16.mxu1 %v5056_v48  ;;  %2609 = vmatprep.mubr.bf16.mxu1 %v6310_v37  ;;  %v5137_v48 = vld [vmem:[#allocation5 + $0x61c] ss:$20 sps:$4 sm:$0xff]  }
 0x1b1   : > { %2432 = vmatpush1.bf16.msra.mxu0 %v5051_v49  ;;  %v5140_v49 = vld [vmem:[#allocation5 + $0x4e4] ss:$20 sps:$4 sm:$0xff]  }
 0x1b2   : > { %2580 = vmatpush1.bf16.msra.mxu1 %v5054_v50  ;;  %2433 = vmatprep.subr.bf16.mxu0 %v5059_v51  ;;  %v5135_v50 = vld [vmem:[#allocation5 + $0x618] ss:$20 sps:$4 sm:$0xff]   ;;  %v5138_v51 = vld [vmem:[#allocation5 + $0x4e0] ss:$20 sps:$4 sm:$0xff]  }
 0x1b3   : > { %2581 = vmatprep.subr.bf16.mxu1 %v5062_v53  ;;  %v5143_v53 = vld [vmem:[#allocation5 + $0x644] ss:$20 sps:$4 sm:$0xff]  }
 0x1b5   : > { %2434 = vmatpush1.bf16.msra.mxu0 %v5057_v54  ;;  %v5146_v54 = vld [vmem:[#allocation5 + $0x50c] ss:$20 sps:$4 sm:$0xff]  }
 0x1b6   : > { %2582 = vmatpush1.bf16.msra.mxu1 %v5060_v55  ;;  %2435 = vmatprep.subr.bf16.mxu0 %v5065_v56  ;;  %v5141_v55 = vld [vmem:[#allocation5 + $0x640] ss:$20 sps:$4 sm:$0xff]   ;;  %v5144_v56 = vld [vmem:[#allocation5 + $0x508] ss:$20 sps:$4 sm:$0xff]  }
 0x1b7   : > { %2583 = vmatprep.subr.bf16.mxu1 %v5068_v57  ;;  %v5149_v57 = vld [vmem:[#allocation5 + $0x66c] ss:$20 sps:$4 sm:$0xff]  }
 0x1b9   : > { %2436 = vmatpush1.bf16.msra.mxu0 %v5063_v58  ;;  %v5152_v58 = vld [vmem:[#allocation5 + $0x534] ss:$20 sps:$4 sm:$0xff]  }
 0x1ba   : > { %2584 = vmatpush1.bf16.msra.mxu1 %v5066_v59  ;;  %2437 = vmatprep.subr.bf16.mxu0 %v5071_v60  ;;  %v5147_v59 = vld [vmem:[#allocation5 + $0x668] ss:$20 sps:$4 sm:$0xff]   ;;  %v5150_v60 = vld [vmem:[#allocation5 + $0x530] ss:$20 sps:$4 sm:$0xff]  }
 0x1bb   : > { %2585 = vmatprep.subr.bf16.mxu1 %v5074_v61  ;;  %v5155_v61 = vld [vmem:[#allocation5 + $0x694] ss:$20 sps:$4 sm:$0xff]  }
 0x1bd   : > { %2438 = vmatpush1.bf16.msra.mxu0 %v5069_v62  ;;  %v5158_v62 = vld [vmem:[#allocation5 + $0x55c] ss:$20 sps:$4 sm:$0xff]  }
 0x1be   : > { %2586 = vmatpush1.bf16.msra.mxu1 %v5072_v63  ;;  %2439 = vmatprep.subr.bf16.mxu0 %v5077_v1  ;;  %v5153_v63 = vld [vmem:[#allocation5 + $0x690] ss:$20 sps:$4 sm:$0xff]   ;;  %v5156_v1 = vld [vmem:[#allocation5 + $0x558] ss:$20 sps:$4 sm:$0xff]  }
 0x1bf   : > { %2587 = vmatprep.subr.bf16.mxu1 %v5080_v2  ;;  %v5161_v2 = vld [vmem:[#allocation5 + $0x6bc] ss:$20 sps:$4 sm:$0xff]  }
 0x1c1   : > { %2440 = vmatpush1.bf16.msra.mxu0 %v5075_v3  ;;  %v5164_v3 = vld [vmem:[#allocation5 + $0x584] ss:$20 sps:$4 sm:$0xff]  }
 0x1c2   : > { %2588 = vmatpush1.bf16.msra.mxu1 %v5078_v4  ;;  %2441 = vmatprep.subr.bf16.mxu0 %v5083_v5  ;;  %v5159_v4 = vld [vmem:[#allocation5 + $0x6b8] ss:$20 sps:$4 sm:$0xff]   ;;  %v5162_v5 = vld [vmem:[#allocation5 + $0x580] ss:$20 sps:$4 sm:$0xff]  }
 0x1c3   : > { %2589 = vmatprep.subr.bf16.mxu1 %v5086_v6  ;;  %v5167_v6 = vld [vmem:[#allocation5 + $0x6e4] ss:$20 sps:$4 sm:$0xff]  }
 0x1c5   : > { %2442 = vmatpush1.bf16.msra.mxu0 %v5081_v7  ;;  %v5170_v7 = vld [vmem:[#allocation5 + $0x5ac] ss:$20 sps:$4 sm:$0xff]  }
 0x1c6   : > { %2590 = vmatpush1.bf16.msra.mxu1 %v5084_v8  ;;  %2443 = vmatprep.subr.bf16.mxu0 %v5089_v9  ;;  %v5165_v8 = vld [vmem:[#allocation5 + $0x6e0] ss:$20 sps:$4 sm:$0xff]   ;;  %v5168_v9 = vld [vmem:[#allocation5 + $0x5a8] ss:$20 sps:$4 sm:$0xff]  }
 0x1c7   : > { %2591 = vmatprep.subr.bf16.mxu1 %v5092_v11  ;;  %v5173_v11 = vld [vmem:[#allocation5 + $0x70c] ss:$20 sps:$4 sm:$0xff]  }
 0x1c9   : > { %2444 = vmatpush1.bf16.msra.mxu0 %v5087_v12  ;;  %v5176_v12 = vld [vmem:[#allocation5 + $0x5d4] ss:$20 sps:$4 sm:$0xff]  }
 0x1ca   : > { %2592 = vmatpush1.bf16.msra.mxu1 %v5090_v13  ;;  %2454 = vmatprep.subr.bf16.mxu0 %v5095_v15  ;;  %v5171_v13 = vld [vmem:[#allocation5 + $0x708] ss:$20 sps:$4 sm:$0xff]  }
 0x1cb   : > { %2593 = vmatprep.subr.bf16.mxu1 %v5098_v16  ;;  %v5179_v15 = vld [vmem:[#allocation5 + $0x734] ss:$20 sps:$4 sm:$0xff]   ;;  %v5182_v16 = vld [vmem:[#allocation5 + $0x5fc] ss:$20 sps:$4 sm:$0xff]  }
 0x1cc   : > { %2446 = vmatmul.mubr.bf16.vlgmr.msra.gmra.mrb[0].mxu0 %v6316_v18 }
 0x1cd   : > { %2455 = vmatpush1.bf16.msra.mxu0 %v5093_v17  ;;  %2486 = vmatprep.mubr.bf16.mxu0 %v6319_v23  ;;  %v5177_v17 = vld [vmem:[#allocation5 + $0x730] ss:$20 sps:$4 sm:$0xff]  }
 0x1ce   : > { %2594 = vmatpush1.bf16.msra.mxu1 %v5096_v19  ;;  %2456 = vmatprep.subr.bf16.mxu0 %v5101_v20  ;;  %v5180_v19 = vld [vmem:[#allocation5 + $0x5f8] ss:$20 sps:$4 sm:$0xff]   ;;  %v5185_v20 = vld [vmem:[#allocation5 + $0x75c] ss:$20 sps:$4 sm:$0xff]  }
 0x1cf   : > { %2595 = vmatprep.subr.bf16.mxu1 %v5104_v21  ;;  %v5188_v21 = vld [vmem:[#allocation5 + $0x624] ss:$20 sps:$4 sm:$0xff]  }
 0x1d1   : > { %2457 = vmatpush1.bf16.msra.mxu0 %v5099_v24  ;;  %v5186_v24 = vld [vmem:[#allocation5 + $0x620] ss:$20 sps:$4 sm:$0xff]  }
 0x1d2   : > { %2596 = vmatpush1.bf16.msra.mxu1 %v5102_v25  ;;  %2458 = vmatprep.subr.bf16.mxu0 %v5107_v26  ;;  %v543_v25 = vld [vmem:[%s6269_s22 + $0x20] sm:$0xff] }
 0x1d3   : > { %2597 = vmatprep.subr.bf16.mxu1 %v5110_v27  ;;  %v5191_v26 = vld [vmem:[#allocation5 + $0x64c] ss:$20 sps:$4 sm:$0xff]   ;;  %v5216_v27 = vld [vmem:[#allocation5 + $0x150] ss:$20 sps:$4 sm:$0xff]  }
 0x1d5   : > { %2459 = vmatpush1.bf16.msra.mxu0 %v5105_v28  ;;  %v5189_v28 = vld [vmem:[#allocation5 + $0x648] ss:$20 sps:$4 sm:$0xff]  }
 0x1d6   : > { %2598 = vmatpush1.bf16.msra.mxu1 %v5108_v29  ;;  %2460 = vmatprep.subr.bf16.mxu0 %v5113_v30  ;;  %v6326_v29 = vpack.c.bf16 %v543_v25, %v543_v25  ;;  %v5194_v30 = vld [vmem:[#allocation5 + $0x674] ss:$20 sps:$4 sm:$0xff]  }
 0x1d7   : > { %2599 = vmatprep.subr.bf16.mxu1 %v5116_v31  ;;  %v5217_v31 = vld [vmem:[#allocation5 + $0x10] ss:$20 sps:$4 sm:$0xff]  }
 0x1d9   : > { %2461 = vmatpush1.bf16.msra.mxu0 %v5111_v32  ;;  %v5221_v32 = vld [vmem:[#allocation5 + $0x178] ss:$20 sps:$4 sm:$0xff]  }
 0x1da   : > { %2600 = vmatpush1.bf16.msra.mxu1 %v5114_v33  ;;  %2462 = vmatprep.subr.bf16.mxu0 %v5119_v34  ;;  %v5192_v33 = vld [vmem:[#allocation5 + $0x670] ss:$20 sps:$4 sm:$0xff]  }
 0x1db   : > { %2601 = vmatprep.subr.bf16.mxu1 %v5122_v35  ;;  %v5197_v34 = vld [vmem:[#allocation5 + $0x69c] ss:$20 sps:$4 sm:$0xff]   ;;  %v5222_v35 = vld [vmem:[#allocation5 + $0x38] ss:$20 sps:$4 sm:$0xff]  }
 0x1dd   : > { %2463 = vmatpush1.bf16.msra.mxu0 %v5117_v38  ;;  %v5226_v38 = vld [vmem:[#allocation5 + $0x1a0] ss:$20 sps:$4 sm:$0xff]  }
 0x1de   : > { %2602 = vmatpush1.bf16.msra.mxu1 %v5120_v39  ;;  %2464 = vmatprep.subr.bf16.mxu0 %v5125_v40  ;;  %v5195_v39 = vld [vmem:[#allocation5 + $0x698] ss:$20 sps:$4 sm:$0xff]  }
 0x1df   : > { %2603 = vmatprep.subr.bf16.mxu1 %v5128_v41  ;;  %v5200_v40 = vld [vmem:[#allocation5 + $0x6c4] ss:$20 sps:$4 sm:$0xff]   ;;  %v5227_v41 = vld [vmem:[#allocation5 + $0x60] ss:$20 sps:$4 sm:$0xff]  }
 0x1e1   : > { %2465 = vmatpush1.bf16.msra.mxu0 %v5123_v42  ;;  %v5231_v42 = vld [vmem:[#allocation5 + $0x1c8] ss:$20 sps:$4 sm:$0xff]  }
 0x1e2   : > { %2604 = vmatpush1.bf16.msra.mxu1 %v5126_v43  ;;  %2466 = vmatprep.subr.bf16.mxu0 %v5131_v44  ;;  %v5198_v43 = vld [vmem:[#allocation5 + $0x6c0] ss:$20 sps:$4 sm:$0xff]  }
 0x1e3   : > { %2605 = vmatprep.subr.bf16.mxu1 %v5134_v45  ;;  %v5203_v44 = vld [vmem:[#allocation5 + $0x6ec] ss:$20 sps:$4 sm:$0xff]   ;;  %v5232_v45 = vld [vmem:[#allocation5 + $0x88] ss:$20 sps:$4 sm:$0xff]  }
 0x1e5   : > { %2467 = vmatpush1.bf16.msra.mxu0 %v5129_v46  ;;  %v5236_v46 = vld [vmem:[#allocation5 + $0x1f0] ss:$20 sps:$4 sm:$0xff]  }
 0x1e6   : > { %2606 = vmatpush1.bf16.msra.mxu1 %v5132_v47  ;;  %2468 = vmatprep.subr.bf16.mxu0 %v5137_v48  ;;  %v5201_v47 = vld [vmem:[#allocation5 + $0x6e8] ss:$20 sps:$4 sm:$0xff]  }
 0x1e7   : > { %2607 = vmatprep.subr.bf16.mxu1 %v5140_v49  ;;  %v5206_v48 = vld [vmem:[#allocation5 + $0x714] ss:$20 sps:$4 sm:$0xff]   ;;  %v5241_v49 = vld [vmem:[#allocation5 + $0x218] ss:$20 sps:$4 sm:$0xff]  }
 0x1e9   : > { %2469 = vmatpush1.bf16.msra.mxu0 %v5135_v50  ;;  %v5204_v50 = vld [vmem:[#allocation5 + $0x710] ss:$20 sps:$4 sm:$0xff]  }
 0x1ea   : > { %2608 = vmatpush1.bf16.msra.mxu1 %v5138_v51  ;;  %2470 = vmatprep.subr.bf16.mxu0 %v5143_v53  ;;  %v5209_v51 = vld [vmem:[#allocation5 + $0x73c] ss:$20 sps:$4 sm:$0xff]   ;;  %v5242_v53 = vld [vmem:[#allocation5 + $0xd8] ss:$20 sps:$4 sm:$0xff]  }
 0x1eb   : > { %2618 = vmatprep.subr.bf16.mxu1 %v5146_v54  ;;  %v5246_v54 = vld [vmem:[#allocation5 + $0x240] ss:$20 sps:$4 sm:$0xff]  }
 0x1ed   : > { %2610 = vmatmul.mubr.bf16.vlgmr.msra.gmra.mrb[4].mxu1 %v6316_v18  ;;  %2471 = vmatpush1.bf16.msra.mxu0 %v5141_v55  ;;  %v5207_v55 = vld [vmem:[#allocation5 + $0x738] ss:$20 sps:$4 sm:$0xff]  }
 0x1ee   : > { %2619 = vmatpush1.bf16.msra.mxu1 %v5144_v56  ;;  %2472 = vmatprep.subr.bf16.mxu0 %v5149_v57  ;;  %v5212_v56 = vld [vmem:[#allocation5 + $0x764] ss:$20 sps:$4 sm:$0xff]   ;;  %v5247_v57 = vld [vmem:[#allocation5 + $0x100] ss:$20 sps:$4 sm:$0xff]  }
 0x1ef   : > { %2620 = vmatprep.subr.bf16.mxu1 %v5152_v58  ;;  %2650 = vmatprep.mubr.bf16.mxu1 %v6319_v23  ;;  %v5251_v58 = vld [vmem:[#allocation5 + $0x268] ss:$20 sps:$4 sm:$0xff]  }
 0x1f1   : > { %2473 = vmatpush1.bf16.msra.mxu0 %v5147_v59  ;;  %v5210_v59 = vld [vmem:[#allocation5 + $0x760] ss:$20 sps:$4 sm:$0xff]  }
 0x1f2   : > { %2621 = vmatpush1.bf16.msra.mxu1 %v5150_v60  ;;  %2474 = vmatprep.subr.bf16.mxu0 %v5155_v61  ;;  %v5215_v60 = vld [vmem:[#allocation5 + $0x78c] ss:$20 sps:$4 sm:$0xff]   ;;  %v5252_v61 = vld [vmem:[#allocation5 + $0x128] ss:$20 sps:$4 sm:$0xff]  }
 0x1f3   : > { %2622 = vmatprep.subr.bf16.mxu1 %v5158_v62  ;;  %v5255_v62 = vld [vmem:[#allocation5 + $0x650] ss:$20 sps:$4 sm:$0xff]  }
 0x1f5   : > { %2475 = vmatpush1.bf16.msra.mxu0 %v5153_v63  ;;  %v5213_v63 = vld [vmem:[#allocation5 + $0x788] ss:$20 sps:$4 sm:$0xff]  }
 0x1f6   : > { %2623 = vmatpush1.bf16.msra.mxu1 %v5156_v1  ;;  %2476 = vmatprep.subr.bf16.mxu0 %v5161_v2  ;;  %v5220_v1 = vld [vmem:[#allocation5 + $0x7b4] ss:$20 sps:$4 sm:$0xff]   ;;  %v5256_v2 = vld [vmem:[#allocation5 + $0x510] ss:$20 sps:$4 sm:$0xff]  }
 0x1f7   : > { %2624 = vmatprep.subr.bf16.mxu1 %v5164_v3  ;;  %v5259_v3 = vld [vmem:[#allocation5 + $0x678] ss:$20 sps:$4 sm:$0xff]  }
 0x1f9   : > { %2477 = vmatpush1.bf16.msra.mxu0 %v5159_v4  ;;  %v5218_v4 = vld [vmem:[#allocation5 + $0x7b0] ss:$20 sps:$4 sm:$0xff]  }
 0x1fa   : > { %2625 = vmatpush1.bf16.msra.mxu1 %v5162_v5  ;;  %2478 = vmatprep.subr.bf16.mxu0 %v5167_v6  ;;  %v5225_v5 = vld [vmem:[#allocation5 + $0x7dc] ss:$20 sps:$4 sm:$0xff]   ;;  %v5260_v6 = vld [vmem:[#allocation5 + $0x538] ss:$20 sps:$4 sm:$0xff]  }
 0x1fb   : > { %2626 = vmatprep.subr.bf16.mxu1 %v5170_v7  ;;  %v5263_v7 = vld [vmem:[#allocation5 + $0x6a0] ss:$20 sps:$4 sm:$0xff]  }
 0x1fd   : > { %2479 = vmatpush1.bf16.msra.mxu0 %v5165_v8  ;;  %v5223_v8 = vld [vmem:[#allocation5 + $0x7d8] ss:$20 sps:$4 sm:$0xff]  }
 0x1fe   : > { %2627 = vmatpush1.bf16.msra.mxu1 %v5168_v9  ;;  %2480 = vmatprep.subr.bf16.mxu0 %v5173_v11  ;;  %v5230_v9 = vld [vmem:[#allocation5 + $0x804] ss:$20 sps:$4 sm:$0xff]   ;;  %v5264_v11 = vld [vmem:[#allocation5 + $0x560] ss:$20 sps:$4 sm:$0xff]  }
 0x1ff   : > { %2628 = vmatprep.subr.bf16.mxu1 %v5176_v12  ;;  %v5267_v12 = vld [vmem:[#allocation5 + $0x6c8] ss:$20 sps:$4 sm:$0xff]  }
 0x201   : > { %2481 = vmatpush1.bf16.msra.mxu0 %v5171_v13  ;;  %v5228_v13 = vld [vmem:[#allocation5 + $0x800] ss:$20 sps:$4 sm:$0xff]  }
 0x202   : > { %2629 = vmatpush1.bf16.msra.mxu1 %v5174_v14  ;;  %2482 = vmatprep.subr.bf16.mxu0 %v5179_v15  ;;  %v5268_v14 = vld [vmem:[#allocation5 + $0x588] ss:$20 sps:$4 sm:$0xff]   ;;  %v5271_v15 = vld [vmem:[#allocation5 + $0x6f0] ss:$20 sps:$4 sm:$0xff]  }
 0x203   : > { %2630 = vmatprep.subr.bf16.mxu1 %v5182_v16  ;;  %v5233_v16 = vld [vmem:[#allocation5 + $0x828] ss:$20 sps:$4 sm:$0xff]  }
 0x205   : > { %2483 = vmatpush1.bf16.msra.mxu0 %v5177_v17  ;;  %v5240_v17 = vld [vmem:[#allocation5 + $0x854] ss:$20 sps:$4 sm:$0xff]  }
 0x206   : > { %2631 = vmatpush1.bf16.msra.mxu1 %v5180_v19  ;;  %2484 = vmatprep.subr.bf16.mxu0 %v5185_v20  ;;  %v5272_v19 = vld [vmem:[#allocation5 + $0x5b0] ss:$20 sps:$4 sm:$0xff]  }
 0x207   : > { %2632 = vmatprep.subr.bf16.mxu1 %v5188_v21  ;;  %v5238_v20 = vld [vmem:[#allocation5 + $0x850] ss:$20 sps:$4 sm:$0xff]  }
 0x208   : > { %v5245_v21 = vld [vmem:[#allocation5 + $0x87c] ss:$20 sps:$4 sm:$0xff]  }
 0x209   : > { %2485 = vmatpush1.bf16.msra.mxu0 %v5183_v22  ;;  %v5276_v22 = vld [vmem:[#allocation5 + $0x5d8] ss:$20 sps:$4 sm:$0xff]  }
 0x20a   : > { %2633 = vmatpush1.bf16.msra.mxu1 %v5186_v24  ;;  %4531 = vmatprep.subr.bf16.mxu0 %v5216_v27  ;;  %v5279_v24 = vld [vmem:[#allocation5 + $0x740] ss:$20 sps:$4 sm:$0xff]  }
 0x20b   : > { %2634 = vmatprep.subr.bf16.mxu1 %v5191_v26  ;;  %v5243_v26 = vld [vmem:[#allocation5 + $0x878] ss:$20 sps:$4 sm:$0xff]  }
 0x20c   : > { %2487 = vmatmul.mubr.bf16.vlgmr.msra.gmra.mrb[0].mxu0 %v6326_v29 }
 0x20d   : > { %4532 = vmatpush3.bf16.msra.mxu0 %v5217_v31  ;;  %2732 = vmatprep.mubr.bf16.mxu0 %v6301_v52  ;;  %v5237_v52 = vld [vmem:[#allocation5 + $0xb0] ss:$20 sps:$4 sm:$0xff]  }
 0x20e   : > { %2635 = vmatpush1.bf16.msra.mxu1 %v5189_v28  ;;  %4533 = vmatprep.subr.bf16.mxu0 %v5221_v32  ;;  %v5250_v28 = vld [vmem:[#allocation5 + $0x8a4] ss:$20 sps:$4 sm:$0xff]   ;;  %v5283_v32 = vld [vmem:[#allocation5 + $0x768] ss:$20 sps:$4 sm:$0xff]  }
 0x20f   : > { %2636 = vmatprep.subr.bf16.mxu1 %v5194_v30  ;;  %v5280_v30 = vld [vmem:[#allocation5 + $0x600] ss:$20 sps:$4 sm:$0xff]  }
 0x211   : > { %4534 = vmatpush3.bf16.msra.mxu0 %v5222_v35  ;;  %v5253_v35 = vld [vmem:[#allocation5 + $0x3d0] ss:$20 sps:$4 sm:$0xff]  }
 0x212   : > { %2637 = vmatpush1.bf16.msra.mxu1 %v5192_v33  ;;  %4535 = vmatprep.subr.bf16.mxu0 %v5226_v38  ;;  %v5284_v38 = vld [vmem:[#allocation5 + $0x628] ss:$20 sps:$4 sm:$0xff]  }
 0x213   : > { %2638 = vmatprep.subr.bf16.mxu1 %v5197_v34  ;;  %v5248_v34 = vld [vmem:[#allocation5 + $0x8a0] ss:$20 sps:$4 sm:$0xff]  }
 0x215   : > { %4536 = vmatpush3.bf16.msra.mxu0 %v5227_v41  ;;  %v5257_v41 = vld [vmem:[#allocation5 + $0x3f8] ss:$20 sps:$4 sm:$0xff]  }
 0x216   : > { %2639 = vmatpush1.bf16.msra.mxu1 %v5195_v39  ;;  %4537 = vmatprep.subr.bf16.mxu0 %v5231_v42  ;;  %v5295_v39 = vld [vmem:[#allocation8 + $0x4] ss:$8 sps:$4 sm:$0xff]   ;;  %v5293_v42 = vld [vmem:[#allocation8] ss:$8 sps:$4 sm:$0xff]  }
 0x217   : > { %2640 = vmatprep.subr.bf16.mxu1 %v5200_v40  ;;  %v5254_v40 = vld [vmem:[#allocation5 + $0x290] ss:$20 sps:$4 sm:$0xff]  }
 0x219   : > { %4538 = vmatpush3.bf16.msra.mxu0 %v5232_v45  ;;  %v5261_v45 = vld [vmem:[#allocation5 + $0x420] ss:$20 sps:$4 sm:$0xff]  }
 0x21a   : > { %2641 = vmatpush1.bf16.msra.mxu1 %v5198_v43  ;;  %4539 = vmatprep.subr.bf16.mxu0 %v5236_v46  ;;  %v5298_v43 = vld [vmem:[#allocation8 + $0x14] ss:$8 sps:$4 sm:$0xff]   ;;  %v5296_v46 = vld [vmem:[#allocation8 + $0x10] ss:$8 sps:$4 sm:$0xff]  }
 0x21b   : > { %2642 = vmatprep.subr.bf16.mxu1 %v5203_v44  ;;  %v5258_v44 = vld [vmem:[#allocation5 + $0x2b8] ss:$20 sps:$4 sm:$0xff]  }
 0x21d   : > { %4540 = vmatpush3.bf16.msra.mxu0 %v5237_v52  ;;  %v5265_v52 = vld [vmem:[#allocation5 + $0x448] ss:$20 sps:$4 sm:$0xff]  }
 0x21e   : > { %2643 = vmatpush1.bf16.msra.mxu1 %v5201_v47  ;;  %4541 = vmatprep.subr.bf16.mxu0 %v5241_v49  ;;  %v5301_v47 = vld [vmem:[#allocation8 + $0x24] ss:$8 sps:$4 sm:$0xff]   ;;  %v5299_v49 = vld [vmem:[#allocation8 + $0x20] ss:$8 sps:$4 sm:$0xff]  }
 0x21f   : > { %2644 = vmatprep.subr.bf16.mxu1 %v5206_v48  ;;  %v5262_v48 = vld [vmem:[#allocation5 + $0x2e0] ss:$20 sps:$4 sm:$0xff]  }
 0x221   : > { %4542 = vmatpush3.bf16.msra.mxu0 %v5242_v53  ;;  %v5269_v53 = vld [vmem:[#allocation5 + $0x470] ss:$20 sps:$4 sm:$0xff]  }
 0x222   : > { %2645 = vmatpush1.bf16.msra.mxu1 %v5204_v50  ;;  %4543 = vmatprep.subr.bf16.mxu0 %v5246_v54  ;;  %v5304_v50 = vld [vmem:[#allocation8 + $0x34] ss:$8 sps:$4 sm:$0xff]   ;;  %v5307_v54 = vld [vmem:[#allocation8 + $0x44] ss:$8 sps:$4 sm:$0xff]  }
 0x223   : > { %2646 = vmatprep.subr.bf16.mxu1 %v5209_v51  ;;  %v5266_v51 = vld [vmem:[#allocation5 + $0x308] ss:$20 sps:$4 sm:$0xff]  }
 0x225   : > { %4544 = vmatpush3.bf16.msra.mxu0 %v5247_v57  ;;  %v5310_v57 = vld [vmem:[#allocation8 + $0x54] ss:$8 sps:$4 sm:$0xff]  }
 0x226   : > { %2647 = vmatpush1.bf16.msra.mxu1 %v5207_v55  ;;  %4545 = vmatprep.subr.bf16.mxu0 %v5251_v58  ;;  %v5273_v55 = vld [vmem:[#allocation5 + $0x498] ss:$20 sps:$4 sm:$0xff]  }
 0x227   : > { %2648 = vmatprep.subr.bf16.mxu1 %v5212_v56  ;;  %v5305_v56 = vld [vmem:[#allocation8 + $0x40] ss:$8 sps:$4 sm:$0xff]  }
 0x228   : > { %v5274_v58 = vld [vmem:[#allocation5 + $0x358] ss:$20 sps:$4 sm:$0xff]  }
 0x229   : > { %4546 = vmatpush3.bf16.msra.mxu0 %v5252_v61  ;;  %v5313_v61 = vld [vmem:[#allocation8 + $0x64] ss:$8 sps:$4 sm:$0xff]  }
 0x22a   : > { %2649 = vmatpush1.bf16.msra.mxu1 %v5210_v59  ;;  %4575 = vmatprep.subr.bf16.mxu0 %v5255_v62  ;;  %v5277_v59 = vld [vmem:[#allocation5 + $0x4c0] ss:$20 sps:$4 sm:$0xff]  }
 0x22b   : > { %2659 = vmatprep.subr.bf16.mxu1 %v5215_v60  ;;  %v5308_v60 = vld [vmem:[#allocation8 + $0x50] ss:$8 sps:$4 sm:$0xff]  }
 0x22c   : > { %2733 = vmatmul.mubr.bf16.vlgmr.msra.gmra.mrb[4].mxu0 %v6306_v10  ;;  %v5235_v10 = vld [vmem:[#allocation5 + $0x82c] ss:$20 sps:$4 sm:$0xff]  }
 0x22d   : > { %2651 = vmatmul.mubr.bf16.vlgmr.msra.gmra.mrb[4].mxu1 %v6326_v29  ;;  %4576 = vmatpush3.bf16.msra.mxu0 %v5256_v2  ;;  %v5278_v62 = vld [vmem:[#allocation5 + $0x380] ss:$20 sps:$4 sm:$0xff]  }
 0x22e   : > { %2660 = vmatpush1.bf16.msra.mxu1 %v5213_v63  ;;  %2691 = vmatprep.mubr.bf16.mxu1 %v5878_v0  ;;  %v5281_v63 = vld [vmem:[#allocation5 + $0x4e8] ss:$20 sps:$4 sm:$0xff]  }
 0x22f   : > { %2661 = vmatprep.subr.bf16.mxu1 %v5220_v1  ;;  %4577 = vmatprep.subr.bf16.mxu0 %v5259_v3  ;;  %v5311_v1 = vld [vmem:[#allocation8 + $0x60] ss:$8 sps:$4 sm:$0xff]   ;;  %v5316_v2 = vld [vmem:[#allocation8 + $0x74] ss:$8 sps:$4 sm:$0xff]  }
 0x230   : > { %2812 = vmatprep.mubr.bf16.mxu0 %v6319_v23  ;;  %v5275_v23 = vld [vmem:[#allocation5 + $0x718] ss:$20 sps:$4 sm:$0xff]   ;;  %v5282_v3 = vld [vmem:[#allocation5 + $0x3a8] ss:$20 sps:$4 sm:$0xff]  }
 0x231   : > { %4578 = vmatpush3.bf16.msra.mxu0 %v5260_v6  ;;  %v5285_v6 = vld [vmem:[#allocation5 + $0x790] ss:$20 sps:$4 sm:$0xff]  }
 0x232   : > { %2662 = vmatpush1.bf16.msra.mxu1 %v5218_v4  ;;  %4579 = vmatprep.subr.bf16.mxu0 %v5263_v7  ;;  %v5314_v4 = vld [vmem:[#allocation8 + $0x70] ss:$8 sps:$4 sm:$0xff]   ;;  %v5879_v7 = vmov 0.0  }
 0x233   : > { %2663 = vmatprep.subr.bf16.mxu1 %v5225_v5  ;;  %v5319_v5 = vld [vmem:[#allocation8 + $0x84] ss:$8 sps:$4 sm:$0xff]  }
 0x235   : > { %4580 = vmatpush3.bf16.msra.mxu0 %v5264_v11  ;;  %v5286_v11 = vld [vmem:[#allocation5 + $0x7b8] ss:$20 sps:$4 sm:$0xff]  }
 0x236   : > { %2664 = vmatpush1.bf16.msra.mxu1 %v5223_v8  ;;  %4581 = vmatprep.subr.bf16.mxu0 %v5267_v12  ;;  %v5317_v8 = vld [vmem:[#allocation8 + $0x80] ss:$8 sps:$4 sm:$0xff]   ;;  %v5320_v12 = vld [vmem:[#allocation8 + $0x90] ss:$8 sps:$4 sm:$0xff]  }
 0x237   : > { %2665 = vmatprep.subr.bf16.mxu1 %v5230_v9  ;;  %v5322_v9 = vld [vmem:[#allocation8 + $0x94] ss:$8 sps:$4 sm:$0xff]  }
 0x239   : > { %4582 = vmatpush3.bf16.msra.mxu0 %v5268_v14  ;;  %v5328_v14 = vld [vmem:[#allocation8 + $0xb4] ss:$8 sps:$4 sm:$0xff]  }
 0x23a   : > { %2666 = vmatpush1.bf16.msra.mxu1 %v5228_v13  ;;  %4583 = vmatprep.subr.bf16.mxu0 %v5271_v15  ;;  %v5325_v13 = vld [vmem:[#allocation8 + $0xa4] ss:$8 sps:$4 sm:$0xff]  }
 0x23b   : > { %2667 = vmatprep.subr.bf16.mxu1 %v5235_v10  ;;  %v5287_v10 = vld [vmem:[#allocation5 + $0x7e0] ss:$20 sps:$4 sm:$0xff]   ;;  %v5288_v15 = vld [vmem:[#allocation5 + $0x808] ss:$20 sps:$4 sm:$0xff]  }
 0x23d   : > { %4584 = vmatpush3.bf16.msra.mxu0 %v5272_v19  ;;  %v5289_v19 = vld [vmem:[#allocation5 + $0x830] ss:$20 sps:$4 sm:$0xff]  }
 0x23e   : > { %2668 = vmatpush1.bf16.msra.mxu1 %v5233_v16  ;;  %4585 = vmatprep.subr.bf16.mxu0 %v5275_v23  ;;  %v5326_v16 = vld [vmem:[#allocation8 + $0xb0] ss:$8 sps:$4 sm:$0xff]   ;;  %v5329_v23 = vld [vmem:[#allocation8 + $0xc0] ss:$8 sps:$4 sm:$0xff]  }
 0x23f   : > { %2669 = vmatprep.subr.bf16.mxu1 %v5240_v17  ;;  %v5331_v17 = vld [vmem:[#allocation8 + $0xc4] ss:$8 sps:$4 sm:$0xff]  }
 0x240   : > { %v6334_v25 = vpop.f32.mrb[0].mxu1 }
 0x241   : > { %v6336_v27 = vpop.f32.mrb[1].mxu1  ;;  %4586 = vmatpush3.bf16.msra.mxu0 %v5276_v22  ;;  %v5332_v22 = vld [vmem:[#allocation8 + $0xd0] ss:$8 sps:$4 sm:$0xff]  }
 0x242   : > { %v2533_v31 = vpop.f32.mrb[2].mxu1  ;;  %2670 = vmatpush1.bf16.msra.mxu1 %v5238_v20  ;;  %4587 = vmatprep.subr.bf16.mxu0 %v5279_v24  ;;  %v5334_v20 = vld [vmem:[#allocation8 + $0xd4] ss:$8 sps:$4 sm:$0xff]   ;;  %v5337_v24 = vld [vmem:[#allocation8 + $0xe4] ss:$8 sps:$4 sm:$0xff]  }
 0x243   : > { %v2534_v33 = vpop.f32.mrb[3].mxu1  ;;  %2671 = vmatprep.subr.bf16.mxu1 %v5245_v21  ;;  %v5290_v21 = vld [vmem:[#allocation5 + $0x858] ss:$20 sps:$4 sm:$0xff]   ;;  %v5292_v31 = vld [vmem:[#allocation5 + $0x8a8] ss:$20 sps:$4 sm:$0xff]  }
 0x244   : > { %v5343_v33 = vld [vmem:[#allocation8 + $0x104] ss:$8 sps:$4 sm:$0xff]  }
 0x245   : > { %4588 = vmatpush3.bf16.msra.mxu0 %v5280_v30  ;;  %v5340_v30 = vld [vmem:[#allocation8 + $0xf4] ss:$8 sps:$4 sm:$0xff]  }
 0x246   : > { %2672 = vmatpush1.bf16.msra.mxu1 %v5243_v26  ;;  %4589 = vmatprep.subr.bf16.mxu0 %v5283_v32  ;;  %v5291_v26 = vld [vmem:[#allocation5 + $0x880] ss:$20 sps:$4 sm:$0xff]  }
 0x247   : > { %2673 = vmatprep.subr.bf16.mxu1 %v5250_v28  ;;  %v5335_v28 = vld [vmem:[#allocation8 + $0xe0] ss:$8 sps:$4 sm:$0xff]   ;;  %v5338_v32 = vld [vmem:[#allocation8 + $0xf0] ss:$8 sps:$4 sm:$0xff]  }
 0x249   : > { %4590 = vmatpush3.bf16.msra.mxu0 %v5284_v38 }
 0x24a   : > { %2674 = vmatpush1.bf16.msra.mxu1 %v5248_v34  ;;  %3382 = vmatprep.subr.bf16.mxu0 %v5295_v39  ;;  %v891_v34 = vlaneseq  ;;  %v6356_v39 = vld [vmem:[#allocation7] sm:$0x1f] }
 0x24b   : > { %4553 = vmatprep.subr.bf16.mxu1 %v5253_v35 }
 0x24c   : > { %2813 = vmatmul.mubr.bf16.vlgmr.msra.gmra.mrb[8].mxu0 %v6326_v29  ;;  %v5270_v29 = vld [vmem:[#allocation5 + $0x330] ss:$20 sps:$4 sm:$0xff]   ;;  %v6353_v35 = vshrl.u32 %v891_v34, 7 }
 0x24d   : > { %2692 = vmatmul.mubr.bf16.vlgmr.msra.gmra.mrb[4].mxu1 %v6297_v36  ;;  %3383 = vmatpush1.bf16.msra.mxu0 %v5293_v42  ;;  %v5376_v34 = vld [vmem:[#allocation8 + $0x1b4] ss:$8 sps:$4 sm:$0xff]  }
 0x24e   : > { %4554 = vmatpush3.bf16.msra.mxu1 %v5254_v40  ;;  %2772 = vmatprep.mubr.bf16.mxu1 %v6310_v37  ;;  %v5302_v37 = vld [vmem:[#allocation8 + $0x30] ss:$8 sps:$4 sm:$0xff]   ;;  %v893_v38 = vsub.s32 0, %v6353_v35  ;;  %v897_v40 = vsub.s32 1, %v6353_v35 }
 0x24f   : > { %4555 = vmatprep.subr.bf16.mxu1 %v5257_v41  ;;  %3384 = vmatprep.subr.bf16.mxu0 %v5298_v43 }
 0x250   : > { %v894_v41 = vrot.slane %v6356_v39, %v893_v38  ;;  %v898_v42 = vrot.slane %v6356_v39, %v897_v40 }
 0x251   : > { %3385 = vmatpush1.bf16.msra.mxu0 %v5296_v46 }
 0x252   : > { %4556 = vmatpush3.bf16.msra.mxu1 %v5258_v44  ;;  %3386 = vmatprep.subr.bf16.mxu0 %v5301_v47 }
 0x253   : > { %4557 = vmatprep.subr.bf16.mxu1 %v5261_v45 }
 0x255   : > { %3387 = vmatpush1.bf16.msra.mxu0 %v5299_v49 }
 0x256   : > { %4558 = vmatpush3.bf16.msra.mxu1 %v5262_v48  ;;  %3388 = vmatprep.subr.bf16.mxu0 %v5304_v50 }
 0x257   : > { %4559 = vmatprep.subr.bf16.mxu1 %v5265_v52 }
 0x259   : > { %3389 = vmatpush1.bf16.msra.mxu0 %v5302_v37 }
 0x25a   : > { %4560 = vmatpush3.bf16.msra.mxu1 %v5266_v51  ;;  %3390 = vmatprep.subr.bf16.mxu0 %v5307_v54 }
 0x25b   : > { %4561 = vmatprep.subr.bf16.mxu1 %v5269_v53 }
 0x25d   : > { %3391 = vmatpush1.bf16.msra.mxu0 %v5305_v56 }
 0x25e   : > { %4562 = vmatpush3.bf16.msra.mxu1 %v5270_v29  ;;  %3392 = vmatprep.subr.bf16.mxu0 %v5310_v57 }
 0x25f   : > { %4563 = vmatprep.subr.bf16.mxu1 %v5273_v55 }
 0x261   : > { %3393 = vmatpush1.bf16.msra.mxu0 %v5308_v60  ;;  %v5415_v60 = vld [vmem:[#allocation11 + $0x48] sm:$0xff]  }
 0x262   : > { %4564 = vmatpush3.bf16.msra.mxu1 %v5274_v58  ;;  %3394 = vmatprep.subr.bf16.mxu0 %v5313_v61  ;;  %v5413_v58 = vld [vmem:[#allocation11 + $0x40] sm:$0xff]  }
 0x263   : > { %4565 = vmatprep.subr.bf16.mxu1 %v5277_v59  ;;  %v5414_v59 = vld [vmem:[#allocation11] sm:$0xff]  }
 0x265   : > { %3395 = vmatpush1.bf16.msra.mxu0 %v5311_v1  ;;  %v5344_v1 = vld [vmem:[#allocation8 + $0x110] ss:$8 sps:$4 sm:$0xff]  }
 0x266   : > { %4566 = vmatpush3.bf16.msra.mxu1 %v5278_v62  ;;  %3396 = vmatprep.subr.bf16.mxu0 %v5316_v2  ;;  %v5349_v2 = vld [vmem:[#allocation8 + $0x124] ss:$8 sps:$4 sm:$0xff]  }
 0x267   : > { %4567 = vmatprep.subr.bf16.mxu1 %v5281_v63  ;;  %v5346_v63 = vld [vmem:[#allocation8 + $0x114] ss:$8 sps:$4 sm:$0xff]  }
 0x269   : > { %3397 = vmatpush1.bf16.msra.mxu0 %v5314_v4  ;;  %v5352_v4 = vld [vmem:[#allocation8 + $0x134] ss:$8 sps:$4 sm:$0xff]  }
 0x26a   : > { %4568 = vmatpush3.bf16.msra.mxu1 %v5282_v3  ;;  %3398 = vmatprep.subr.bf16.mxu0 %v5319_v5  ;;  %v5347_v3 = vld [vmem:[#allocation8 + $0x120] ss:$8 sps:$4 sm:$0xff]  }
 0x26b   : > { %4646 = vmatprep.subr.bf16.mxu1 %v5879_v7 }
 0x26d   : > { %2773 = vmatmul.mubr.bf16.vlgmr.msra.gmra.mrb[8].mxu1 %v6316_v18  ;;  %3399 = vmatpush1.bf16.msra.mxu0 %v5317_v8  ;;  %v5323_v18 = vld [vmem:[#allocation8 + $0xa0] ss:$8 sps:$4 sm:$0xff]  }
 0x26e   : > { %4647 = vmatpush3.bf16.msra.mxu1 %v5285_v6  ;;  %4662 = vmatprep.mubr.msk.bf16.mxu1 %vm5880_vm0, %v5879_v7 }
 0x26f   : > { %4648 = vmatprep.subr.bf16.mxu1 %v5879_v7  ;;  %3400 = vmatprep.subr.bf16.mxu0 %v5322_v9 }
 0x271   : > { %3401 = vmatpush1.bf16.msra.mxu0 %v5320_v12 }
 0x272   : > { %4649 = vmatpush3.bf16.msra.mxu1 %v5286_v11  ;;  %3402 = vmatprep.subr.bf16.mxu0 %v5325_v13  ;;  %v5350_v11 = vld [vmem:[#allocation8 + $0x130] ss:$8 sps:$4 sm:$0xff]   ;;  %v5355_v13 = vld [vmem:[#allocation8 + $0x144] ss:$8 sps:$4 sm:$0xff]  }
 0x273   : > { %4650 = vmatprep.subr.bf16.mxu1 %v5879_v7 }
 0x275   : > { %3403 = vmatpush1.bf16.msra.mxu0 %v5323_v18  ;;  %v5358_v18 = vld [vmem:[#allocation8 + $0x154] ss:$8 sps:$4 sm:$0xff]  }
 0x276   : > { %4651 = vmatpush3.bf16.msra.mxu1 %v5287_v10  ;;  %3404 = vmatprep.subr.bf16.mxu0 %v5328_v14  ;;  %v5353_v10 = vld [vmem:[#allocation8 + $0x140] ss:$8 sps:$4 sm:$0xff]   ;;  %v5356_v14 = vld [vmem:[#allocation8 + $0x150] ss:$8 sps:$4 sm:$0xff]  }
 0x277   : > { %4652 = vmatprep.subr.bf16.mxu1 %v5879_v7 }
 0x279   : > { %3405 = vmatpush1.bf16.msra.mxu0 %v5326_v16  ;;  %v5359_v16 = vld [vmem:[#allocation8 + $0x160] ss:$8 sps:$4 sm:$0xff]  }
 0x27a   : > { %4653 = vmatpush3.bf16.msra.mxu1 %v5288_v15  ;;  %3406 = vmatprep.subr.bf16.mxu0 %v5331_v17  ;;  %v5361_v15 = vld [vmem:[#allocation8 + $0x164] ss:$8 sps:$4 sm:$0xff]   ;;  %v5364_v17 = vld [vmem:[#allocation8 + $0x174] ss:$8 sps:$4 sm:$0xff]  }
 0x27b   : > { %4654 = vmatprep.subr.bf16.mxu1 %v5879_v7 }
 0x27d   : > { %3407 = vmatpush1.bf16.msra.mxu0 %v5329_v23  ;;  %v5367_v23 = vld [vmem:[#allocation8 + $0x184] ss:$8 sps:$4 sm:$0xff]  }
 0x27e   : > { %4655 = vmatpush3.bf16.msra.mxu1 %v5289_v19  ;;  %3408 = vmatprep.subr.bf16.mxu0 %v5334_v20  ;;  %v5362_v19 = vld [vmem:[#allocation8 + $0x170] ss:$8 sps:$4 sm:$0xff]   ;;  %v5365_v20 = vld [vmem:[#allocation8 + $0x180] ss:$8 sps:$4 sm:$0xff]  }
 0x27f   : > { %4656 = vmatprep.subr.bf16.mxu1 %v5879_v7 }
 0x281   : > { %3409 = vmatpush1.bf16.msra.mxu0 %v5332_v22  ;;  %v901_v22 = vsub.s32 2, %v6353_v35 }
 0x282   : > { %4657 = vmatpush3.bf16.msra.mxu1 %v5290_v21  ;;  %3410 = vmatprep.subr.bf16.mxu0 %v5337_v24  ;;  %v5370_v21 = vld [vmem:[#allocation8 + $0x194] ss:$8 sps:$4 sm:$0xff]   ;;  %v905_v24 = vsub.s32 3, %v6353_v35 }
 0x283   : > { %4658 = vmatprep.subr.bf16.mxu1 %v5879_v7 }
 0x285   : > { %3411 = vmatpush1.bf16.msra.mxu0 %v5335_v28  ;;  %v5373_v28 = vld [vmem:[#allocation8 + $0x1a4] ss:$8 sps:$4 sm:$0xff]  }
 0x286   : > { %4659 = vmatpush3.bf16.msra.mxu1 %v5291_v26  ;;  %3412 = vmatprep.subr.bf16.mxu0 %v5340_v30  ;;  %v5368_v26 = vld [vmem:[#allocation8 + $0x190] ss:$8 sps:$4 sm:$0xff]   ;;  %v902_v30 = vrot.slane %v6356_v39, %v901_v22 }
 0x287   : > { %4660 = vmatprep.subr.bf16.mxu1 %v5879_v7 }
 0x289   : > { %3413 = vmatpush1.bf16.msra.mxu0 %v5338_v32  ;;  %v5371_v32 = vld [vmem:[#allocation8 + $0x1a0] ss:$8 sps:$4 sm:$0xff]  }
 0x28a   : > { %4661 = vmatpush3.bf16.msra.mxu1 %v5292_v31  ;;  %3423 = vmatprep.subr.bf16.mxu0 %v5343_v33  ;;  %v906_v31 = vrot.slane %v6356_v39, %v905_v24  ;;  %v5401_v24 = vld [vmem:[#allocation8 + $0x240] ss:$8 sps:$4 sm:$0xff]  }
 0x28b   : > { %4606 = vmatprep.subr.bf16.mxu1 %v5413_v58 }
 0x28d   : > { %4663 = vmatmul.mubr.bf16.vlgmr.msra.gmra.mrb[12].mxu1 %v6297_v36 }
 0x28e   : > { %4607 = vmatpush3.bf16.msra.mxu1 %v5414_v59 }
 0x28f   : > { %4608 = vmatprep.subr.bf16.mxu1 %v5415_v60  ;;  %v5388_v60 = vld [vmem:[#allocation8 + $0x1f4] ss:$8 sps:$4 sm:$0xff]  }
 0x2df   : > { %v2488_v43 = vpop.f32.mrb[0].mxu0 }
 0x2e0   : > { %v4706_v36 = vadd.f32 %v2488_v43, %v894_v41  ;;  %v2490_v44 = vpop.f32.mrb[1].mxu0 }
 0x2e1   : > { %v4708_v45 = vadd.f32 %v2490_v44, %v898_v42  ;;  %v2492_v46 = vpop.f32.mrb[2].mxu0 }
 0x2e2   : > { %v4707_v47 = vadd.f32 %v4706_v36, %v6334_v25  ;;  %v2493_v48 = vpop.f32.mrb[3].mxu0  ;;  %v5341_v25 = vld [vmem:[#allocation8 + $0x100] ss:$8 sps:$4 sm:$0xff]  }
 0x2e3   : > { %v4709_v52 = vadd.f32 %v4708_v45, %v6336_v27  ;;  %v5416_v27 = vld [vmem:[#allocation11 + $0x8] sm:$0xff]  }
 0x2e4   : > { %v2865_v49 = vmul.f32 0.70710677, %v4707_v47  ;;  %v2860_v37 = vmul.f32 0.5, %v4707_v47  ;;  %4609 = vmatpush3.bf16.msra.mxu1 %v5416_v27  ;;  %v5374_v47 = vld [vmem:[#allocation8 + $0x1b0] ss:$8 sps:$4 sm:$0xff]  }
 0x2e5   : > { %v2866_v50 = vmul.f32 0.70710677, %v4709_v52  ;;  %v2861_v29 = vmul.f32 0.5, %v4709_v52 }
 0x2e6   : > { %5445 = verf.f32 %v2865_v49  ;;  %v5379_v49 = vld [vmem:[#allocation8 + $0x1c4] ss:$8 sps:$4 sm:$0xff]  }
 0x2e7   : > { %5447 = verf.f32 %v2866_v50 }
 0x2f0   : > { %v5446_v51 = vpop.eup %5445 }
 0x2f1   : > { %v5448_v53 = vpop.eup %5447  ;;  %v2875_v54 = vadd.f32 1.0, %v5446_v51 }
 0x2f2   : > { %v2876_v55 = vadd.f32 1.0, %v5448_v53 }
 0x2f3   : > { %v2880_v56 = vmul.f32 %v2875_v54, %v2860_v37  ;;  %v5377_v37 = vld [vmem:[#allocation8 + $0x1c0] ss:$8 sps:$4 sm:$0xff]   ;;  %v5382_v54 = vld [vmem:[#allocation8 + $0x1d4] ss:$8 sps:$4 sm:$0xff]  }
 0x2f4   : > { %v2881_v57 = vmul.f32 %v2876_v55, %v2861_v29  ;;  %v5380_v29 = vld [vmem:[#allocation8 + $0x1d0] ss:$8 sps:$4 sm:$0xff]   ;;  %v5385_v55 = vld [vmem:[#allocation8 + $0x1e4] ss:$8 sps:$4 sm:$0xff]  }
 0x2f5   : > { %v2885_v62 = vpack.c.bf16 %v2880_v56, %v2880_v56 }
 0x2f6   : > { %v2886_v61 = vpack.c.bf16 %v2881_v57, %v2881_v57  ;;  %v5383_v57 = vld [vmem:[#allocation8 + $0x1e0] ss:$8 sps:$4 sm:$0xff]  }
 0x2f8   : > { %3414 = vmatprep.mubr.bf16.mxu0 %v2886_v61 }
 0x2f9   : > { %3415 = vmatmul.mubr.bf16.vlgmr.msra.gmra.mrb[12].mxu0 %v2885_v62 }
 0x2fa   : > { %3424 = vmatpush1.bf16.msra.mxu0 %v5341_v25 }
 0x2fb   : > { %3425 = vmatprep.subr.bf16.mxu0 %v5346_v63  ;;  %v5386_v63 = vld [vmem:[#allocation8 + $0x1f0] ss:$8 sps:$4 sm:$0xff]  }
 0x2fe   : > { %3426 = vmatpush1.bf16.msra.mxu0 %v5344_v1 }
 0x2ff   : > { %3427 = vmatprep.subr.bf16.mxu0 %v5349_v2  ;;  %v4547_v5 = vpop.f32.mrb[4].mxu0  ;;  %v5391_v2 = vld [vmem:[#allocation8 + $0x204] ss:$8 sps:$4 sm:$0xff]  }
 0x300   : > { %v4548_v6 = vpop.f32.mrb[5].mxu0 }
 0x301   : > { %v6367_v8 = vadd.f32 %v4548_v6, %v4547_v5  ;;  %v4550_v9 = vpop.f32.mrb[6].mxu0  ;;  %v5394_v6 = vld [vmem:[#allocation8 + $0x214] ss:$8 sps:$4 sm:$0xff]  }
 0x302   : > { %3428 = vmatpush1.bf16.msra.mxu0 %v5347_v3  ;;  %v4551_v12 = vpop.f32.mrb[7].mxu0  ;;  %v909_v9 = vsub.s32 4, %v6353_v35 }
 0x303   : > { %3429 = vmatprep.subr.bf16.mxu0 %v5352_v4  ;;  %v5389_v4 = vld [vmem:[#allocation8 + $0x200] ss:$8 sps:$4 sm:$0xff]   ;;  %v5397_v12 = vld [vmem:[#allocation8 + $0x224] ss:$8 sps:$4 sm:$0xff]  }
 0x306   : > { %3430 = vmatpush1.bf16.msra.mxu0 %v5350_v11  ;;  %v5392_v11 = vld [vmem:[#allocation8 + $0x210] ss:$8 sps:$4 sm:$0xff]  }
 0x307   : > { %3431 = vmatprep.subr.bf16.mxu0 %v5355_v13  ;;  %v910_v13 = vrot.slane %v6356_v39, %v909_v9  ;;  %v5406_v39 = vld [vmem:[#allocation8 + $0x254] ss:$8 sps:$4 sm:$0xff]  }
 0x30a   : > { %3432 = vmatpush1.bf16.msra.mxu0 %v5353_v10  ;;  %v5395_v10 = vld [vmem:[#allocation8 + $0x220] ss:$8 sps:$4 sm:$0xff]  }
 0x30b   : > { %3433 = vmatprep.subr.bf16.mxu0 %v5358_v18 }
 0x30e   : > { %3434 = vmatpush1.bf16.msra.mxu0 %v5356_v14  ;;  %v5400_v14 = vld [vmem:[#allocation8 + $0x234] ss:$8 sps:$4 sm:$0xff]  }
 0x30f   : > { %3435 = vmatprep.subr.bf16.mxu0 %v5361_v15 }
 0x312   : > { %3436 = vmatpush1.bf16.msra.mxu0 %v5359_v16  ;;  %v2735_v16 = vadd.f32 %v6367_v8, %v910_v13  ;;  %v5412_v8 = vld [vmem:[#allocation8 + $0x274] ss:$8 sps:$4 sm:$0xff]  }
 0x313   : > { %3437 = vmatprep.subr.bf16.mxu0 %v5364_v17 }
 0x316   : > { %3438 = vmatpush1.bf16.msra.mxu0 %v5362_v19 }
 0x317   : > { %3439 = vmatprep.subr.bf16.mxu0 %v5367_v23 }
 0x31a   : > { %3440 = vmatpush1.bf16.msra.mxu0 %v5365_v20  ;;  %v5398_v20 = vld [vmem:[#allocation8 + $0x230] ss:$8 sps:$4 sm:$0xff]  }
 0x31b   : > { %3441 = vmatprep.subr.bf16.mxu0 %v5370_v21 }
 0x31e   : > { %3442 = vmatpush1.bf16.msra.mxu0 %v5368_v26  ;;  %v5404_v26 = vld [vmem:[#allocation8 + $0x250] ss:$8 sps:$4 sm:$0xff]  }
 0x31f   : > { %3443 = vmatprep.subr.bf16.mxu0 %v5373_v28  ;;  %v4591_v44 = vpop.f32.mrb[8].mxu0  ;;  %v5409_v28 = vld [vmem:[#allocation8 + $0x264] ss:$8 sps:$4 sm:$0xff]  }
 0x320   : > { %v2693_v33 = vpop.f32.mrb[4].mxu1  ;;  %v4592_v48 = vpop.f32.mrb[9].mxu0 }
 0x321   : > { %v4710_v41 = vadd.f32 %v2693_v33, %v902_v30  ;;  %v2695_v42 = vpop.f32.mrb[5].mxu1  ;;  %v4593_v50 = vadd.f32 %v4592_v48, %v4591_v44  ;;  %v4594_v51 = vpop.f32.mrb[10].mxu0  ;;  %v5407_v30 = vld [vmem:[#allocation8 + $0x260] ss:$8 sps:$4 sm:$0xff]   ;;  %v5417_v48 = vld [vmem:[#allocation11 + $0x50] sm:$0xff]  }
 0x322   : > { %v4711_v43 = vadd.f32 %v2695_v42, %v906_v31  ;;  %v2697_v36 = vpop.f32.mrb[6].mxu1  ;;  %3444 = vmatpush1.bf16.msra.mxu0 %v5371_v32  ;;  %v4595_v53 = vpop.f32.mrb[11].mxu0  ;;  %v5410_v31 = vld [vmem:[#allocation8 + $0x270] ss:$8 sps:$4 sm:$0xff]   ;;  %4610 = vmatprep.subr.bf16.mxu1 %v5417_v48  ;;  %v5421_v51 = vld [vmem:[#allocation11 + $0x60] sm:$0xff]  }
 0x323   : > { %v2867_v45 = vmul.f32 0.70710677, %v4710_v41  ;;  %v2698_v46 = vpop.f32.mrb[7].mxu1  ;;  %3445 = vmatprep.subr.bf16.mxu0 %v5376_v34  ;;  %v2862_v62 = vmul.f32 0.5, %v4710_v41  ;;  %v5422_v53 = vld [vmem:[#allocation11 + $0x20] sm:$0xff]  }
 0x324   : > { %v2868_v52 = vmul.f32 0.70710677, %v4711_v43  ;;  %v2863_v61 = vmul.f32 0.5, %v4711_v43 }
 0x325   : > { %5449 = verf.f32 %v2867_v45 }
 0x326   : > { %5451 = verf.f32 %v2868_v52  ;;  %3446 = vmatpush1.bf16.msra.mxu0 %v5374_v47  ;;  %v5418_v52 = vld [vmem:[#allocation11 + $0x10] sm:$0xff]  }
 0x327   : > { %3447 = vmatprep.subr.bf16.mxu0 %v5379_v49  ;;  %4611 = vmatpush3.bf16.msra.mxu1 %v5418_v52  ;;  %v5419_v49 = vld [vmem:[#allocation11 + $0x58] sm:$0xff]  }
 0x328   : > { %4612 = vmatprep.subr.bf16.mxu1 %v5419_v49 }
 0x32a   : > { %3448 = vmatpush1.bf16.msra.mxu0 %v5377_v37  ;;  %v5423_v37 = vld [vmem:[#allocation11 + $0x68] sm:$0xff]  }
 0x32b   : > { %3449 = vmatprep.subr.bf16.mxu0 %v5382_v54  ;;  %v5424_v54 = vld [vmem:[#allocation11 + $0x28] sm:$0xff]  }
 0x32e   : > { %3450 = vmatpush1.bf16.msra.mxu0 %v5380_v29  ;;  %v5425_v29 = vld [vmem:[#allocation11 + $0x70] sm:$0xff]  }
 0x32f   : > { %v5450_v56 = vpop.eup %5449  ;;  %3451 = vmatprep.subr.bf16.mxu0 %v5385_v55  ;;  %v5426_v55 = vld [vmem:[#allocation11 + $0x30] sm:$0xff]  }
 0x330   : > { %v5452_v58 = vpop.eup %5451  ;;  %v2877_v59 = vadd.f32 1.0, %v5450_v56  ;;  %v5427_v56 = vld [vmem:[#allocation11 + $0x78] sm:$0xff]  }
 0x331   : > { %v2878_v25 = vadd.f32 1.0, %v5452_v58  ;;  %v2970_v58 = vld [vmem:[#allocation10] sm:$0x3] }
 0x332   : > { %3452 = vmatpush1.bf16.msra.mxu0 %v5383_v57  ;;  %v2882_v1 = vmul.f32 %v2877_v59, %v2862_v62  ;;  %v5428_v57 = vld [vmem:[#allocation11 + $0x38] sm:$0xff]   ;;  %v2975_v59 = vrot.slane %v2970_v58, %v893_v38 }
 0x333   : > { %v2883_v27 = vmul.f32 %v2878_v25, %v2863_v61  ;;  %3453 = vmatprep.subr.bf16.mxu0 %v5388_v60  ;;  %v2979_v60 = vrot.slane %v2970_v58, %v897_v40  ;;  %v5429_v40 = vld [vmem:[#allocation14] sm:$0xff]  }
 0x334   : > { %v2887_v5 = vpack.c.bf16 %v2882_v1, %v2882_v1 }
 0x335   : > { %v2888_v3 = vpack.c.bf16 %v2883_v27, %v2883_v27 }
 0x336   : > { %3454 = vmatpush1.bf16.msra.mxu0 %v5386_v63 }
 0x337   : > { %3455 = vmatprep.mubr.bf16.mxu0 %v2888_v3  ;;  %3464 = vmatprep.subr.bf16.mxu0 %v5391_v2 }
 0x339   : > { %3456 = vmatmul.mubr.bf16.vlgmr.msra.gmra.mrb[12].mxu0 %v2887_v5 }
 0x33a   : > { %3465 = vmatpush1.bf16.msra.mxu0 %v5389_v4  ;;  %3496 = vmatprep.mubr.bf16.mxu0 %v5878_v0  ;;  %v5403_v0 = vld [vmem:[#allocation8 + $0x244] ss:$8 sps:$4 sm:$0xff]  }
 0x33b   : > { %3466 = vmatprep.subr.bf16.mxu0 %v5394_v6 }
 0x33e   : > { %3467 = vmatpush1.bf16.msra.mxu0 %v5392_v11 }
 0x33f   : > { %3468 = vmatprep.subr.bf16.mxu0 %v5397_v12 }
 0x340   : > { %v4569_v18 = vpop.f32.mrb[8].mxu1 }
 0x341   : > { %v4570_v15 = vpop.f32.mrb[9].mxu1 }
 0x342   : > { %v4571_v17 = vadd.f32 %v4570_v15, %v4569_v18  ;;  %v4572_v19 = vpop.f32.mrb[10].mxu1  ;;  %3469 = vmatpush1.bf16.msra.mxu0 %v5395_v10  ;;  %v5430_v18 = vld [vmem:[#allocation14 + $0x8] sm:$0xff]   ;;  %v5432_v15 = vld [vmem:[#allocation14 + $0x18] sm:$0xff]  }
 0x343   : > { %v4573_v23 = vpop.f32.mrb[11].mxu1  ;;  %3470 = vmatprep.subr.bf16.mxu0 %v5400_v14  ;;  %v5431_v14 = vld [vmem:[#allocation14 + $0x10] sm:$0xff]  }
 0x344   : > { %v2775_v21 = vadd.f32 %v4571_v17, %v2735_v16  ;;  %v5433_v16 = vld [vmem:[#allocation14 + $0x20] sm:$0xff]   ;;  %v5434_v17 = vld [vmem:[#allocation14 + $0x28] sm:$0xff]   ;;  %v5435_v19 = vld [vmem:[#allocation14 + $0x30] sm:$0xff]  }
 0x345   : > { %v5436_v23 = vld [vmem:[#allocation14 + $0x38] sm:$0xff]  }
 0x346   : > { %v2815_v22 = vadd.f32 %v4593_v50, %v2775_v21  ;;  %3471 = vmatpush1.bf16.msra.mxu0 %v5398_v20  ;;  %v5420_v50 = vld [vmem:[#allocation11 + $0x18] sm:$0xff]   ;;  %v4492_v21 = vld [vmem:[#allocation13] ss:$0 sm:$0xff] }
 0x347   : > { %3472 = vmatprep.subr.bf16.mxu0 %v5403_v0  ;;  %4613 = vmatpush3.bf16.msra.mxu1 %v5420_v50 }
 0x348   : > { %4614 = vmatprep.subr.bf16.mxu1 %v5421_v51 }
 0x34a   : > { %3473 = vmatpush1.bf16.msra.mxu0 %v5401_v24 }
 0x34b   : > { %3474 = vmatprep.subr.bf16.mxu0 %v5406_v39  ;;  %4615 = vmatpush3.bf16.msra.mxu1 %v5422_v53 }
 0x34c   : > { %4616 = vmatprep.subr.bf16.mxu1 %v5423_v37 }
 0x34e   : > { %3475 = vmatpush1.bf16.msra.mxu0 %v5404_v26 }
 0x34f   : > { %3476 = vmatprep.subr.bf16.mxu0 %v5409_v28  ;;  %4617 = vmatpush3.bf16.msra.mxu1 %v5424_v54 }
 0x350   : > { %4618 = vmatprep.subr.bf16.mxu1 %v5425_v29 }
 0x352   : > { %3477 = vmatpush1.bf16.msra.mxu0 %v5407_v30 }
 0x353   : > { %3478 = vmatprep.subr.bf16.mxu0 %v5412_v8  ;;  %4619 = vmatpush3.bf16.msra.mxu1 %v5426_v55 }
 0x354   : > { %4620 = vmatprep.subr.bf16.mxu1 %v5427_v56 }
 0x356   : > { %3479 = vmatpush1.bf16.msra.mxu0 %v5410_v31 }
 0x357   : > { %4621 = vmatpush3.bf16.msra.mxu1 %v5428_v57 }
 0x358   : > { %4666 = vmatprep.subr.bf16.mxu1 %v5879_v7 }
 0x360   : > { %v2854_v32 = vpop.f32.mrb[12].mxu1 }
 0x361   : > { %v2855_v33 = vadd.f32 %v2854_v32, %v2815_v22  ;;  %v4664_v34 = vpop.f32.mrb[13].mxu1 }
 0x362   : > { %v2857_v41 = vpop.f32.mrb[14].mxu1 }
 0x363   : > { %v2869_v42 = vmul.f32 0.70710677, %v2855_v33  ;;  %v4665_v43 = vpop.f32.mrb[15].mxu1  ;;  %v2864_v44 = vmul.f32 0.5, %v2855_v33  ;;  %v5437_v33 = vld [vmem:[#allocation17] sm:$0xff]   ;;  %v5438_v41 = vld [vmem:[#allocation17 + $0x8] sm:$0xff]  }
 0x364   : > { %v5440_v43 = vld [vmem:[#allocation17 + $0x18] sm:$0xff]  }
 0x365   : > { %5453 = verf.f32 %v2869_v42  ;;  %v5439_v42 = vld [vmem:[#allocation17 + $0x10] sm:$0xff]  }
 0x36f   : > { %v5454_v36 = vpop.eup %5453 }
 0x370   : > { %v2879_v45 = vadd.f32 1.0, %v5454_v36  ;;  %v5441_v36 = vld [vmem:[#allocation17 + $0x20] sm:$0xff]  }
 0x372   : > { %v2884_v46 = vmul.f32 %v2879_v45, %v2864_v44  ;;  %v5442_v44 = vld [vmem:[#allocation17 + $0x28] sm:$0xff]   ;;  %v5443_v45 = vld [vmem:[#allocation17 + $0x30] sm:$0xff]  }
 0x374   : > { %v2889_v47 = vpack.c.bf16 %v2884_v46, %v2884_v46  ;;  %v5444_v46 = vld [vmem:[#allocation17 + $0x38] sm:$0xff]  }
 0x376   : > { %3497 = vmatmul.mubr.bf16.vlgmr.msra.gmra.mrb[12].mxu0 %v2889_v47  ;;  %v4509_v47 = vld [vmem:[#allocation16] ss:$0 sm:$0xff] }
 0x449   : > { %v3498_v61 = vpop.f32.mrb[12].mxu0 }
 0x44a   : > { %v4712_v25 = vadd.f32 %v3498_v61, %v2975_v59  ;;  %v3500_v62 = vpop.f32.mrb[13].mxu0 }
 0x44b   : > { %v4713_v63 = vadd.f32 %v3500_v62, %v2979_v60  ;;  %v3502_v27 = vpop.f32.mrb[14].mxu0 }
 0x44c   : > { %v3507_v1 = vmul.f32 0.70710677, %v4712_v25  ;;  %v3503_v2 = vpop.f32.mrb[15].mxu0  ;;  %v3505_v6 = vmul.f32 0.5, %v4712_v25 }
 0x44d   : > { %v3508_v3 = vmul.f32 0.70710677, %v4713_v63  ;;  %v3506_v11 = vmul.f32 0.5, %v4713_v63 }
 0x44e   : > { %5455 = verf.f32 %v3507_v1 }
 0x44f   : > { %5457 = verf.f32 %v3508_v3 }
 0x458   : > { %v5456_v4 = vpop.eup %5455 }
 0x459   : > { %v5458_v5 = vpop.eup %5457  ;;  %v3511_v9 = vadd.f32 1.0, %v5456_v4 }
 0x45a   : > { %v3512_v12 = vadd.f32 1.0, %v5458_v5 }
 0x45b   : > { %v3513_v38 = vmul.f32 %v3511_v9, %v3505_v6 }
 0x45c   : > { %v3514_v13 = vmul.f32 %v3512_v12, %v3506_v11 }
 0x45d   : > { %v3515_v10 = vpack.c.bf16 %v3513_v38, %v3513_v38 }
 0x45e   : > { %v3516_v35 = vpack.c.bf16 %v3514_v13, %v3514_v13 }
 0x460   : > { %3684 = vmatprep.mubr.bf16.mxu1 %v3516_v35 }
 0x461   : > { %3685 = vmatmul.mubr.bf16.vlgmr.msra.gmra.mrb[16].mxu1 %v3515_v10 }
 0x462   : > { %4667 = vmatpush3.bf16.msra.mxu1 %v5429_v40  ;;  %4682 = vmatprep.mubr.msk.bf16.mxu1 %vm5880_vm0, %v5879_v7 }
 0x463   : > { %4668 = vmatprep.subr.bf16.mxu1 %v5879_v7 }
 0x466   : > { %4669 = vmatpush3.bf16.msra.mxu1 %v5430_v18 }
 0x467   : > { %4670 = vmatprep.subr.bf16.mxu1 %v5879_v7 }
 0x46a   : > { %4671 = vmatpush3.bf16.msra.mxu1 %v5431_v14 }
 0x46b   : > { %4672 = vmatprep.subr.bf16.mxu1 %v5879_v7 }
 0x46e   : > { %4673 = vmatpush3.bf16.msra.mxu1 %v5432_v15 }
 0x46f   : > { %4674 = vmatprep.subr.bf16.mxu1 %v5879_v7 }
 0x472   : > { %4675 = vmatpush3.bf16.msra.mxu1 %v5433_v16 }
 0x473   : > { %4676 = vmatprep.subr.bf16.mxu1 %v5879_v7 }
 0x476   : > { %4677 = vmatpush3.bf16.msra.mxu1 %v5434_v17 }
 0x477   : > { %4678 = vmatprep.subr.bf16.mxu1 %v5879_v7 }
 0x47a   : > { %4679 = vmatpush3.bf16.msra.mxu1 %v5435_v19 }
 0x47b   : > { %4680 = vmatprep.subr.bf16.mxu1 %v5879_v7 }
 0x47e   : > { %4681 = vmatpush3.bf16.msra.mxu1 %v5436_v23 }
 0x47f   : > { %4686 = vmatprep.subr.bf16.mxu1 %v5879_v7 }
 0x534   : > { %v4622_v20 = vpop.f32.mrb[16].mxu1 }
 0x535   : > { %v4623_v0 = vpop.f32.mrb[17].mxu1 }
 0x536   : > { %v4624_v22 = vadd.f32 %v4623_v0, %v4622_v20  ;;  %v4625_v24 = vpop.f32.mrb[18].mxu1 }
 0x537   : > { %v4626_v39 = vpop.f32.mrb[19].mxu1 }
 0x538   : > { %v3687_v26 = vadd.f32 %v4624_v22, %v4492_v21 }
 0x53a   : > { %v3693_v28 = vmul.f32 0.70710677, %v3687_v26  ;;  %v3692_v8 = vmul.f32 0.5, %v3687_v26 }
 0x53c   : > { %5459 = verf.f32 %v3693_v28 }
 0x546   : > { %v5460_v30 = vpop.eup %5459 }
 0x547   : > { %v3695_v31 = vadd.f32 1.0, %v5460_v30 }
 0x549   : > { %v3696_v32 = vmul.f32 %v3695_v31, %v3692_v8 }
 0x54b   : > { %v3697_v34 = vpack.c.bf16 %v3696_v32, %v3696_v32 }
 0x54d   : > { %4683 = vmatmul.mubr.bf16.vlgmr.msra.gmra.mrb[20].mxu1 %v3697_v34 }
 0x54e   : > { %4687 = vmatpush3.bf16.msra.mxu1 %v5437_v33  ;;  %4702 = vmatprep.mubr.msk.bf16.mxu1 %vm5880_vm0, %v5879_v7 }
 0x54f   : > { %4688 = vmatprep.subr.bf16.mxu1 %v5879_v7 }
 0x552   : > { %4689 = vmatpush3.bf16.msra.mxu1 %v5438_v41 }
 0x553   : > { %4690 = vmatprep.subr.bf16.mxu1 %v5879_v7 }
 0x556   : > { %4691 = vmatpush3.bf16.msra.mxu1 %v5439_v42 }
 0x557   : > { %4692 = vmatprep.subr.bf16.mxu1 %v5879_v7 }
 0x55a   : > { %4693 = vmatpush3.bf16.msra.mxu1 %v5440_v43 }
 0x55b   : > { %4694 = vmatprep.subr.bf16.mxu1 %v5879_v7 }
 0x55e   : > { %4695 = vmatpush3.bf16.msra.mxu1 %v5441_v36 }
 0x55f   : > { %4696 = vmatprep.subr.bf16.mxu1 %v5879_v7 }
 0x562   : > { %4697 = vmatpush3.bf16.msra.mxu1 %v5442_v44 }
 0x563   : > { %4698 = vmatprep.subr.bf16.mxu1 %v5879_v7 }
 0x566   : > { %4699 = vmatpush3.bf16.msra.mxu1 %v5443_v45 }
 0x567   : > { %4700 = vmatprep.subr.bf16.mxu1 %v5879_v7  ;;  %v4518_v7 = vld [vmem:[#allocation19] ss:$0 sm:$0xff] }
 0x56a   : > { %4701 = vmatpush3.bf16.msra.mxu1 %v5444_v46 }
 0x620   : > { %v3803_v48 = vpop.f32.mrb[20].mxu1 }
 0x621   : > { %v3804_v52 = vadd.f32 %v4509_v47, %v3803_v48  ;;  %v4684_v49 = vpop.f32.mrb[21].mxu1 }
 0x622   : > { %v3806_v50 = vpop.f32.mrb[22].mxu1 }
 0x623   : > { %v3810_v51 = vmul.f32 0.70710677, %v3804_v52  ;;  %v4685_v53 = vpop.f32.mrb[23].mxu1  ;;  %v3809_v54 = vmul.f32 0.5, %v3804_v52 }
 0x625   : > { %5461 = verf.f32 %v3810_v51 }
 0x62f   : > { %v5462_v37 = vpop.eup %5461 }
 0x630   : > { %v3812_v29 = vadd.f32 1.0, %v5462_v37 }
 0x632   : > { %v3813_v55 = vmul.f32 %v3812_v29, %v3809_v54 }
 0x634   : > { %v3814_v56 = vpack.c.bf16 %v3813_v55, %v3813_v55 }
 0x636   : > { %4703 = vmatmul.mubr.bf16.vlgmr.msra.gmra.mrb[24].mxu1 %v3814_v56 }
 0x709   : > { %v3920_v57 = vpop.f32.mrb[24].mxu1 }
 0x70a   : > { %v3921_v58 = vadd.f32 %v4518_v7, %v3920_v57  ;;  %v4704_v59 = vpop.f32.mrb[25].mxu1 }
 0x70b   : > { %v3923_v60 = vpop.f32.mrb[26].mxu1 }
 0x70c   : > { %3926 = vst [vmem:[%s537_s29] sm:$0xff] %v3921_v58  ;;  %v4705_v61 = vpop.f32.mrb[27].mxu1 }
 0x70d   : > { %5786 = shalt.err (!%p5783_p8)
}
 0x70e   : > { %s5787_s30 = scalar_lea.hbm %s6406_s3, 128  ;;  %s5791_s11 = scalar_lea.hbm %s6498_s25, 256 }
 0x70f   : > { %p5788_p6 = scmp.ne.s32.totalorder %s6406_s3, %s5787_s30  ;;  %p5792_p5 = scmp.lt.u32.totalorder %s6406_s3, %s6498_s25 }
 0x710   : > { %p5793_p10 = scmp.lt.u32.totalorder %s5791_s11, %s5787_s30  ;;  %p5795_p11 = scmp.lt.u32.totalorder %s5787_s30, %s6406_s3 }
 0x711   : > { %p5789_p2 = pnand %p5788_p6, %p6499_p12 }
 0x712   : > { %p5794_p1 = por %p5793_p10, %p5792_p5 }
 0x713   : > { %p5790_p0 = pneg %p5789_p2 }
 0x714   : > { %p5796_p13 = por %p5795_p11, %p5794_p1 }
 0x716   : > { %p5797_p3 = pnand %p5796_p13, %p5790_p0 }
 0x718   : > { %5800 = shalt.err (!%p5797_p3)
}
 0x719   : > { %4787 = dma.vmem_to_hbm [thread:$0]  (%p6499_p12), %s6408_s24, 128, %s6406_s3, %s3928_s2  }
 0x71a PF: > { %s3953_s15 = sand.u32 1, %s5847_s17   ;;  %p6500_p7 = scmp.ne.s32.totalorder %s6483_s1, 0 }
 0x71b   : > { %p6501_p9 = scmp.ge.s32.totalorder %s5859_s20, 2  ;;  %s3954_s23 = scalar_lea.sflag [#allocation4], %s3953_s15 }
 0x71d   : > { %p4825_p4 = pnand %p6501_p9, %p6500_p7 }
 0x71f   : > { %5842 = dma.done.wait (!%p4825_p4), %s3954_s23, 128  }
 0x720   : > { %5844 = vsyncadd (!%p4825_p4), %s3954_s23, 4294967168  ;;  %p29_p8 = scmp.ge.s32.totalorder %s6195_s27, 4   ;;  %s6502_s17 = smov %s5851_s18 }
 0x721   : > { %s6503_s18 = smov %s5855_s19  ;;  %s6504_s19 = smov %s6206_s13 }
 0x722   : > { %s6505_s20 = smov %s6195_s27  ;;  %31 = sbr.rel (!%p29_p8) target bundleno = 16 (0x10), region = 149 }
 0x729   :  { %3959 = vsyncpa [#allocation3], 1 }
 0x72a   :  { %3961 = vsyncpa [#allocation3 + $0x1], 1 }
 0x72b   :  { %3962 = vsyncpa [#allocation6], 1 }
 0x72c   :  { %3963 = vsyncpa [#allocation9], 1 }
 0x72d   :  { %3964 = vsyncpa [#allocation12], 1 }
 0x72e   :  { %3965 = vsyncpa [#allocation15], 1 }
 0x72f   :  { %3966 = vsyncpa [#allocation18], 1 }
 0x730   :  { %3967 = vsyncpa [#allocation4], 1 }
 0x731   :  { %3969 = vsyncpa [#allocation4 + $0x1], 1 }

</bundles_post_ra>
